<compile_context>
chip_gen: v6e
topology: v6e:2x2x1
jax: 0.10.0
libtpu: 0.0.40
codegen_flags: <defaults>
</compile_context>

<pallas_src>
import functools

import jax
import jax.numpy as jnp
from jax import lax
from jax.experimental import pallas as pl
from jax.experimental.pallas import tpu as pltpu


def _round_up(n, m):
    return ((n + m - 1) // m) * m


# ----------------------------------------------------------------------------
# Kernel: feedforward + masked cross-entropy partial sum for one batch tile,
# accumulated into a single (1, 1) resident output block.
# ----------------------------------------------------------------------------
def _bottleneck_nn_kernel(n_first, n_second, act, total_batch, tb,
                          x_ref, y_ref, *refs):
    # refs = (w0, b0, w1, b1, ..., wL-1, bL-1, loss_ref)
    loss_ref = refs[-1]
    params = refs[:-1]

    i = pl.program_id(0)

    @pl.when(i == 0)
    def _init():
        loss_ref[...] = jnp.zeros_like(loss_ref)

    h = x_ref[...].astype(jnp.float32)                 # (TB, in_features)
    n_total = n_first + n_second
    for li in range(n_total):
        w = params[2 * li][...]                        # (in, out), VMEM-resident
        b = params[2 * li + 1][...]                    # (1, out)
        h = jnp.dot(h, w, preferred_element_type=jnp.float32) + b
        last_of_first = (li == n_first - 1)
        last_of_second = (li == n_total - 1)
        if not (last_of_first or last_of_second):
            h = act(h)

    logits = h                                         # (TB, C) float32
    # numerically-stable log-sum-exp
    m = jnp.max(logits, axis=1, keepdims=True)
    lse = m + jnp.log(jnp.sum(jnp.exp(logits - m), axis=1, keepdims=True))

    y = y_ref[...]                                     # (TB, 1) int32
    cls = lax.broadcasted_iota(jnp.int32, logits.shape, 1)
    picked = jnp.sum(jnp.where(cls == y, logits, 0.0), axis=1, keepdims=True)
    per_row = lse - picked                             # (TB, 1)

    # Mask rows belonging to a partial last block (batch not a multiple of TB).
    row = i * tb + lax.broadcasted_iota(jnp.int32, (tb, 1), 0)
    masked = jnp.where(row < total_batch, per_row, 0.0)

    # In-kernel reduction: accumulate the tile's sum into the (1,1) output.
    loss_ref[...] = loss_ref[...] + jnp.sum(masked)

    @pl.when(i == pl.num_programs(0) - 1)
    def _finalize():
        loss_ref[...] = loss_ref[...] / jnp.float32(total_batch)


# ----------------------------------------------------------------------------
# One-time parameter preprocessing (hoisted out of the hot path).
# ----------------------------------------------------------------------------
def prepare_params(first_half_params, second_half_params):
    """torch-layout (out,in)/(out,) params -> flat tuple of (in,out)/(1,out)."""
    flat = []
    for (w, b) in list(first_half_params) + list(second_half_params):
        flat.append(jnp.asarray(w, jnp.float32).T)        # (in, out)
        flat.append(jnp.asarray(b, jnp.float32).reshape(1, -1))
    return tuple(flat), len(first_half_params), len(second_half_params)


# ----------------------------------------------------------------------------
# Builder: returns a jitted loss(x, y, *flat_params) function.
# ----------------------------------------------------------------------------
def make_bottleneck_nn_loss_fn(n_first, n_second, act=jax.nn.relu,
                               max_tile_rows=4096):
    def forward(x, y, *flat_params):
        x = jnp.asarray(x, jnp.float32)
        y2 = jnp.asarray(y, jnp.int32).reshape(-1, 1)
        batch = x.shape[0]

        # One big tile whenever it fits (grid=(1,)); always a multiple of 8.
        tb_eff = min(_round_up(batch, 8), _round_up(max_tile_rows, 8))
        grid = (pl.cdiv(batch, tb_eff),)

        kernel = functools.partial(
            _bottleneck_nn_kernel, n_first, n_second, act, batch, tb_eff)

        in_specs = [
            pl.BlockSpec((tb_eff, x.shape[1]), lambda i: (i, 0)),   # x tile
            pl.BlockSpec((tb_eff, 1), lambda i: (i, 0)),            # y tile
        ]
        for p in flat_params:                                       # resident weights
            in_specs.append(pl.BlockSpec(p.shape, lambda i: (0, 0)))

        loss2d = pl.pallas_call(
            kernel,
            out_shape=jax.ShapeDtypeStruct((1, 1), jnp.float32),
            grid=grid,
            in_specs=in_specs,
            # Accumulator output: same (1,1) block for every grid step.
            out_specs=pl.BlockSpec((1, 1), lambda i: (0, 0)),
            compiler_params=pltpu.CompilerParams(
                dimension_semantics=("arbitrary",)),   # output-resident accum
        )(x, y2, *flat_params)

        return loss2d[0, 0]

    return jax.jit(forward)


# ----------------------------------------------------------------------------
# Pure-JAX reference (correctness check).
# ----------------------------------------------------------------------------
def _reference_forward(x, y, first_half_params, second_half_params, act=jax.nn.relu):
    h = jnp.asarray(x, jnp.float32)
    fh = list(first_half_params)
    sh = list(second_half_params)
    for i, (w, b) in enumerate(fh):
        h = h @ w.T + b
        if i != len(fh) - 1:
            h = act(h)
    for i, (w, b) in enumerate(sh):
        h = h @ w.T + b
        if i != len(sh) - 1:
            h = act(h)
    logits = h
    logp = jax.nn.log_softmax(logits, axis=1)
    nll = -jnp.take_along_axis(logp, jnp.asarray(y, jnp.int32)[:, None], axis=1)
    return jnp.mean(nll)


# ----------------------------------------------------------------------------
# Deterministic parameter init (torch.nn.Linear-style uniform init).
# ----------------------------------------------------------------------------
def _init_linear(key, in_f, out_f):
    k1, k2 = jax.random.split(key)
    bound = 1.0 / jnp.sqrt(jnp.float32(in_f))
    w = jax.random.uniform(k1, (out_f, in_f), jnp.float32, -bound, bound)  # torch (out, in)
    b = jax.random.uniform(k2, (out_f,), jnp.float32, -bound, bound)
    return w, b


if __name__ == "__main__":
    # hyper_config analog (viz_2D classification):
    #   act_func    = relu
    #   first_half  = [[2, 32], [32, 32], [32, 2]]   (2-D input -> 2-D bottleneck)
    #   second_half = [[2, 32], [32, 32], [32, 2]]   (bottleneck -> 2 classes)
    arch_1 = [(2, 32), (32, 32), (32, 2)]
    arch_2 = [(2, 32), (32, 32), (32, 2)]
    batch = 512   # one batch tile -> grid=(1,)

    key = jax.random.PRNGKey(0)
    keys = jax.random.split(key, len(arch_1) + len(arch_2) + 2)

    first_half_params = [_init_linear(keys[i], a, b) for i, (a, b) in enumerate(arch_1)]
    second_half_params = [
        _init_linear(keys[len(arch_1) + i], a, b) for i, (a, b) in enumerate(arch_2)
    ]

    x = jax.random.normal(keys[-2], (batch, arch_1[0][0]), jnp.float32)
    y = jax.random.randint(keys[-1], (batch,), 0, arch_2[-1][1], jnp.int32)

    # Hoisted, one-time parameter packing; jitted forward.
    flat_params, n_first, n_second = prepare_params(first_half_params, second_half_params)
    loss_fn = make_bottleneck_nn_loss_fn(n_first, n_second, act=jax.nn.relu)

    loss = loss_fn(x, y, *flat_params)
    loss = jax.block_until_ready(loss)

    ref = _reference_forward(x, y, first_half_params, second_half_params)
    assert jnp.allclose(loss, ref, atol=1e-4, rtol=1e-4), (loss, ref)

    print("KERNEL_OK")
</pallas_src>

<mosaic_0001>
module attributes {stable_mosaic.version = 11 : i64} {
  func.func @_bottleneck_nn_kernel(%arg0: i32, %arg1: memref<512x2xf32, #tpu.memory_space<vmem>>, %arg2: memref<512x1xi32, #tpu.memory_space<vmem>>, %arg3: memref<2x32xf32, #tpu.memory_space<vmem>>, %arg4: memref<1x32xf32, #tpu.memory_space<vmem>>, %arg5: memref<32x32xf32, #tpu.memory_space<vmem>>, %arg6: memref<1x32xf32, #tpu.memory_space<vmem>>, %arg7: memref<32x2xf32, #tpu.memory_space<vmem>>, %arg8: memref<1x2xf32, #tpu.memory_space<vmem>>, %arg9: memref<2x32xf32, #tpu.memory_space<vmem>>, %arg10: memref<1x32xf32, #tpu.memory_space<vmem>>, %arg11: memref<32x32xf32, #tpu.memory_space<vmem>>, %arg12: memref<1x32xf32, #tpu.memory_space<vmem>>, %arg13: memref<32x2xf32, #tpu.memory_space<vmem>>, %arg14: memref<1x2xf32, #tpu.memory_space<vmem>>, %arg15: memref<1x1xf32, #tpu.memory_space<vmem>>) attributes {dimension_semantics = [#tpu.dimension_semantics<arbitrary>], iteration_bounds = array<i64: 1>, scalar_prefetch = 0 : i64, scratch_operands = 0 : i64, tpu.core_type = #tpu.core_type<tc>, window_params = [{transform_indices = @transform_0, window_bounds = array<i64: 512, 2>}, {transform_indices = @transform_1, window_bounds = array<i64: 512, 1>}, {pipeline_mode = #tpu.pipeline_mode<synchronous>, transform_indices = @transform_2, window_bounds = array<i64: 2, 32>}, {pipeline_mode = #tpu.pipeline_mode<synchronous>, transform_indices = @transform_3, window_bounds = array<i64: 1, 32>}, {pipeline_mode = #tpu.pipeline_mode<synchronous>, transform_indices = @transform_4, window_bounds = array<i64: 32, 32>}, {pipeline_mode = #tpu.pipeline_mode<synchronous>, transform_indices = @transform_5, window_bounds = array<i64: 1, 32>}, {pipeline_mode = #tpu.pipeline_mode<synchronous>, transform_indices = @transform_6, window_bounds = array<i64: 32, 2>}, {pipeline_mode = #tpu.pipeline_mode<synchronous>, transform_indices = @transform_7, window_bounds = array<i64: 1, 2>}, {pipeline_mode = #tpu.pipeline_mode<synchronous>, transform_indices = @transform_8, window_bounds = array<i64: 2, 32>}, {pipeline_mode = #tpu.pipeline_mode<synchronous>, transform_indices = @transform_9, window_bounds = array<i64: 1, 32>}, {pipeline_mode = #tpu.pipeline_mode<synchronous>, transform_indices = @transform_10, window_bounds = array<i64: 32, 32>}, {pipeline_mode = #tpu.pipeline_mode<synchronous>, transform_indices = @transform_11, window_bounds = array<i64: 1, 32>}, {pipeline_mode = #tpu.pipeline_mode<synchronous>, transform_indices = @transform_12, window_bounds = array<i64: 32, 2>}, {pipeline_mode = #tpu.pipeline_mode<synchronous>, transform_indices = @transform_13, window_bounds = array<i64: 1, 2>}, {pipeline_mode = #tpu.pipeline_mode<synchronous>, transform_indices = @transform_14, window_bounds = array<i64: 1, 1>}]} {
    %c0_i32 = arith.constant 0 : i32
    %0 = arith.cmpi eq, %arg0, %c0_i32 : i32
    %1 = arith.extui %0 : i1 to i32
    %c0_i32_0 = arith.constant 0 : i32
    %2 = arith.cmpi ne, %1, %c0_i32_0 : i32
    scf.if %2 {
      %cst_50 = arith.constant 0.000000e+00 : f32
      %79 = vector.broadcast %cst_50 : f32 to vector<1x1xf32>
      %c0_51 = arith.constant 0 : index
      %c0_52 = arith.constant 0 : index
      %80 = vector.load %arg15[%c0_51, %c0_52] : memref<1x1xf32, #tpu.memory_space<vmem>>, vector<1x1xf32>
      tpu.vector_store %arg15[%c0_51, %c0_52], %79 {strides = array<i32>} : memref<1x1xf32, #tpu.memory_space<vmem>>, vector<1x1xf32>,
    } else {
    }
    %c0 = arith.constant 0 : index
    %c0_1 = arith.constant 0 : index
    %3 = vector.load %arg1[%c0, %c0_1] : memref<512x2xf32, #tpu.memory_space<vmem>>, vector<512x2xf32>
    %c0_2 = arith.constant 0 : index
    %c0_3 = arith.constant 0 : index
    %4 = vector.load %arg3[%c0_2, %c0_3] : memref<2x32xf32, #tpu.memory_space<vmem>>, vector<2x32xf32>
    %c0_4 = arith.constant 0 : index
    %c0_5 = arith.constant 0 : index
    %5 = vector.load %arg4[%c0_4, %c0_5] : memref<1x32xf32, #tpu.memory_space<vmem>>, vector<1x32xf32>
    %cst = arith.constant dense<0.000000e+00> : vector<512x32xf32>
    %6 = tpu.matmul %3, %4, %cst {dimension_numbers = #tpu.dot_dimension_numbers<[1], [0], [0], [1], [0, 0, 1, 1], [], []>} : vector<512x2xf32>, vector<2x32xf32>, vector<512x32xf32> -> vector<512x32xf32>
    %7 = vector.broadcast %5 : vector<1x32xf32> to vector<512x32xf32>
    %8 = arith.addf %6, %7 : vector<512x32xf32>
    %cst_6 = arith.constant 0.000000e+00 : f32
    %9 = vector.broadcast %cst_6 : f32 to vector<512x32xf32>
    %10 = arith.maximumf %8, %9 : vector<512x32xf32>
    %c0_7 = arith.constant 0 : index
    %c0_8 = arith.constant 0 : index
    %11 = vector.load %arg5[%c0_7, %c0_8] : memref<32x32xf32, #tpu.memory_space<vmem>>, vector<32x32xf32>
    %c0_9 = arith.constant 0 : index
    %c0_10 = arith.constant 0 : index
    %12 = vector.load %arg6[%c0_9, %c0_10] : memref<1x32xf32, #tpu.memory_space<vmem>>, vector<1x32xf32>
    %cst_11 = arith.constant dense<0.000000e+00> : vector<512x32xf32>
    %13 = tpu.matmul %10, %11, %cst_11 {dimension_numbers = #tpu.dot_dimension_numbers<[1], [0], [0], [1], [0, 0, 1, 1], [], []>} : vector<512x32xf32>, vector<32x32xf32>, vector<512x32xf32> -> vector<512x32xf32>
    %14 = vector.broadcast %12 : vector<1x32xf32> to vector<512x32xf32>
    %15 = arith.addf %13, %14 : vector<512x32xf32>
    %cst_12 = arith.constant 0.000000e+00 : f32
    %16 = vector.broadcast %cst_12 : f32 to vector<512x32xf32>
    %17 = arith.maximumf %15, %16 : vector<512x32xf32>
    %c0_13 = arith.constant 0 : index
    %c0_14 = arith.constant 0 : index
    %18 = vector.load %arg7[%c0_13, %c0_14] : memref<32x2xf32, #tpu.memory_space<vmem>>, vector<32x2xf32>
    %c0_15 = arith.constant 0 : index
    %c0_16 = arith.constant 0 : index
    %19 = vector.load %arg8[%c0_15, %c0_16] : memref<1x2xf32, #tpu.memory_space<vmem>>, vector<1x2xf32>
    %cst_17 = arith.constant dense<0.000000e+00> : vector<512x2xf32>
    %20 = tpu.matmul %17, %18, %cst_17 {dimension_numbers = #tpu.dot_dimension_numbers<[1], [0], [0], [1], [0, 0, 1, 1], [], []>} : vector<512x32xf32>, vector<32x2xf32>, vector<512x2xf32> -> vector<512x2xf32>
    %21 = vector.broadcast %19 : vector<1x2xf32> to vector<512x2xf32>
    %22 = arith.addf %20, %21 : vector<512x2xf32>
    %c0_18 = arith.constant 0 : index
    %c0_19 = arith.constant 0 : index
    %23 = vector.load %arg9[%c0_18, %c0_19] : memref<2x32xf32, #tpu.memory_space<vmem>>, vector<2x32xf32>
    %c0_20 = arith.constant 0 : index
    %c0_21 = arith.constant 0 : index
    %24 = vector.load %arg10[%c0_20, %c0_21] : memref<1x32xf32, #tpu.memory_space<vmem>>, vector<1x32xf32>
    %cst_22 = arith.constant dense<0.000000e+00> : vector<512x32xf32>
    %25 = tpu.matmul %22, %23, %cst_22 {dimension_numbers = #tpu.dot_dimension_numbers<[1], [0], [0], [1], [0, 0, 1, 1], [], []>} : vector<512x2xf32>, vector<2x32xf32>, vector<512x32xf32> -> vector<512x32xf32>
    %26 = vector.broadcast %24 : vector<1x32xf32> to vector<512x32xf32>
    %27 = arith.addf %25, %26 : vector<512x32xf32>
    %cst_23 = arith.constant 0.000000e+00 : f32
    %28 = vector.broadcast %cst_23 : f32 to vector<512x32xf32>
    %29 = arith.maximumf %27, %28 : vector<512x32xf32>
    %c0_24 = arith.constant 0 : index
    %c0_25 = arith.constant 0 : index
    %30 = vector.load %arg11[%c0_24, %c0_25] : memref<32x32xf32, #tpu.memory_space<vmem>>, vector<32x32xf32>
    %c0_26 = arith.constant 0 : index
    %c0_27 = arith.constant 0 : index
    %31 = vector.load %arg12[%c0_26, %c0_27] : memref<1x32xf32, #tpu.memory_space<vmem>>, vector<1x32xf32>
    %cst_28 = arith.constant dense<0.000000e+00> : vector<512x32xf32>
    %32 = tpu.matmul %29, %30, %cst_28 {dimension_numbers = #tpu.dot_dimension_numbers<[1], [0], [0], [1], [0, 0, 1, 1], [], []>} : vector<512x32xf32>, vector<32x32xf32>, vector<512x32xf32> -> vector<512x32xf32>
    %33 = vector.broadcast %31 : vector<1x32xf32> to vector<512x32xf32>
    %34 = arith.addf %32, %33 : vector<512x32xf32>
    %cst_29 = arith.constant 0.000000e+00 : f32
    %35 = vector.broadcast %cst_29 : f32 to vector<512x32xf32>
    %36 = arith.maximumf %34, %35 : vector<512x32xf32>
    %c0_30 = arith.constant 0 : index
    %c0_31 = arith.constant 0 : index
    %37 = vector.load %arg13[%c0_30, %c0_31] : memref<32x2xf32, #tpu.memory_space<vmem>>, vector<32x2xf32>
    %c0_32 = arith.constant 0 : index
    %c0_33 = arith.constant 0 : index
    %38 = vector.load %arg14[%c0_32, %c0_33] : memref<1x2xf32, #tpu.memory_space<vmem>>, vector<1x2xf32>
    %cst_34 = arith.constant dense<0.000000e+00> : vector<512x2xf32>
    %39 = tpu.matmul %36, %37, %cst_34 {dimension_numbers = #tpu.dot_dimension_numbers<[1], [0], [0], [1], [0, 0, 1, 1], [], []>} : vector<512x32xf32>, vector<32x2xf32>, vector<512x2xf32> -> vector<512x2xf32>
    %40 = vector.broadcast %38 : vector<1x2xf32> to vector<512x2xf32>
    %41 = arith.addf %39, %40 : vector<512x2xf32>
    %cst_35 = arith.constant dense<0xFF800000> : vector<512xf32>
    %42 = vector.multi_reduction <maximumf>, %41, %cst_35 [1] : vector<512x2xf32> to vector<512xf32>
    %43 = vector.shape_cast %42 : vector<512xf32> to vector<512x1xf32>
    %44 = vector.broadcast %43 : vector<512x1xf32> to vector<512x2xf32>
    %45 = arith.subf %41, %44 : vector<512x2xf32>
    %46 = math.exp %45 : vector<512x2xf32>
    %cst_36 = arith.constant dense<0.000000e+00> : vector<512xf32>
    %47 = vector.multi_reduction <add>, %46, %cst_36 [1] : vector<512x2xf32> to vector<512xf32>
    %48 = vector.shape_cast %47 : vector<512xf32> to vector<512x1xf32>
    %49 = math.log %48 : vector<512x1xf32>
    %50 = arith.addf %43, %49 : vector<512x1xf32>
    %c0_37 = arith.constant 0 : index
    %c0_38 = arith.constant 0 : index
    %51 = vector.load %arg2[%c0_37, %c0_38] : memref<512x1xi32, #tpu.memory_space<vmem>>, vector<512x1xi32>
    %52 = tpu.iota {dimensions = array<i32: 1>} : vector<512x2xi32>
    %53 = vector.broadcast %51 : vector<512x1xi32> to vector<512x2xi32>
    %54 = arith.cmpi eq, %52, %53 : vector<512x2xi32>
    %cst_39 = arith.constant 0.000000e+00 : f32
    %55 = vector.broadcast %cst_39 : f32 to vector<512x2xf32>
    %56 = arith.select %54, %41, %55 : vector<512x2xi1>, vector<512x2xf32>
    %cst_40 = arith.constant dense<0.000000e+00> : vector<512xf32>
    %57 = vector.multi_reduction <add>, %56, %cst_40 [1] : vector<512x2xf32> to vector<512xf32>
    %58 = vector.shape_cast %57 : vector<512xf32> to vector<512x1xf32>
    %59 = arith.subf %50, %58 : vector<512x1xf32>
    %c512_i32 = arith.constant 512 : i32
    %60 = arith.muli %arg0, %c512_i32 : i32
    %61 = tpu.iota {dimensions = array<i32: 0>} : vector<512x1xi32>
    %62 = vector.broadcast %60 : i32 to vector<512x1xi32>
    %63 = arith.addi %62, %61 : vector<512x1xi32>
    %c512_i32_41 = arith.constant 512 : i32
    %64 = vector.broadcast %c512_i32_41 : i32 to vector<512x1xi32>
    %65 = arith.cmpi slt, %63, %64 : vector<512x1xi32>
    %cst_42 = arith.constant 0.000000e+00 : f32
    %66 = vector.broadcast %cst_42 : f32 to vector<512x1xf32>
    %67 = arith.select %65, %59, %66 : vector<512x1xi1>, vector<512x1xf32>
    %c0_43 = arith.constant 0 : index
    %c0_44 = arith.constant 0 : index
    %68 = vector.load %arg15[%c0_43, %c0_44] : memref<1x1xf32, #tpu.memory_space<vmem>>, vector<1x1xf32>
    %69 = vector.shape_cast %67 : vector<512x1xf32> to vector<1x512x1xf32>
    %cst_45 = arith.constant dense<0.000000e+00> : vector<1xf32>
    %70 = vector.multi_reduction <add>, %69, %cst_45 [1, 2] : vector<1x512x1xf32> to vector<1xf32>
    %71 = vector.shape_cast %70 : vector<1xf32> to vector<1x1x1xf32>
    %72 = vector.extract %71[0, 0, 0] : f32 from vector<1x1x1xf32>
    %73 = vector.broadcast %72 : f32 to vector<1x1xf32>
    %74 = arith.addf %68, %73 : vector<1x1xf32>
    %c0_46 = arith.constant 0 : index
    %c0_47 = arith.constant 0 : index
    %75 = vector.load %arg15[%c0_46, %c0_47] : memref<1x1xf32, #tpu.memory_space<vmem>>, vector<1x1xf32>
    tpu.vector_store %arg15[%c0_46, %c0_47], %74 {strides = array<i32>} : memref<1x1xf32, #tpu.memory_space<vmem>>, vector<1x1xf32>,
    %c0_i32_48 = arith.constant 0 : i32
    %76 = arith.cmpi eq, %arg0, %c0_i32_48 : i32
    %77 = arith.extui %76 : i1 to i32
    %c0_i32_49 = arith.constant 0 : i32
    %78 = arith.cmpi ne, %77, %c0_i32_49 : i32
    scf.if %78 {
      %c0_50 = arith.constant 0 : index
      %c0_51 = arith.constant 0 : index
      %79 = vector.load %arg15[%c0_50, %c0_51] : memref<1x1xf32, #tpu.memory_space<vmem>>, vector<1x1xf32>
      %cst_52 = arith.constant 5.120000e+02 : f32
      %80 = vector.broadcast %cst_52 : f32 to vector<1x1xf32>
      %81 = arith.divf %79, %80 : vector<1x1xf32>
      %c0_53 = arith.constant 0 : index
      %c0_54 = arith.constant 0 : index
      %82 = vector.load %arg15[%c0_53, %c0_54] : memref<1x1xf32, #tpu.memory_space<vmem>>, vector<1x1xf32>
      tpu.vector_store %arg15[%c0_53, %c0_54], %81 {strides = array<i32>} : memref<1x1xf32, #tpu.memory_space<vmem>>, vector<1x1xf32>,
    } else {
    }
    return
  }
  func.func @transform_0(%arg0: i32) -> (i32, i32) {
    %c0_i32 = arith.constant 0 : i32
    %c0_i32_0 = arith.constant 0 : i32
    return %arg0, %c0_i32 : i32, i32
  }
  func.func @transform_1(%arg0: i32) -> (i32, i32) {
    %c0_i32 = arith.constant 0 : i32
    %c0_i32_0 = arith.constant 0 : i32
    return %arg0, %c0_i32 : i32, i32
  }
  func.func @transform_2(%arg0: i32) -> (i32, i32) {
    %c0_i32 = arith.constant 0 : i32
    %c0_i32_0 = arith.constant 0 : i32
    %c0_i32_1 = arith.constant 0 : i32
    return %c0_i32, %c0_i32_0 : i32, i32
  }
  func.func @transform_3(%arg0: i32) -> (i32, i32) {
    %c0_i32 = arith.constant 0 : i32
    %c0_i32_0 = arith.constant 0 : i32
    %c0_i32_1 = arith.constant 0 : i32
    return %c0_i32, %c0_i32_0 : i32, i32
  }
  func.func @transform_4(%arg0: i32) -> (i32, i32) {
    %c0_i32 = arith.constant 0 : i32
    %c0_i32_0 = arith.constant 0 : i32
    %c0_i32_1 = arith.constant 0 : i32
    return %c0_i32, %c0_i32_0 : i32, i32
  }
  func.func @transform_5(%arg0: i32) -> (i32, i32) {
    %c0_i32 = arith.constant 0 : i32
    %c0_i32_0 = arith.constant 0 : i32
    %c0_i32_1 = arith.constant 0 : i32
    return %c0_i32, %c0_i32_0 : i32, i32
  }
  func.func @transform_6(%arg0: i32) -> (i32, i32) {
    %c0_i32 = arith.constant 0 : i32
    %c0_i32_0 = arith.constant 0 : i32
    %c0_i32_1 = arith.constant 0 : i32
    return %c0_i32, %c0_i32_0 : i32, i32
  }
  func.func @transform_7(%arg0: i32) -> (i32, i32) {
    %c0_i32 = arith.constant 0 : i32
    %c0_i32_0 = arith.constant 0 : i32
    %c0_i32_1 = arith.constant 0 : i32
    return %c0_i32, %c0_i32_0 : i32, i32
  }
  func.func @transform_8(%arg0: i32) -> (i32, i32) {
    %c0_i32 = arith.constant 0 : i32
    %c0_i32_0 = arith.constant 0 : i32
    %c0_i32_1 = arith.constant 0 : i32
    return %c0_i32, %c0_i32_0 : i32, i32
  }
  func.func @transform_9(%arg0: i32) -> (i32, i32) {
    %c0_i32 = arith.constant 0 : i32
    %c0_i32_0 = arith.constant 0 : i32
    %c0_i32_1 = arith.constant 0 : i32
    return %c0_i32, %c0_i32_0 : i32, i32
  }
  func.func @transform_10(%arg0: i32) -> (i32, i32) {
    %c0_i32 = arith.constant 0 : i32
    %c0_i32_0 = arith.constant 0 : i32
    %c0_i32_1 = arith.constant 0 : i32
    return %c0_i32, %c0_i32_0 : i32, i32
  }
  func.func @transform_11(%arg0: i32) -> (i32, i32) {
    %c0_i32 = arith.constant 0 : i32
    %c0_i32_0 = arith.constant 0 : i32
    %c0_i32_1 = arith.constant 0 : i32
    return %c0_i32, %c0_i32_0 : i32, i32
  }
  func.func @transform_12(%arg0: i32) -> (i32, i32) {
    %c0_i32 = arith.constant 0 : i32
    %c0_i32_0 = arith.constant 0 : i32
    %c0_i32_1 = arith.constant 0 : i32
    return %c0_i32, %c0_i32_0 : i32, i32
  }
  func.func @transform_13(%arg0: i32) -> (i32, i32) {
    %c0_i32 = arith.constant 0 : i32
    %c0_i32_0 = arith.constant 0 : i32
    %c0_i32_1 = arith.constant 0 : i32
    return %c0_i32, %c0_i32_0 : i32, i32
  }
  func.func @transform_14(%arg0: i32) -> (i32, i32) {
    %c0_i32 = arith.constant 0 : i32
    %c0_i32_0 = arith.constant 0 : i32
    %c0_i32_1 = arith.constant 0 : i32
    return %c0_i32, %c0_i32_0 : i32, i32
  }
}

</mosaic_0001>

<bundles_post_ra>
// kernel: forward.1
= control target key start
LH: loop header
LB: loop body
LE: loop exit
PB: predicated region body
PF: predicated region fallthrough
CT: control target
= control target key end

     0   :  { %vm319_vm0 = vcmask 1041408   ;;  %vm126_vm1 = vcmask 15360   ;;  %s10118_s0 = inlined_call_operand.vmem [shape: f32[512,2], index: 0, kind: input, shape index: {}]   ;;  %s10119_s1 = inlined_call_operand.vmem [shape: s32[512,1], index: 1, kind: input, shape index: {}]   ;;  %s10120_s2 = inlined_call_operand.vmem [shape: f32[2,32], index: 2, kind: input, shape index: {}]   ;;  %s10121_s3 = inlined_call_operand.vmem [shape: f32[1,32], index: 3, kind: input, shape index: {}]   ;;  %s10122_s4 = inlined_call_operand.vmem [shape: f32[32,32], index: 4, kind: input, shape index: {}]   ;;  %s10123_s5 = inlined_call_operand.vmem [shape: f32[1,32], index: 5, kind: input, shape index: {}]   ;;  %s10124_s6 = inlined_call_operand.vmem [shape: f32[32,2], index: 6, kind: input, shape index: {}]   ;;  %s10125_s7 = inlined_call_operand.vmem [shape: f32[1,2], index: 7, kind: input, shape index: {}]   ;;  %s10126_s8 = inlined_call_operand.vmem [shape: f32[2,32], index: 8, kind: input, shape index: {}]   ;;  %s10127_s9 = inlined_call_operand.vmem [shape: f32[1,32], index: 9, kind: input, shape index: {}]   ;;  %s10128_s10 = inlined_call_operand.vmem [shape: f32[32,32], index: 10, kind: input, shape index: {}]   ;;  %s10129_s11 = inlined_call_operand.vmem [shape: f32[1,32], index: 11, kind: input, shape index: {}]   ;;  %s10130_s12 = inlined_call_operand.vmem [shape: f32[32,2], index: 12, kind: input, shape index: {}]   ;;  %s10131_s13 = inlined_call_operand.vmem [shape: f32[1,2], index: 13, kind: input, shape index: {}]   ;;  %s10132_s14 = inlined_call_operand.hbm [shape: f32[1,1], index: 14, kind: output, shape index: {}]  }
   0x1   :  { %v118_v0 = vld [vmem:[%s10120_s2] sm:$0x3]  ;;  %v55_v2 = vld [vmem:[%s10118_s0 + $0x8] sm:$0xff]  ;;  %v56_v3 = vld [vmem:[%s10118_s0 + $0x10] sm:$0xff] }
   0x2   :  { %v54_v1 = vld [vmem:[%s10118_s0] sm:$0xff]  ;;  %6531 = vmatprep.subr.msk.mxu0 %vm319_vm0, %v118_v0  ;;  %v57_v4 = vld [vmem:[%s10118_s0 + $0x18] sm:$0xff]  ;;  %v59_v6 = vld [vmem:[%s10118_s0 + $0x28] sm:$0xff] }
   0x3   :  { %6533 = vmatprep.mubr.msk.f32.mxu0 %vm126_vm1, %v54_v1  ;;  %6532 = vmatpush3.msk.msra.mxu0 %vm319_vm0, %v118_v0  ;;  %v58_v5 = vld [vmem:[%s10118_s0 + $0x20] sm:$0xff]  ;;  %v60_v7 = vld [vmem:[%s10118_s0 + $0x30] sm:$0xff]  ;;  %v61_v8 = vld [vmem:[%s10118_s0 + $0x38] sm:$0xff] }
   0x4   :  { %6534 = vmatmul.mubr.msk.f32.vlgmr.msra.gmra.mxu0 %vm126_vm1, %v55_v2  ;;  %v62_v9 = vld [vmem:[%s10118_s0 + $0x40] sm:$0xff]  ;;  %v63_v10 = vld [vmem:[%s10118_s0 + $0x48] sm:$0xff]  ;;  %v64_v11 = vld [vmem:[%s10118_s0 + $0x50] sm:$0xff] }
   0x5   :  { %6536 = vmatprep.mubr.msk.f32.mxu0 %vm126_vm1, %v56_v3  ;;  %v65_v12 = vld [vmem:[%s10118_s0 + $0x58] sm:$0xff]  ;;  %v66_v13 = vld [vmem:[%s10118_s0 + $0x60] sm:$0xff] }
   0x8   :  { %6537 = vmatmul.mubr.msk.f32.gmra.mxu0 %vm126_vm1, %v57_v4 }
   0x9   :  { %6539 = vmatprep.mubr.msk.f32.mxu0 %vm126_vm1, %v58_v5 }
   0xc   :  { %6540 = vmatmul.mubr.msk.f32.gmra.mxu0 %vm126_vm1, %v59_v6 }
   0xd   :  { %6542 = vmatprep.mubr.msk.f32.mxu0 %vm126_vm1, %v60_v7 }
  0x10   :  { %6543 = vmatmul.mubr.msk.f32.gmra.mxu0 %vm126_vm1, %v61_v8 }
  0x11   :  { %6545 = vmatprep.mubr.msk.f32.mxu0 %vm126_vm1, %v62_v9 }
  0x14   :  { %6546 = vmatmul.mubr.msk.f32.gmra.mxu0 %vm126_vm1, %v63_v10 }
  0x15   :  { %6548 = vmatprep.mubr.msk.f32.mxu0 %vm126_vm1, %v64_v11 }
  0x16   :  { %19 = vsyncpa [#allocation3], 0  ;;  %v67_v14 = vld [vmem:[%s10118_s0 + $0x68] sm:$0xff]  ;;  %v68_v15 = vld [vmem:[%s10118_s0 + $0x70] sm:$0xff]  ;;  %vm783_vm2 = vcmask 261120   ;;  %s7431_s18 = smov [#allocation2]  }
  0x17   :  { %v69_v16 = vld [vmem:[%s10118_s0 + $0x78] sm:$0xff]  ;;  %v70_v17 = vld [vmem:[%s10118_s0 + $0x80] sm:$0xff]  ;;  %v71_v18 = vld [vmem:[%s10118_s0 + $0x88] sm:$0xff]  ;;  %s5729_s19 = sshll.u32 %s7431_s18, 4  ;;  %s5730_s19 = int_to_ptr.vmem [resolvable:$true] %s5729_s19 }
  0x18   :  { %6549 = vmatmul.mubr.msk.f32.gmra.mxu0 %vm126_vm1, %v65_v12  ;;  %v72_v19 = vld [vmem:[%s10118_s0 + $0x90] sm:$0xff]  ;;  %v73_v20 = vld [vmem:[%s10118_s0 + $0x98] sm:$0xff]  ;;  %v74_v21 = vld [vmem:[%s10118_s0 + $0xa0] sm:$0xff]  ;;  %p7412_p1 = scmp.lt.s32.totalorder %s5730_s19, %s5730_s19 }
  0x19   :  { %6551 = vmatprep.mubr.msk.f32.mxu0 %vm126_vm1, %v66_v13  ;;  %v75_v22 = vld [vmem:[%s10118_s0 + $0xa8] sm:$0xff]  ;;  %v76_v23 = vld [vmem:[%s10118_s0 + $0xb0] sm:$0xff]  ;;  %v77_v24 = vld [vmem:[%s10118_s0 + $0xb8] sm:$0xff] }
  0x1a   :  { %v78_v25 = vld [vmem:[%s10118_s0 + $0xc0] sm:$0xff]  ;;  %v79_v26 = vld [vmem:[%s10118_s0 + $0xc8] sm:$0xff]  ;;  %v80_v27 = vld [vmem:[%s10118_s0 + $0xd0] sm:$0xff] }
  0x1b   :  { %v81_v28 = vld [vmem:[%s10118_s0 + $0xd8] sm:$0xff]  ;;  %v82_v29 = vld [vmem:[%s10118_s0 + $0xe0] sm:$0xff]  ;;  %v83_v30 = vld [vmem:[%s10118_s0 + $0xe8] sm:$0xff] }
  0x1c   :  { %6552 = vmatmul.mubr.msk.f32.gmra.mxu0 %vm126_vm1, %v67_v14  ;;  %v84_v31 = vld [vmem:[%s10118_s0 + $0xf0] sm:$0xff]  ;;  %v85_v32 = vld [vmem:[%s10118_s0 + $0xf8] sm:$0xff]  ;;  %v86_v33 = vld [vmem:[%s10118_s0 + $0x100] sm:$0xff] }
  0x1d   :  { %6554 = vmatprep.mubr.msk.f32.mxu0 %vm126_vm1, %v68_v15  ;;  %v87_v34 = vld [vmem:[%s10118_s0 + $0x108] sm:$0xff]  ;;  %v88_v35 = vld [vmem:[%s10118_s0 + $0x110] sm:$0xff]  ;;  %v775_v36 = vld [vmem:[%s10122_s4 + $0x18] sm:$0xff] }
  0x1e   :  { %6629 = vmatprep.subr.mxu1 %v775_v36  ;;  %v89_v37 = vld [vmem:[%s10118_s0 + $0x118] sm:$0xff]  ;;  %v774_v38 = vld [vmem:[%s10122_s4 + $0x10] sm:$0xff]  ;;  %v90_v39 = vld [vmem:[%s10118_s0 + $0x120] sm:$0xff] }
  0x1f   :  { %6630 = vmatpush3.msra.mxu1 %v775_v36  ;;  %v773_v40 = vld [vmem:[%s10122_s4 + $0x8] sm:$0xff]  ;;  %v772_v42 = vld [vmem:[%s10122_s4] sm:$0xff]  ;;  %v92_v43 = vld [vmem:[%s10118_s0 + $0x130] sm:$0xff]  ;;  %s7407_s4 = scalar_lea.vmem %s5730_s19, 16 }
  0x20   :  { %6555 = vmatmul.mubr.msk.f32.gmra.mxu0 %vm126_vm1, %v69_v16  ;;  %6631 = vmatprep.subr.mxu1 %v774_v38  ;;  %v91_v41 = vld [vmem:[%s10118_s0 + $0x128] sm:$0xff]  ;;  %v93_v44 = vld [vmem:[%s10118_s0 + $0x138] sm:$0xff]  ;;  %v94_v45 = vld [vmem:[%s10118_s0 + $0x140] sm:$0xff]  ;;  %p7408_p0 = scmp.ne.s32.totalorder %s5730_s19, %s7407_s4 }
  0x21   :  { %6557 = vmatprep.mubr.msk.f32.mxu0 %vm126_vm1, %v70_v17  ;;  %6632 = vmatpush3.msra.mxu1 %v774_v38  ;;  %v95_v46 = vld [vmem:[%s10118_s0 + $0x148] sm:$0xff]  ;;  %v96_v47 = vld [vmem:[%s10118_s0 + $0x150] sm:$0xff]  ;;  %v97_v48 = vld [vmem:[%s10118_s0 + $0x158] sm:$0xff] }
  0x22   :  { %6633 = vmatprep.subr.mxu1 %v773_v40  ;;  %v98_v49 = vld [vmem:[%s10118_s0 + $0x160] sm:$0xff]  ;;  %v99_v50 = vld [vmem:[%s10118_s0 + $0x168] sm:$0xff]  ;;  %v100_v51 = vld [vmem:[%s10118_s0 + $0x170] sm:$0xff] }
  0x23   :  { %6634 = vmatpush3.msra.mxu1 %v773_v40  ;;  %v101_v52 = vld [vmem:[%s10118_s0 + $0x178] sm:$0xff]  ;;  %v102_v53 = vld [vmem:[%s10118_s0 + $0x180] sm:$0xff]  ;;  %v103_v54 = vld [vmem:[%s10118_s0 + $0x188] sm:$0xff] }
  0x24   :  { %6558 = vmatmul.mubr.msk.f32.gmra.mxu0 %vm126_vm1, %v71_v18  ;;  %6635 = vmatprep.subr.mxu1 %v772_v42  ;;  %v104_v55 = vld [vmem:[%s10118_s0 + $0x190] sm:$0xff]  ;;  %v105_v56 = vld [vmem:[%s10118_s0 + $0x198] sm:$0xff]  ;;  %v106_v57 = vld [vmem:[%s10118_s0 + $0x1a0] sm:$0xff] }
  0x25   :  { %6560 = vmatprep.mubr.msk.f32.mxu0 %vm126_vm1, %v72_v19  ;;  %6636 = vmatpush3.msra.mxu1 %v772_v42  ;;  %v107_v58 = vld [vmem:[%s10118_s0 + $0x1a8] sm:$0xff]  ;;  %v108_v59 = vld [vmem:[%s10118_s0 + $0x1b0] sm:$0xff]  ;;  %v109_v60 = vld [vmem:[%s10118_s0 + $0x1b8] sm:$0xff] }
  0x26   :  { %v110_v61 = vld [vmem:[%s10118_s0 + $0x1c0] sm:$0xff]  ;;  %v111_v62 = vld [vmem:[%s10118_s0 + $0x1c8] sm:$0xff]  ;;  %v112_v63 = vld [vmem:[%s10118_s0 + $0x1d0] sm:$0xff] }
  0x27   :  { %v113_v0 = vld [vmem:[%s10118_s0 + $0x1d8] sm:$0xff]  ;;  %v114_v1 = vld [vmem:[%s10118_s0 + $0x1e0] sm:$0xff]  ;;  %v115_v2 = vld [vmem:[%s10118_s0 + $0x1e8] sm:$0xff] }
  0x28   :  { %6561 = vmatmul.mubr.msk.f32.gmra.mxu0 %vm126_vm1, %v73_v20  ;;  %v116_v3 = vld [vmem:[%s10118_s0 + $0x1f0] sm:$0xff]  ;;  %v117_v4 = vld [vmem:[%s10118_s0 + $0x1f8] sm:$0xff]  ;;  %v7789_v7 = vld [vmem:[%s10121_s3] ss:$0 sm:$0xff]  ;;  %s7411_s3 = scalar_lea.vmem %s5730_s19, 32 }
  0x29   :  { %6563 = vmatprep.mubr.msk.f32.mxu0 %vm126_vm1, %v74_v21  ;;  %v1428_v5 = vld [vmem:[%s10124_s6 + $0x18] sm:$0xff]  ;;  %v1427_v6 = vld [vmem:[%s10124_s6 + $0x10] sm:$0xff]  ;;  %v1426_v13 = vld [vmem:[%s10124_s6 + $0x8] sm:$0xff]  ;;  %p7413_p2 = scmp.lt.s32.totalorder %s7411_s3, %s7407_s4 }
  0x2a   :  { %6733 = vmatprep.subr.mxu0 %v1428_v5  ;;  %v1425_v14 = vld [vmem:[%s10124_s6] sm:$0xff] }
  0x2b   :  { %6734 = vmatpush3.msra.mxu0 %v1428_v5  ;;  %p7414_p3 = por %p7413_p2, %p7412_p1 }
  0x2c   :  { %6564 = vmatmul.mubr.msk.f32.gmra.mxu0 %vm126_vm1, %v75_v22  ;;  %6735 = vmatprep.subr.mxu0 %v1427_v6 }
  0x2d   :  { %6566 = vmatprep.mubr.msk.f32.mxu0 %vm126_vm1, %v76_v23  ;;  %6736 = vmatpush3.msra.mxu0 %v1427_v6  ;;  %p7415_p4 = pnand %p7414_p3, %p7408_p0 }
  0x2e   :  { %6737 = vmatprep.subr.mxu0 %v1426_v13 }
  0x2f   :  { %6738 = vmatpush3.msra.mxu0 %v1426_v13 }
  0x30   :  { %6567 = vmatmul.mubr.msk.f32.gmra.mxu0 %vm126_vm1, %v77_v24  ;;  %6739 = vmatprep.subr.mxu0 %v1425_v14 }
  0x31   :  { %6569 = vmatprep.mubr.msk.f32.mxu0 %vm126_vm1, %v78_v25  ;;  %6740 = vmatpush3.msra.mxu0 %v1425_v14 }
  0x34   :  { %6570 = vmatmul.mubr.msk.f32.gmra.mxu0 %vm126_vm1, %v79_v26 }
  0x35   :  { %6572 = vmatprep.mubr.msk.f32.mxu0 %vm126_vm1, %v80_v27 }
  0x38   :  { %6573 = vmatmul.mubr.msk.f32.gmra.mxu0 %vm126_vm1, %v81_v28 }
  0x39   :  { %6575 = vmatprep.mubr.msk.f32.mxu0 %vm126_vm1, %v82_v29 }
  0x3c   :  { %6576 = vmatmul.mubr.msk.f32.gmra.mxu0 %vm126_vm1, %v83_v30 }
  0x3d   :  { %6578 = vmatprep.mubr.msk.f32.mxu0 %vm126_vm1, %v84_v31 }
  0x40   :  { %6579 = vmatmul.mubr.msk.f32.gmra.mxu0 %vm126_vm1, %v85_v32 }
  0x41   :  { %6581 = vmatprep.mubr.msk.f32.mxu0 %vm126_vm1, %v86_v33 }
  0x44   :  { %6582 = vmatmul.mubr.msk.f32.gmra.mxu0 %vm126_vm1, %v87_v34 }
  0x45   :  { %6584 = vmatprep.mubr.msk.f32.mxu0 %vm126_vm1, %v88_v35 }
  0x48   :  { %6585 = vmatmul.mubr.msk.f32.gmra.mxu0 %vm126_vm1, %v89_v37 }
  0x49   :  { %6587 = vmatprep.mubr.msk.f32.mxu0 %vm126_vm1, %v90_v39 }
  0x4c   :  { %6588 = vmatmul.mubr.msk.f32.gmra.mxu0 %vm126_vm1, %v91_v41 }
  0x4d   :  { %6590 = vmatprep.mubr.msk.f32.mxu0 %vm126_vm1, %v92_v43 }
  0x50   :  { %6591 = vmatmul.mubr.msk.f32.gmra.mxu0 %vm126_vm1, %v93_v44 }
  0x51   :  { %6593 = vmatprep.mubr.msk.f32.mxu0 %vm126_vm1, %v94_v45 }
  0x54   :  { %6594 = vmatmul.mubr.msk.f32.gmra.mxu0 %vm126_vm1, %v95_v46 }
  0x55   :  { %6596 = vmatprep.mubr.msk.f32.mxu0 %vm126_vm1, %v96_v47 }
  0x58   :  { %6597 = vmatmul.mubr.msk.f32.gmra.mxu0 %vm126_vm1, %v97_v48 }
  0x59   :  { %6599 = vmatprep.mubr.msk.f32.mxu0 %vm126_vm1, %v98_v49 }
  0x5c   :  { %6600 = vmatmul.mubr.msk.f32.gmra.mxu0 %vm126_vm1, %v99_v50 }
  0x5d   :  { %6602 = vmatprep.mubr.msk.f32.mxu0 %vm126_vm1, %v100_v51 }
  0x60   :  { %6603 = vmatmul.mubr.msk.f32.gmra.mxu0 %vm126_vm1, %v101_v52 }
  0x61   :  { %6605 = vmatprep.mubr.msk.f32.mxu0 %vm126_vm1, %v102_v53 }
  0x64   :  { %6606 = vmatmul.mubr.msk.f32.gmra.mxu0 %vm126_vm1, %v103_v54 }
  0x65   :  { %6608 = vmatprep.mubr.msk.f32.mxu0 %vm126_vm1, %v104_v55 }
  0x68   :  { %6609 = vmatmul.mubr.msk.f32.gmra.mxu0 %vm126_vm1, %v105_v56 }
  0x69   :  { %6611 = vmatprep.mubr.msk.f32.mxu0 %vm126_vm1, %v106_v57 }
  0x6c   :  { %6612 = vmatmul.mubr.msk.f32.gmra.mxu0 %vm126_vm1, %v107_v58 }
  0x6d   :  { %6614 = vmatprep.mubr.msk.f32.mxu0 %vm126_vm1, %v108_v59 }
  0x70   :  { %6615 = vmatmul.mubr.msk.f32.gmra.mxu0 %vm126_vm1, %v109_v60 }
  0x71   :  { %6617 = vmatprep.mubr.msk.f32.mxu0 %vm126_vm1, %v110_v61 }
  0x74   :  { %6618 = vmatmul.mubr.msk.f32.gmra.mxu0 %vm126_vm1, %v111_v62 }
  0x75   :  { %6620 = vmatprep.mubr.msk.f32.mxu0 %vm126_vm1, %v112_v63 }
  0x78   :  { %6621 = vmatmul.mubr.msk.f32.gmra.mxu0 %vm126_vm1, %v113_v0 }
  0x79   :  { %6623 = vmatprep.mubr.msk.f32.mxu0 %vm126_vm1, %v114_v1 }
  0x7c   :  { %6624 = vmatmul.mubr.msk.f32.gmra.mxu0 %vm126_vm1, %v115_v2 }
  0x7d   :  { %6626 = vmatprep.mubr.msk.f32.mxu0 %vm126_vm1, %v116_v3 }
  0x80   :  { %6627 = vmatmul.mubr.msk.f32.gmra.mxu0 %vm126_vm1, %v117_v4 }
  0xc4   :  { %v6535_v8 = vpop.f32.mrf.mxu0 }
  0xc5   :  { %v395_v9 = vadd.f32 %v6535_v8, %v7789_v7 }
  0xc6   :  { %v389_v10 = vpop.f32.mrf.mxu0 }
  0xc7   :  { %v390_v11 = vadd.f32 %v7789_v7, %v389_v10  ;;  %v709_v16 = vmax.f32 %v395_v9, 0.0 }
  0xc8   :  { %v6538_v12 = vpop.f32.mrf.mxu0 }
  0xc9   :  { %v708_v15 = vmax.f32 %v390_v11, 0.0  ;;  %v405_v17 = vadd.f32 %v6538_v12, %v7789_v7 }
  0xca   :  { %v399_v18 = vpop.f32.mrf.mxu0 }
  0xcb   :  { %v400_v19 = vadd.f32 %v7789_v7, %v399_v18  ;;  %6637 = vmatprep.mubr.msk.f32.mxu1 %vm783_vm2, %v708_v15  ;;  %v711_v23 = vmax.f32 %v405_v17, 0.0 }
  0xcc   :  { %v6541_v20 = vpop.f32.mrf.mxu0  ;;  %6638 = vmatmul.mubr.msk.f32.vlgmr.msra.gmra.mxu1 %vm783_vm2, %v709_v16 }
  0xcd   :  { %v710_v21 = vmax.f32 %v400_v19, 0.0  ;;  %v415_v22 = vadd.f32 %v6541_v20, %v7789_v7 }
  0xce   :  { %v409_v24 = vpop.f32.mrf.mxu0 }
  0xcf   :  { %v410_v25 = vadd.f32 %v7789_v7, %v409_v24  ;;  %6640 = vmatprep.mubr.msk.f32.mxu1 %vm783_vm2, %v710_v21  ;;  %v713_v26 = vmax.f32 %v415_v22, 0.0 }
  0xd0   :  { %v6544_v27 = vpop.f32.mrf.mxu0  ;;  %6641 = vmatmul.mubr.msk.f32.gmra.mxu1 %vm783_vm2, %v711_v23 }
  0xd1   :  { %v712_v28 = vmax.f32 %v410_v25, 0.0  ;;  %v425_v29 = vadd.f32 %v6544_v27, %v7789_v7 }
  0xd2   :  { %v419_v30 = vpop.f32.mrf.mxu0 }
  0xd3   :  { %v420_v31 = vadd.f32 %v7789_v7, %v419_v30  ;;  %6643 = vmatprep.mubr.msk.f32.mxu1 %vm783_vm2, %v712_v28  ;;  %v715_v32 = vmax.f32 %v425_v29, 0.0 }
  0xd4   :  { %v6547_v33 = vpop.f32.mrf.mxu0  ;;  %6644 = vmatmul.mubr.msk.f32.gmra.mxu1 %vm783_vm2, %v713_v26 }
  0xd5   :  { %v714_v34 = vmax.f32 %v420_v31, 0.0  ;;  %v435_v35 = vadd.f32 %v6547_v33, %v7789_v7 }
  0xd6   :  { %v429_v36 = vpop.f32.mrf.mxu0 }
  0xd7   :  { %v430_v37 = vadd.f32 %v7789_v7, %v429_v36  ;;  %6646 = vmatprep.mubr.msk.f32.mxu1 %vm783_vm2, %v714_v34  ;;  %v717_v38 = vmax.f32 %v435_v35, 0.0 }
  0xd8   :  { %v6550_v39 = vpop.f32.mrf.mxu0  ;;  %6647 = vmatmul.mubr.msk.f32.gmra.mxu1 %vm783_vm2, %v715_v32 }
  0xd9   :  { %v716_v40 = vmax.f32 %v430_v37, 0.0  ;;  %v445_v41 = vadd.f32 %v6550_v39, %v7789_v7 }
  0xda   :  { %v439_v42 = vpop.f32.mrf.mxu0 }
  0xdb   :  { %v440_v43 = vadd.f32 %v7789_v7, %v439_v42  ;;  %6649 = vmatprep.mubr.msk.f32.mxu1 %vm783_vm2, %v716_v40  ;;  %v719_v44 = vmax.f32 %v445_v41, 0.0 }
  0xdc   :  { %v6553_v45 = vpop.f32.mrf.mxu0  ;;  %6650 = vmatmul.mubr.msk.f32.gmra.mxu1 %vm783_vm2, %v717_v38 }
  0xdd   :  { %v718_v46 = vmax.f32 %v440_v43, 0.0  ;;  %v455_v47 = vadd.f32 %v6553_v45, %v7789_v7 }
  0xde   :  { %v449_v48 = vpop.f32.mrf.mxu0 }
  0xdf   :  { %v450_v49 = vadd.f32 %v7789_v7, %v449_v48  ;;  %6652 = vmatprep.mubr.msk.f32.mxu1 %vm783_vm2, %v718_v46  ;;  %v721_v50 = vmax.f32 %v455_v47, 0.0 }
  0xe0   :  { %v6556_v51 = vpop.f32.mrf.mxu0  ;;  %6653 = vmatmul.mubr.msk.f32.gmra.mxu1 %vm783_vm2, %v719_v44 }
  0xe1   :  { %v720_v52 = vmax.f32 %v450_v49, 0.0  ;;  %v465_v53 = vadd.f32 %v6556_v51, %v7789_v7 }
  0xe2   :  { %v459_v54 = vpop.f32.mrf.mxu0 }
  0xe3   :  { %v460_v55 = vadd.f32 %v7789_v7, %v459_v54  ;;  %6655 = vmatprep.mubr.msk.f32.mxu1 %vm783_vm2, %v720_v52  ;;  %v723_v56 = vmax.f32 %v465_v53, 0.0 }
  0xe4   :  { %v6559_v57 = vpop.f32.mrf.mxu0  ;;  %6656 = vmatmul.mubr.msk.f32.gmra.mxu1 %vm783_vm2, %v721_v50 }
  0xe5   :  { %v722_v58 = vmax.f32 %v460_v55, 0.0  ;;  %v475_v59 = vadd.f32 %v6559_v57, %v7789_v7 }
  0xe6   :  { %v469_v60 = vpop.f32.mrf.mxu0 }
  0xe7   :  { %v470_v61 = vadd.f32 %v7789_v7, %v469_v60  ;;  %6658 = vmatprep.mubr.msk.f32.mxu1 %vm783_vm2, %v722_v58  ;;  %v725_v62 = vmax.f32 %v475_v59, 0.0 }
  0xe8   :  { %v6562_v63 = vpop.f32.mrf.mxu0  ;;  %6659 = vmatmul.mubr.msk.f32.gmra.mxu1 %vm783_vm2, %v723_v56 }
  0xe9   :  { %v724_v0 = vmax.f32 %v470_v61, 0.0  ;;  %v485_v1 = vadd.f32 %v6562_v63, %v7789_v7 }
  0xea   :  { %v479_v2 = vpop.f32.mrf.mxu0 }
  0xeb   :  { %v480_v3 = vadd.f32 %v7789_v7, %v479_v2  ;;  %6661 = vmatprep.mubr.msk.f32.mxu1 %vm783_vm2, %v724_v0  ;;  %v727_v4 = vmax.f32 %v485_v1, 0.0 }
  0xec   :  { %v6565_v5 = vpop.f32.mrf.mxu0  ;;  %6662 = vmatmul.mubr.msk.f32.gmra.mxu1 %vm783_vm2, %v725_v62 }
  0xed   :  { %v726_v6 = vmax.f32 %v480_v3, 0.0  ;;  %v495_v8 = vadd.f32 %v6565_v5, %v7789_v7 }
  0xee   :  { %v489_v9 = vpop.f32.mrf.mxu0 }
  0xef   :  { %v490_v10 = vadd.f32 %v7789_v7, %v489_v9  ;;  %6664 = vmatprep.mubr.msk.f32.mxu1 %vm783_vm2, %v726_v6  ;;  %v729_v11 = vmax.f32 %v495_v8, 0.0 }
  0xf0   :  { %v6568_v12 = vpop.f32.mrf.mxu0  ;;  %6665 = vmatmul.mubr.msk.f32.gmra.mxu1 %vm783_vm2, %v727_v4 }
  0xf1   :  { %v728_v13 = vmax.f32 %v490_v10, 0.0  ;;  %v505_v14 = vadd.f32 %v6568_v12, %v7789_v7 }
  0xf2   :  { %v499_v15 = vpop.f32.mrf.mxu0 }
  0xf3   :  { %v500_v16 = vadd.f32 %v7789_v7, %v499_v15  ;;  %6667 = vmatprep.mubr.msk.f32.mxu1 %vm783_vm2, %v728_v13  ;;  %v731_v17 = vmax.f32 %v505_v14, 0.0 }
  0xf4   :  { %v6571_v18 = vpop.f32.mrf.mxu0  ;;  %6668 = vmatmul.mubr.msk.f32.gmra.mxu1 %vm783_vm2, %v729_v11 }
  0xf5   :  { %v730_v19 = vmax.f32 %v500_v16, 0.0  ;;  %v515_v20 = vadd.f32 %v6571_v18, %v7789_v7 }
  0xf6   :  { %v509_v21 = vpop.f32.mrf.mxu0 }
  0xf7   :  { %v510_v22 = vadd.f32 %v7789_v7, %v509_v21  ;;  %6670 = vmatprep.mubr.msk.f32.mxu1 %vm783_vm2, %v730_v19  ;;  %v733_v23 = vmax.f32 %v515_v20, 0.0 }
  0xf8   :  { %v6574_v24 = vpop.f32.mrf.mxu0  ;;  %6671 = vmatmul.mubr.msk.f32.gmra.mxu1 %vm783_vm2, %v731_v17 }
  0xf9   :  { %v732_v25 = vmax.f32 %v510_v22, 0.0  ;;  %v525_v26 = vadd.f32 %v6574_v24, %v7789_v7 }
  0xfa   :  { %v519_v27 = vpop.f32.mrf.mxu0 }
  0xfb   :  { %v520_v28 = vadd.f32 %v7789_v7, %v519_v27  ;;  %6673 = vmatprep.mubr.msk.f32.mxu1 %vm783_vm2, %v732_v25  ;;  %v735_v29 = vmax.f32 %v525_v26, 0.0 }
  0xfc   :  { %v6577_v30 = vpop.f32.mrf.mxu0  ;;  %6674 = vmatmul.mubr.msk.f32.gmra.mxu1 %vm783_vm2, %v733_v23 }
  0xfd   :  { %v734_v31 = vmax.f32 %v520_v28, 0.0  ;;  %v535_v32 = vadd.f32 %v6577_v30, %v7789_v7 }
  0xfe   :  { %v529_v33 = vpop.f32.mrf.mxu0 }
  0xff   :  { %v530_v34 = vadd.f32 %v7789_v7, %v529_v33  ;;  %6676 = vmatprep.mubr.msk.f32.mxu1 %vm783_vm2, %v734_v31  ;;  %v737_v35 = vmax.f32 %v535_v32, 0.0 }
 0x100   :  { %v6580_v36 = vpop.f32.mrf.mxu0  ;;  %6677 = vmatmul.mubr.msk.f32.gmra.mxu1 %vm783_vm2, %v735_v29 }
 0x101   :  { %v736_v37 = vmax.f32 %v530_v34, 0.0  ;;  %v545_v38 = vadd.f32 %v6580_v36, %v7789_v7 }
 0x102   :  { %v539_v39 = vpop.f32.mrf.mxu0 }
 0x103   :  { %v540_v40 = vadd.f32 %v7789_v7, %v539_v39  ;;  %6679 = vmatprep.mubr.msk.f32.mxu1 %vm783_vm2, %v736_v37  ;;  %v739_v41 = vmax.f32 %v545_v38, 0.0 }
 0x104   :  { %v6583_v42 = vpop.f32.mrf.mxu0  ;;  %6680 = vmatmul.mubr.msk.f32.gmra.mxu1 %vm783_vm2, %v737_v35 }
 0x105   :  { %v738_v43 = vmax.f32 %v540_v40, 0.0  ;;  %v555_v44 = vadd.f32 %v6583_v42, %v7789_v7 }
 0x106   :  { %v549_v45 = vpop.f32.mrf.mxu0 }
 0x107   :  { %v550_v46 = vadd.f32 %v7789_v7, %v549_v45  ;;  %6682 = vmatprep.mubr.msk.f32.mxu1 %vm783_vm2, %v738_v43  ;;  %v741_v47 = vmax.f32 %v555_v44, 0.0 }
 0x108   :  { %v6586_v48 = vpop.f32.mrf.mxu0  ;;  %6683 = vmatmul.mubr.msk.f32.gmra.mxu1 %vm783_vm2, %v739_v41 }
 0x109   :  { %v740_v49 = vmax.f32 %v550_v46, 0.0  ;;  %v565_v50 = vadd.f32 %v6586_v48, %v7789_v7 }
 0x10a   :  { %v559_v51 = vpop.f32.mrf.mxu0 }
 0x10b   :  { %v560_v52 = vadd.f32 %v7789_v7, %v559_v51  ;;  %6685 = vmatprep.mubr.msk.f32.mxu1 %vm783_vm2, %v740_v49  ;;  %v743_v53 = vmax.f32 %v565_v50, 0.0 }
 0x10c   :  { %v6589_v54 = vpop.f32.mrf.mxu0  ;;  %6686 = vmatmul.mubr.msk.f32.gmra.mxu1 %vm783_vm2, %v741_v47 }
 0x10d   :  { %v742_v55 = vmax.f32 %v560_v52, 0.0  ;;  %v575_v56 = vadd.f32 %v6589_v54, %v7789_v7 }
 0x10e   :  { %v569_v57 = vpop.f32.mrf.mxu0 }
 0x10f   :  { %v570_v58 = vadd.f32 %v7789_v7, %v569_v57  ;;  %6688 = vmatprep.mubr.msk.f32.mxu1 %vm783_vm2, %v742_v55  ;;  %v745_v59 = vmax.f32 %v575_v56, 0.0 }
 0x110   :  { %v6592_v60 = vpop.f32.mrf.mxu0  ;;  %6689 = vmatmul.mubr.msk.f32.gmra.mxu1 %vm783_vm2, %v743_v53 }
 0x111   :  { %v744_v61 = vmax.f32 %v570_v58, 0.0  ;;  %v585_v62 = vadd.f32 %v6592_v60, %v7789_v7 }
 0x112   :  { %v579_v63 = vpop.f32.mrf.mxu0 }
 0x113   :  { %v580_v0 = vadd.f32 %v7789_v7, %v579_v63  ;;  %6691 = vmatprep.mubr.msk.f32.mxu1 %vm783_vm2, %v744_v61  ;;  %v747_v1 = vmax.f32 %v585_v62, 0.0 }
 0x114   :  { %v6595_v2 = vpop.f32.mrf.mxu0  ;;  %6692 = vmatmul.mubr.msk.f32.gmra.mxu1 %vm783_vm2, %v745_v59 }
 0x115   :  { %v746_v3 = vmax.f32 %v580_v0, 0.0  ;;  %v595_v4 = vadd.f32 %v6595_v2, %v7789_v7 }
 0x116   :  { %v589_v5 = vpop.f32.mrf.mxu0 }
 0x117   :  { %v590_v6 = vadd.f32 %v7789_v7, %v589_v5  ;;  %6694 = vmatprep.mubr.msk.f32.mxu1 %vm783_vm2, %v746_v3  ;;  %v749_v8 = vmax.f32 %v595_v4, 0.0 }
 0x118   :  { %v6598_v9 = vpop.f32.mrf.mxu0  ;;  %6695 = vmatmul.mubr.msk.f32.gmra.mxu1 %vm783_vm2, %v747_v1 }
 0x119   :  { %v748_v10 = vmax.f32 %v590_v6, 0.0  ;;  %v605_v11 = vadd.f32 %v6598_v9, %v7789_v7 }
 0x11a   :  { %v599_v12 = vpop.f32.mrf.mxu0 }
 0x11b   :  { %v600_v13 = vadd.f32 %v7789_v7, %v599_v12  ;;  %6697 = vmatprep.mubr.msk.f32.mxu1 %vm783_vm2, %v748_v10  ;;  %v751_v14 = vmax.f32 %v605_v11, 0.0 }
 0x11c   :  { %v6601_v15 = vpop.f32.mrf.mxu0  ;;  %6698 = vmatmul.mubr.msk.f32.gmra.mxu1 %vm783_vm2, %v749_v8 }
 0x11d   :  { %v750_v16 = vmax.f32 %v600_v13, 0.0  ;;  %v615_v17 = vadd.f32 %v6601_v15, %v7789_v7  ;;  %v2013_v13 = vld [vmem:[%s10126_s8] sm:$0x3] }
 0x11e   :  { %v609_v18 = vpop.f32.mrf.mxu0  ;;  %6837 = vmatprep.subr.msk.mxu1 %vm319_vm0, %v2013_v13 }
 0x11f   :  { %v610_v19 = vadd.f32 %v7789_v7, %v609_v18  ;;  %6700 = vmatprep.mubr.msk.f32.mxu1 %vm783_vm2, %v750_v16  ;;  %v753_v20 = vmax.f32 %v615_v17, 0.0  ;;  %6838 = vmatpush3.msk.msra.mxu1 %vm319_vm0, %v2013_v13 }
 0x120   :  { %v6604_v21 = vpop.f32.mrf.mxu0  ;;  %6701 = vmatmul.mubr.msk.f32.gmra.mxu1 %vm783_vm2, %v751_v14 }
 0x121   :  { %v752_v22 = vmax.f32 %v610_v19, 0.0  ;;  %v625_v23 = vadd.f32 %v6604_v21, %v7789_v7 }
 0x122   :  { %v619_v24 = vpop.f32.mrf.mxu0 }
 0x123   :  { %v620_v25 = vadd.f32 %v7789_v7, %v619_v24  ;;  %6703 = vmatprep.mubr.msk.f32.mxu1 %vm783_vm2, %v752_v22  ;;  %v755_v26 = vmax.f32 %v625_v23, 0.0 }
 0x124   :  { %v6607_v27 = vpop.f32.mrf.mxu0  ;;  %6704 = vmatmul.mubr.msk.f32.gmra.mxu1 %vm783_vm2, %v753_v20 }
 0x125   :  { %v754_v28 = vmax.f32 %v620_v25, 0.0  ;;  %v635_v29 = vadd.f32 %v6607_v27, %v7789_v7 }
 0x126   :  { %v629_v30 = vpop.f32.mrf.mxu0 }
 0x127   :  { %v630_v31 = vadd.f32 %v7789_v7, %v629_v30  ;;  %6706 = vmatprep.mubr.msk.f32.mxu1 %vm783_vm2, %v754_v28  ;;  %v757_v32 = vmax.f32 %v635_v29, 0.0 }
 0x128   :  { %v6610_v33 = vpop.f32.mrf.mxu0  ;;  %6707 = vmatmul.mubr.msk.f32.gmra.mxu1 %vm783_vm2, %v755_v26 }
 0x129   :  { %v756_v34 = vmax.f32 %v630_v31, 0.0  ;;  %v645_v35 = vadd.f32 %v6610_v33, %v7789_v7 }
 0x12a   :  { %v639_v36 = vpop.f32.mrf.mxu0 }
 0x12b   :  { %v640_v37 = vadd.f32 %v7789_v7, %v639_v36  ;;  %6709 = vmatprep.mubr.msk.f32.mxu1 %vm783_vm2, %v756_v34  ;;  %v759_v38 = vmax.f32 %v645_v35, 0.0 }
 0x12c   :  { %v6613_v39 = vpop.f32.mrf.mxu0  ;;  %6710 = vmatmul.mubr.msk.f32.gmra.mxu1 %vm783_vm2, %v757_v32 }
 0x12d   :  { %v758_v40 = vmax.f32 %v640_v37, 0.0  ;;  %v655_v41 = vadd.f32 %v6613_v39, %v7789_v7 }
 0x12e   :  { %v649_v42 = vpop.f32.mrf.mxu0 }
 0x12f   :  { %v650_v43 = vadd.f32 %v7789_v7, %v649_v42  ;;  %6712 = vmatprep.mubr.msk.f32.mxu1 %vm783_vm2, %v758_v40  ;;  %v761_v44 = vmax.f32 %v655_v41, 0.0 }
 0x130   :  { %v6616_v45 = vpop.f32.mrf.mxu0  ;;  %6713 = vmatmul.mubr.msk.f32.gmra.mxu1 %vm783_vm2, %v759_v38 }
 0x131   :  { %v760_v46 = vmax.f32 %v650_v43, 0.0  ;;  %v665_v47 = vadd.f32 %v6616_v45, %v7789_v7 }
 0x132   :  { %v659_v48 = vpop.f32.mrf.mxu0 }
 0x133   :  { %v660_v49 = vadd.f32 %v7789_v7, %v659_v48  ;;  %6715 = vmatprep.mubr.msk.f32.mxu1 %vm783_vm2, %v760_v46  ;;  %v763_v50 = vmax.f32 %v665_v47, 0.0 }
 0x134   :  { %v6619_v51 = vpop.f32.mrf.mxu0  ;;  %6716 = vmatmul.mubr.msk.f32.gmra.mxu1 %vm783_vm2, %v761_v44 }
 0x135   :  { %v762_v52 = vmax.f32 %v660_v49, 0.0  ;;  %v675_v53 = vadd.f32 %v6619_v51, %v7789_v7 }
 0x136   :  { %v669_v54 = vpop.f32.mrf.mxu0 }
 0x137   :  { %v670_v55 = vadd.f32 %v7789_v7, %v669_v54  ;;  %6718 = vmatprep.mubr.msk.f32.mxu1 %vm783_vm2, %v762_v52  ;;  %v765_v56 = vmax.f32 %v675_v53, 0.0 }
 0x138   :  { %v6622_v57 = vpop.f32.mrf.mxu0  ;;  %6719 = vmatmul.mubr.msk.f32.gmra.mxu1 %vm783_vm2, %v763_v50 }
 0x139   :  { %v764_v58 = vmax.f32 %v670_v55, 0.0  ;;  %v685_v59 = vadd.f32 %v6622_v57, %v7789_v7 }
 0x13a   :  { %v679_v60 = vpop.f32.mrf.mxu0 }
 0x13b   :  { %v680_v61 = vadd.f32 %v7789_v7, %v679_v60  ;;  %6721 = vmatprep.mubr.msk.f32.mxu1 %vm783_vm2, %v764_v58  ;;  %v767_v62 = vmax.f32 %v685_v59, 0.0 }
 0x13c   :  { %v6625_v63 = vpop.f32.mrf.mxu0  ;;  %6722 = vmatmul.mubr.msk.f32.gmra.mxu1 %vm783_vm2, %v765_v56 }
 0x13d   :  { %v766_v0 = vmax.f32 %v680_v61, 0.0  ;;  %v695_v1 = vadd.f32 %v6625_v63, %v7789_v7 }
 0x13e   :  { %v689_v2 = vpop.f32.mrf.mxu0 }
 0x13f   :  { %v690_v3 = vadd.f32 %v7789_v7, %v689_v2  ;;  %6724 = vmatprep.mubr.msk.f32.mxu1 %vm783_vm2, %v766_v0  ;;  %v769_v4 = vmax.f32 %v695_v1, 0.0 }
 0x140   :  { %v6628_v5 = vpop.f32.mrf.mxu0  ;;  %6725 = vmatmul.mubr.msk.f32.gmra.mxu1 %vm783_vm2, %v767_v62 }
 0x141   :  { %v768_v6 = vmax.f32 %v690_v3, 0.0  ;;  %v705_v8 = vadd.f32 %v6628_v5, %v7789_v7 }
 0x142   :  { %v699_v9 = vpop.f32.mrf.mxu0 }
 0x143   :  { %v700_v10 = vadd.f32 %v7789_v7, %v699_v9  ;;  %6727 = vmatprep.mubr.msk.f32.mxu1 %vm783_vm2, %v768_v6  ;;  %v771_v11 = vmax.f32 %v705_v8, 0.0  ;;  %v7933_v7 = vld [vmem:[%s10123_s5] ss:$0 sm:$0xff] }
 0x144   :  { %6728 = vmatmul.mubr.msk.f32.gmra.mxu1 %vm783_vm2, %v769_v4 }
 0x145   :  { %v770_v12 = vmax.f32 %v700_v10, 0.0 }
 0x147   :  { %6730 = vmatprep.mubr.msk.f32.mxu1 %vm783_vm2, %v770_v12 }
 0x148   :  { %6731 = vmatmul.mubr.msk.f32.gmra.mxu1 %vm783_vm2, %v771_v11 }
 0x18c   :  { %v6639_v14 = vpop.f32.mrf.mxu1 }
 0x18d   :  { %v1048_v15 = vadd.f32 %v6639_v14, %v7933_v7 }
 0x18e   :  { %v1042_v16 = vpop.f32.mrf.mxu1 }
 0x18f   :  { %v1043_v17 = vadd.f32 %v7933_v7, %v1042_v16  ;;  %v1362_v20 = vmax.f32 %v1048_v15, 0.0 }
 0x190   :  { %v6642_v18 = vpop.f32.mrf.mxu1 }
 0x191   :  { %v1361_v19 = vmax.f32 %v1043_v17, 0.0  ;;  %v1058_v21 = vadd.f32 %v6642_v18, %v7933_v7 }
 0x192   :  { %v1052_v22 = vpop.f32.mrf.mxu1 }
 0x193   :  { %v1053_v23 = vadd.f32 %v7933_v7, %v1052_v22  ;;  %6741 = vmatprep.mubr.msk.f32.mxu0 %vm783_vm2, %v1361_v19  ;;  %v1364_v27 = vmax.f32 %v1058_v21, 0.0 }
 0x194   :  { %v6645_v24 = vpop.f32.mrf.mxu1  ;;  %6742 = vmatmul.mubr.msk.f32.vlgmr.msra.gmra.mxu0 %vm783_vm2, %v1362_v20 }
 0x195   :  { %v1363_v25 = vmax.f32 %v1053_v23, 0.0  ;;  %v1068_v26 = vadd.f32 %v6645_v24, %v7933_v7 }
 0x196   :  { %v1062_v28 = vpop.f32.mrf.mxu1 }
 0x197   :  { %v1063_v29 = vadd.f32 %v7933_v7, %v1062_v28  ;;  %6744 = vmatprep.mubr.msk.f32.mxu0 %vm783_vm2, %v1363_v25  ;;  %v1366_v30 = vmax.f32 %v1068_v26, 0.0 }
 0x198   :  { %v6648_v31 = vpop.f32.mrf.mxu1  ;;  %6745 = vmatmul.mubr.msk.f32.gmra.mxu0 %vm783_vm2, %v1364_v27 }
 0x199   :  { %v1365_v32 = vmax.f32 %v1063_v29, 0.0  ;;  %v1078_v33 = vadd.f32 %v6648_v31, %v7933_v7 }
 0x19a   :  { %v1072_v34 = vpop.f32.mrf.mxu1 }
 0x19b   :  { %v1073_v35 = vadd.f32 %v7933_v7, %v1072_v34  ;;  %6747 = vmatprep.mubr.msk.f32.mxu0 %vm783_vm2, %v1365_v32  ;;  %v1368_v36 = vmax.f32 %v1078_v33, 0.0 }
 0x19c   :  { %v6651_v37 = vpop.f32.mrf.mxu1  ;;  %6748 = vmatmul.mubr.msk.f32.gmra.mxu0 %vm783_vm2, %v1366_v30 }
 0x19d   :  { %v1367_v38 = vmax.f32 %v1073_v35, 0.0  ;;  %v1088_v39 = vadd.f32 %v6651_v37, %v7933_v7 }
 0x19e   :  { %v1082_v40 = vpop.f32.mrf.mxu1 }
 0x19f   :  { %v1083_v41 = vadd.f32 %v7933_v7, %v1082_v40  ;;  %6750 = vmatprep.mubr.msk.f32.mxu0 %vm783_vm2, %v1367_v38  ;;  %v1370_v42 = vmax.f32 %v1088_v39, 0.0 }
 0x1a0   :  { %v6654_v43 = vpop.f32.mrf.mxu1  ;;  %6751 = vmatmul.mubr.msk.f32.gmra.mxu0 %vm783_vm2, %v1368_v36 }
 0x1a1   :  { %v1369_v44 = vmax.f32 %v1083_v41, 0.0  ;;  %v1098_v45 = vadd.f32 %v6654_v43, %v7933_v7 }
 0x1a2   :  { %v1092_v46 = vpop.f32.mrf.mxu1 }
 0x1a3   :  { %v1093_v47 = vadd.f32 %v7933_v7, %v1092_v46  ;;  %6753 = vmatprep.mubr.msk.f32.mxu0 %vm783_vm2, %v1369_v44  ;;  %v1372_v48 = vmax.f32 %v1098_v45, 0.0 }
 0x1a4   :  { %v6657_v49 = vpop.f32.mrf.mxu1  ;;  %6754 = vmatmul.mubr.msk.f32.gmra.mxu0 %vm783_vm2, %v1370_v42 }
 0x1a5   :  { %v1371_v50 = vmax.f32 %v1093_v47, 0.0  ;;  %v1108_v51 = vadd.f32 %v6657_v49, %v7933_v7 }
 0x1a6   :  { %v1102_v52 = vpop.f32.mrf.mxu1 }
 0x1a7   :  { %v1103_v53 = vadd.f32 %v7933_v7, %v1102_v52  ;;  %6756 = vmatprep.mubr.msk.f32.mxu0 %vm783_vm2, %v1371_v50  ;;  %v1374_v54 = vmax.f32 %v1108_v51, 0.0 }
 0x1a8   :  { %v6660_v55 = vpop.f32.mrf.mxu1  ;;  %6757 = vmatmul.mubr.msk.f32.gmra.mxu0 %vm783_vm2, %v1372_v48 }
 0x1a9   :  { %v1373_v56 = vmax.f32 %v1103_v53, 0.0  ;;  %v1118_v57 = vadd.f32 %v6660_v55, %v7933_v7 }
 0x1aa   :  { %v1112_v58 = vpop.f32.mrf.mxu1 }
 0x1ab   :  { %v1113_v59 = vadd.f32 %v7933_v7, %v1112_v58  ;;  %6759 = vmatprep.mubr.msk.f32.mxu0 %vm783_vm2, %v1373_v56  ;;  %v1376_v60 = vmax.f32 %v1118_v57, 0.0 }
 0x1ac   :  { %v6663_v61 = vpop.f32.mrf.mxu1  ;;  %6760 = vmatmul.mubr.msk.f32.gmra.mxu0 %vm783_vm2, %v1374_v54 }
 0x1ad   :  { %v1375_v62 = vmax.f32 %v1113_v59, 0.0  ;;  %v1128_v63 = vadd.f32 %v6663_v61, %v7933_v7 }
 0x1ae   :  { %v1122_v0 = vpop.f32.mrf.mxu1 }
 0x1af   :  { %v1123_v1 = vadd.f32 %v7933_v7, %v1122_v0  ;;  %6762 = vmatprep.mubr.msk.f32.mxu0 %vm783_vm2, %v1375_v62  ;;  %v1378_v2 = vmax.f32 %v1128_v63, 0.0 }
 0x1b0   :  { %v6666_v3 = vpop.f32.mrf.mxu1  ;;  %6763 = vmatmul.mubr.msk.f32.gmra.mxu0 %vm783_vm2, %v1376_v60 }
 0x1b1   :  { %v1377_v4 = vmax.f32 %v1123_v1, 0.0  ;;  %v1138_v5 = vadd.f32 %v6666_v3, %v7933_v7 }
 0x1b2   :  { %v1132_v6 = vpop.f32.mrf.mxu1 }
 0x1b3   :  { %v1133_v8 = vadd.f32 %v7933_v7, %v1132_v6  ;;  %6765 = vmatprep.mubr.msk.f32.mxu0 %vm783_vm2, %v1377_v4  ;;  %v1380_v9 = vmax.f32 %v1138_v5, 0.0 }
 0x1b4   :  { %v6669_v10 = vpop.f32.mrf.mxu1  ;;  %6766 = vmatmul.mubr.msk.f32.gmra.mxu0 %vm783_vm2, %v1378_v2 }
 0x1b5   :  { %v1379_v11 = vmax.f32 %v1133_v8, 0.0  ;;  %v1148_v12 = vadd.f32 %v6669_v10, %v7933_v7 }
 0x1b6   :  { %v1142_v13 = vpop.f32.mrf.mxu1 }
 0x1b7   :  { %v1143_v14 = vadd.f32 %v7933_v7, %v1142_v13  ;;  %6768 = vmatprep.mubr.msk.f32.mxu0 %vm783_vm2, %v1379_v11  ;;  %v1382_v15 = vmax.f32 %v1148_v12, 0.0 }
 0x1b8   :  { %v6672_v16 = vpop.f32.mrf.mxu1  ;;  %6769 = vmatmul.mubr.msk.f32.gmra.mxu0 %vm783_vm2, %v1380_v9 }
 0x1b9   :  { %v1381_v17 = vmax.f32 %v1143_v14, 0.0  ;;  %v1158_v18 = vadd.f32 %v6672_v16, %v7933_v7 }
 0x1ba   :  { %v1152_v19 = vpop.f32.mrf.mxu1 }
 0x1bb   :  { %v1153_v20 = vadd.f32 %v7933_v7, %v1152_v19  ;;  %6771 = vmatprep.mubr.msk.f32.mxu0 %vm783_vm2, %v1381_v17  ;;  %v1384_v21 = vmax.f32 %v1158_v18, 0.0 }
 0x1bc   :  { %v6675_v22 = vpop.f32.mrf.mxu1  ;;  %6772 = vmatmul.mubr.msk.f32.gmra.mxu0 %vm783_vm2, %v1382_v15 }
 0x1bd   :  { %v1383_v23 = vmax.f32 %v1153_v20, 0.0  ;;  %v1168_v24 = vadd.f32 %v6675_v22, %v7933_v7 }
 0x1be   :  { %v1162_v25 = vpop.f32.mrf.mxu1 }
 0x1bf   :  { %v1163_v26 = vadd.f32 %v7933_v7, %v1162_v25  ;;  %6774 = vmatprep.mubr.msk.f32.mxu0 %vm783_vm2, %v1383_v23  ;;  %v1386_v27 = vmax.f32 %v1168_v24, 0.0 }
 0x1c0   :  { %v6678_v28 = vpop.f32.mrf.mxu1  ;;  %6775 = vmatmul.mubr.msk.f32.gmra.mxu0 %vm783_vm2, %v1384_v21 }
 0x1c1   :  { %v1385_v29 = vmax.f32 %v1163_v26, 0.0  ;;  %v1178_v30 = vadd.f32 %v6678_v28, %v7933_v7 }
 0x1c2   :  { %v1172_v31 = vpop.f32.mrf.mxu1 }
 0x1c3   :  { %v1173_v32 = vadd.f32 %v7933_v7, %v1172_v31  ;;  %6777 = vmatprep.mubr.msk.f32.mxu0 %vm783_vm2, %v1385_v29  ;;  %v1388_v33 = vmax.f32 %v1178_v30, 0.0 }
 0x1c4   :  { %v6681_v34 = vpop.f32.mrf.mxu1  ;;  %6778 = vmatmul.mubr.msk.f32.gmra.mxu0 %vm783_vm2, %v1386_v27 }
 0x1c5   :  { %v1387_v35 = vmax.f32 %v1173_v32, 0.0  ;;  %v1188_v36 = vadd.f32 %v6681_v34, %v7933_v7 }
 0x1c6   :  { %v1182_v37 = vpop.f32.mrf.mxu1 }
 0x1c7   :  { %v1183_v38 = vadd.f32 %v7933_v7, %v1182_v37  ;;  %6780 = vmatprep.mubr.msk.f32.mxu0 %vm783_vm2, %v1387_v35  ;;  %v1390_v39 = vmax.f32 %v1188_v36, 0.0 }
 0x1c8   :  { %v6684_v40 = vpop.f32.mrf.mxu1  ;;  %6781 = vmatmul.mubr.msk.f32.gmra.mxu0 %vm783_vm2, %v1388_v33 }
 0x1c9   :  { %v1389_v41 = vmax.f32 %v1183_v38, 0.0  ;;  %v1198_v42 = vadd.f32 %v6684_v40, %v7933_v7 }
 0x1ca   :  { %v1192_v43 = vpop.f32.mrf.mxu1 }
 0x1cb   :  { %v1193_v44 = vadd.f32 %v7933_v7, %v1192_v43  ;;  %6783 = vmatprep.mubr.msk.f32.mxu0 %vm783_vm2, %v1389_v41  ;;  %v1392_v45 = vmax.f32 %v1198_v42, 0.0 }
 0x1cc   :  { %v6687_v46 = vpop.f32.mrf.mxu1  ;;  %6784 = vmatmul.mubr.msk.f32.gmra.mxu0 %vm783_vm2, %v1390_v39 }
 0x1cd   :  { %v1391_v47 = vmax.f32 %v1193_v44, 0.0  ;;  %v1208_v48 = vadd.f32 %v6687_v46, %v7933_v7 }
 0x1ce   :  { %v1202_v49 = vpop.f32.mrf.mxu1 }
 0x1cf   :  { %v1203_v50 = vadd.f32 %v7933_v7, %v1202_v49  ;;  %6786 = vmatprep.mubr.msk.f32.mxu0 %vm783_vm2, %v1391_v47  ;;  %v1394_v51 = vmax.f32 %v1208_v48, 0.0 }
 0x1d0   :  { %v6690_v52 = vpop.f32.mrf.mxu1  ;;  %6787 = vmatmul.mubr.msk.f32.gmra.mxu0 %vm783_vm2, %v1392_v45 }
 0x1d1   :  { %v1393_v53 = vmax.f32 %v1203_v50, 0.0  ;;  %v1218_v54 = vadd.f32 %v6690_v52, %v7933_v7 }
 0x1d2   :  { %v1212_v55 = vpop.f32.mrf.mxu1 }
 0x1d3   :  { %v1213_v56 = vadd.f32 %v7933_v7, %v1212_v55  ;;  %6789 = vmatprep.mubr.msk.f32.mxu0 %vm783_vm2, %v1393_v53  ;;  %v1396_v57 = vmax.f32 %v1218_v54, 0.0 }
 0x1d4   :  { %v6693_v58 = vpop.f32.mrf.mxu1  ;;  %6790 = vmatmul.mubr.msk.f32.gmra.mxu0 %vm783_vm2, %v1394_v51 }
 0x1d5   :  { %v1395_v59 = vmax.f32 %v1213_v56, 0.0  ;;  %v1228_v60 = vadd.f32 %v6693_v58, %v7933_v7 }
 0x1d6   :  { %v1222_v61 = vpop.f32.mrf.mxu1 }
 0x1d7   :  { %v1223_v62 = vadd.f32 %v7933_v7, %v1222_v61  ;;  %6792 = vmatprep.mubr.msk.f32.mxu0 %vm783_vm2, %v1395_v59  ;;  %v1398_v63 = vmax.f32 %v1228_v60, 0.0 }
 0x1d8   :  { %v6696_v0 = vpop.f32.mrf.mxu1  ;;  %6793 = vmatmul.mubr.msk.f32.gmra.mxu0 %vm783_vm2, %v1396_v57 }
 0x1d9   :  { %v1397_v1 = vmax.f32 %v1223_v62, 0.0  ;;  %v1238_v2 = vadd.f32 %v6696_v0, %v7933_v7 }
 0x1da   :  { %v1232_v3 = vpop.f32.mrf.mxu1 }
 0x1db   :  { %v1233_v4 = vadd.f32 %v7933_v7, %v1232_v3  ;;  %6795 = vmatprep.mubr.msk.f32.mxu0 %vm783_vm2, %v1397_v1  ;;  %v1400_v5 = vmax.f32 %v1238_v2, 0.0 }
 0x1dc   :  { %v6699_v6 = vpop.f32.mrf.mxu1  ;;  %6796 = vmatmul.mubr.msk.f32.gmra.mxu0 %vm783_vm2, %v1398_v63 }
 0x1dd   :  { %v1399_v8 = vmax.f32 %v1233_v4, 0.0  ;;  %v1248_v9 = vadd.f32 %v6699_v6, %v7933_v7 }
 0x1de   :  { %v1242_v10 = vpop.f32.mrf.mxu1 }
 0x1df   :  { %v1243_v11 = vadd.f32 %v7933_v7, %v1242_v10  ;;  %6798 = vmatprep.mubr.msk.f32.mxu0 %vm783_vm2, %v1399_v8  ;;  %v1402_v12 = vmax.f32 %v1248_v9, 0.0 }
 0x1e0   :  { %v6702_v13 = vpop.f32.mrf.mxu1  ;;  %6799 = vmatmul.mubr.msk.f32.gmra.mxu0 %vm783_vm2, %v1400_v5 }
 0x1e1   :  { %v1401_v14 = vmax.f32 %v1243_v11, 0.0  ;;  %v1258_v15 = vadd.f32 %v6702_v13, %v7933_v7 }
 0x1e2   :  { %v1252_v16 = vpop.f32.mrf.mxu1 }
 0x1e3   :  { %v1253_v17 = vadd.f32 %v7933_v7, %v1252_v16  ;;  %6801 = vmatprep.mubr.msk.f32.mxu0 %vm783_vm2, %v1401_v14  ;;  %v1404_v18 = vmax.f32 %v1258_v15, 0.0 }
 0x1e4   :  { %v6705_v19 = vpop.f32.mrf.mxu1  ;;  %6802 = vmatmul.mubr.msk.f32.gmra.mxu0 %vm783_vm2, %v1402_v12 }
 0x1e5   :  { %v1403_v20 = vmax.f32 %v1253_v17, 0.0  ;;  %v1268_v21 = vadd.f32 %v6705_v19, %v7933_v7  ;;  %v2668_v17 = vld [vmem:[%s10128_s10 + $0x18] sm:$0xff]  ;;  %v8072_v19 = vld [vmem:[%s10125_s7] ss:$0 sm:$0xff] }
 0x1e6   :  { %v1262_v22 = vpop.f32.mrf.mxu1  ;;  %6935 = vmatprep.subr.mxu0 %v2668_v17 }
 0x1e7   :  { %v1263_v23 = vadd.f32 %v7933_v7, %v1262_v22  ;;  %6804 = vmatprep.mubr.msk.f32.mxu0 %vm783_vm2, %v1403_v20  ;;  %v1406_v24 = vmax.f32 %v1268_v21, 0.0  ;;  %6936 = vmatpush3.msra.mxu0 %v2668_v17  ;;  %v2666_v21 = vld [vmem:[%s10128_s10 + $0x8] sm:$0xff]  ;;  %v2665_v22 = vld [vmem:[%s10128_s10] sm:$0xff] }
 0x1e8   :  { %v6708_v25 = vpop.f32.mrf.mxu1  ;;  %6805 = vmatmul.mubr.msk.f32.gmra.mxu0 %vm783_vm2, %v1404_v18 }
 0x1e9   :  { %v1405_v26 = vmax.f32 %v1263_v23, 0.0  ;;  %v1278_v27 = vadd.f32 %v6708_v25, %v7933_v7 }
 0x1ea   :  { %v1272_v28 = vpop.f32.mrf.mxu1 }
 0x1eb   :  { %v1273_v29 = vadd.f32 %v7933_v7, %v1272_v28  ;;  %6807 = vmatprep.mubr.msk.f32.mxu0 %vm783_vm2, %v1405_v26  ;;  %v1408_v30 = vmax.f32 %v1278_v27, 0.0 }
 0x1ec   :  { %v6711_v31 = vpop.f32.mrf.mxu1  ;;  %6808 = vmatmul.mubr.msk.f32.gmra.mxu0 %vm783_vm2, %v1406_v24 }
 0x1ed   :  { %v1407_v32 = vmax.f32 %v1273_v29, 0.0  ;;  %v1288_v33 = vadd.f32 %v6711_v31, %v7933_v7 }
 0x1ee   :  { %v1282_v34 = vpop.f32.mrf.mxu1 }
 0x1ef   :  { %v1283_v35 = vadd.f32 %v7933_v7, %v1282_v34  ;;  %6810 = vmatprep.mubr.msk.f32.mxu0 %vm783_vm2, %v1407_v32  ;;  %v1410_v36 = vmax.f32 %v1288_v33, 0.0 }
 0x1f0   :  { %v6714_v37 = vpop.f32.mrf.mxu1  ;;  %6811 = vmatmul.mubr.msk.f32.gmra.mxu0 %vm783_vm2, %v1408_v30 }
 0x1f1   :  { %v1409_v38 = vmax.f32 %v1283_v35, 0.0  ;;  %v1298_v39 = vadd.f32 %v6714_v37, %v7933_v7 }
 0x1f2   :  { %v1292_v40 = vpop.f32.mrf.mxu1 }
 0x1f3   :  { %v1293_v41 = vadd.f32 %v7933_v7, %v1292_v40  ;;  %6813 = vmatprep.mubr.msk.f32.mxu0 %vm783_vm2, %v1409_v38  ;;  %v1412_v42 = vmax.f32 %v1298_v39, 0.0 }
 0x1f4   :  { %v6717_v43 = vpop.f32.mrf.mxu1  ;;  %6814 = vmatmul.mubr.msk.f32.gmra.mxu0 %vm783_vm2, %v1410_v36 }
 0x1f5   :  { %v1411_v44 = vmax.f32 %v1293_v41, 0.0  ;;  %v1308_v45 = vadd.f32 %v6717_v43, %v7933_v7 }
 0x1f6   :  { %v1302_v46 = vpop.f32.mrf.mxu1 }
 0x1f7   :  { %v1303_v47 = vadd.f32 %v7933_v7, %v1302_v46  ;;  %6816 = vmatprep.mubr.msk.f32.mxu0 %vm783_vm2, %v1411_v44  ;;  %v1414_v48 = vmax.f32 %v1308_v45, 0.0 }
 0x1f8   :  { %v6720_v49 = vpop.f32.mrf.mxu1  ;;  %6817 = vmatmul.mubr.msk.f32.gmra.mxu0 %vm783_vm2, %v1412_v42 }
 0x1f9   :  { %v1413_v50 = vmax.f32 %v1303_v47, 0.0  ;;  %v1318_v51 = vadd.f32 %v6720_v49, %v7933_v7 }
 0x1fa   :  { %v1312_v52 = vpop.f32.mrf.mxu1 }
 0x1fb   :  { %v1313_v53 = vadd.f32 %v7933_v7, %v1312_v52  ;;  %6819 = vmatprep.mubr.msk.f32.mxu0 %vm783_vm2, %v1413_v50  ;;  %v1416_v54 = vmax.f32 %v1318_v51, 0.0 }
 0x1fc   :  { %v6723_v55 = vpop.f32.mrf.mxu1  ;;  %6820 = vmatmul.mubr.msk.f32.gmra.mxu0 %vm783_vm2, %v1414_v48 }
 0x1fd   :  { %v1415_v56 = vmax.f32 %v1313_v53, 0.0  ;;  %v1328_v57 = vadd.f32 %v6723_v55, %v7933_v7 }
 0x1fe   :  { %v1322_v58 = vpop.f32.mrf.mxu1 }
 0x1ff   :  { %v1323_v59 = vadd.f32 %v7933_v7, %v1322_v58  ;;  %6822 = vmatprep.mubr.msk.f32.mxu0 %vm783_vm2, %v1415_v56  ;;  %v1418_v60 = vmax.f32 %v1328_v57, 0.0 }
 0x200   :  { %v6726_v61 = vpop.f32.mrf.mxu1  ;;  %6823 = vmatmul.mubr.msk.f32.gmra.mxu0 %vm783_vm2, %v1416_v54 }
 0x201   :  { %v1417_v62 = vmax.f32 %v1323_v59, 0.0  ;;  %v1338_v63 = vadd.f32 %v6726_v61, %v7933_v7 }
 0x202   :  { %v1332_v0 = vpop.f32.mrf.mxu1 }
 0x203   :  { %v1333_v1 = vadd.f32 %v7933_v7, %v1332_v0  ;;  %6825 = vmatprep.mubr.msk.f32.mxu0 %vm783_vm2, %v1417_v62  ;;  %v1420_v2 = vmax.f32 %v1338_v63, 0.0 }
 0x204   :  { %v6729_v3 = vpop.f32.mrf.mxu1  ;;  %6826 = vmatmul.mubr.msk.f32.gmra.mxu0 %vm783_vm2, %v1418_v60 }
 0x205   :  { %v1419_v4 = vmax.f32 %v1333_v1, 0.0  ;;  %v1348_v5 = vadd.f32 %v6729_v3, %v7933_v7 }
 0x206   :  { %v1342_v6 = vpop.f32.mrf.mxu1 }
 0x207   :  { %v1343_v8 = vadd.f32 %v7933_v7, %v1342_v6  ;;  %6828 = vmatprep.mubr.msk.f32.mxu0 %vm783_vm2, %v1419_v4  ;;  %v1422_v9 = vmax.f32 %v1348_v5, 0.0 }
 0x208   :  { %v6732_v10 = vpop.f32.mrf.mxu1  ;;  %6829 = vmatmul.mubr.msk.f32.gmra.mxu0 %vm783_vm2, %v1420_v2 }
 0x209   :  { %v1421_v11 = vmax.f32 %v1343_v8, 0.0  ;;  %v1358_v12 = vadd.f32 %v6732_v10, %v7933_v7 }
 0x20a   :  { %v1352_v13 = vpop.f32.mrf.mxu1 }
 0x20b   :  { %v1353_v14 = vadd.f32 %v7933_v7, %v1352_v13  ;;  %6831 = vmatprep.mubr.msk.f32.mxu0 %vm783_vm2, %v1421_v11  ;;  %v1424_v15 = vmax.f32 %v1358_v12, 0.0  ;;  %v2667_v7 = vld [vmem:[%s10128_s10 + $0x10] sm:$0xff] }
 0x20c   :  { %6832 = vmatmul.mubr.msk.f32.gmra.mxu0 %vm783_vm2, %v1422_v9  ;;  %6937 = vmatprep.subr.mxu0 %v2667_v7 }
 0x20d   :  { %v1423_v16 = vmax.f32 %v1353_v14, 0.0  ;;  %6938 = vmatpush3.msra.mxu0 %v2667_v7 }
 0x20e   :  { %6939 = vmatprep.subr.mxu0 %v2666_v21 }
 0x20f   :  { %6834 = vmatprep.mubr.msk.f32.mxu0 %vm783_vm2, %v1423_v16  ;;  %6940 = vmatpush3.msra.mxu0 %v2666_v21 }
 0x210   :  { %6835 = vmatmul.mubr.msk.f32.gmra.mxu0 %vm783_vm2, %v1424_v15  ;;  %6941 = vmatprep.subr.mxu0 %v2665_v22 }
 0x211   :  { %6942 = vmatpush3.msra.mxu0 %v2665_v22 }
 0x254   :  { %v6743_v18 = vpop.f32.mrf.mxu0 }
 0x255   :  { %v1700_v24 = vadd.f32 %v6743_v18, %v8072_v19 }
 0x256   :  { %v1694_v20 = vpop.f32.mrf.mxu0 }
 0x257   :  { %v1695_v23 = vadd.f32 %v8072_v19, %v1694_v20 }
 0x258   :  { %v6746_v25 = vpop.f32.mrf.mxu0 }
 0x259   :  { %6839 = vmatprep.mubr.msk.f32.mxu1 %vm126_vm1, %v1695_v23  ;;  %v1710_v28 = vadd.f32 %v6746_v25, %v8072_v19 }
 0x25a   :  { %v1704_v26 = vpop.f32.mrf.mxu0  ;;  %6840 = vmatmul.mubr.msk.f32.vlgmr.msra.gmra.mxu1 %vm126_vm1, %v1700_v24 }
 0x25b   :  { %v1705_v27 = vadd.f32 %v8072_v19, %v1704_v26 }
 0x25c   :  { %v6749_v29 = vpop.f32.mrf.mxu0 }
 0x25d   :  { %6842 = vmatprep.mubr.msk.f32.mxu1 %vm126_vm1, %v1705_v27  ;;  %v1720_v30 = vadd.f32 %v6749_v29, %v8072_v19 }
 0x25e   :  { %v1714_v31 = vpop.f32.mrf.mxu0  ;;  %6843 = vmatmul.mubr.msk.f32.gmra.mxu1 %vm126_vm1, %v1710_v28 }
 0x25f   :  { %v1715_v32 = vadd.f32 %v8072_v19, %v1714_v31 }
 0x260   :  { %v6752_v33 = vpop.f32.mrf.mxu0 }
 0x261   :  { %6845 = vmatprep.mubr.msk.f32.mxu1 %vm126_vm1, %v1715_v32  ;;  %v1730_v34 = vadd.f32 %v6752_v33, %v8072_v19 }
 0x262   :  { %v1724_v35 = vpop.f32.mrf.mxu0  ;;  %6846 = vmatmul.mubr.msk.f32.gmra.mxu1 %vm126_vm1, %v1720_v30 }
 0x263   :  { %v1725_v36 = vadd.f32 %v8072_v19, %v1724_v35 }
 0x264   :  { %v6755_v37 = vpop.f32.mrf.mxu0 }
 0x265   :  { %6848 = vmatprep.mubr.msk.f32.mxu1 %vm126_vm1, %v1725_v36  ;;  %v1740_v38 = vadd.f32 %v6755_v37, %v8072_v19 }
 0x266   :  { %v1734_v39 = vpop.f32.mrf.mxu0  ;;  %6849 = vmatmul.mubr.msk.f32.gmra.mxu1 %vm126_vm1, %v1730_v34 }
 0x267   :  { %v1735_v40 = vadd.f32 %v8072_v19, %v1734_v39 }
 0x268   :  { %v6758_v41 = vpop.f32.mrf.mxu0 }
 0x269   :  { %6851 = vmatprep.mubr.msk.f32.mxu1 %vm126_vm1, %v1735_v40  ;;  %v1750_v42 = vadd.f32 %v6758_v41, %v8072_v19 }
 0x26a   :  { %v1744_v43 = vpop.f32.mrf.mxu0  ;;  %6852 = vmatmul.mubr.msk.f32.gmra.mxu1 %vm126_vm1, %v1740_v38 }
 0x26b   :  { %v1745_v44 = vadd.f32 %v8072_v19, %v1744_v43 }
 0x26c   :  { %v6761_v45 = vpop.f32.mrf.mxu0 }
 0x26d   :  { %6854 = vmatprep.mubr.msk.f32.mxu1 %vm126_vm1, %v1745_v44  ;;  %v1760_v46 = vadd.f32 %v6761_v45, %v8072_v19 }
 0x26e   :  { %v1754_v47 = vpop.f32.mrf.mxu0  ;;  %6855 = vmatmul.mubr.msk.f32.gmra.mxu1 %vm126_vm1, %v1750_v42 }
 0x26f   :  { %v1755_v48 = vadd.f32 %v8072_v19, %v1754_v47 }
 0x270   :  { %v6764_v49 = vpop.f32.mrf.mxu0 }
 0x271   :  { %6857 = vmatprep.mubr.msk.f32.mxu1 %vm126_vm1, %v1755_v48  ;;  %v1770_v50 = vadd.f32 %v6764_v49, %v8072_v19 }
 0x272   :  { %v1764_v51 = vpop.f32.mrf.mxu0  ;;  %6858 = vmatmul.mubr.msk.f32.gmra.mxu1 %vm126_vm1, %v1760_v46 }
 0x273   :  { %v1765_v52 = vadd.f32 %v8072_v19, %v1764_v51 }
 0x274   :  { %v6767_v53 = vpop.f32.mrf.mxu0 }
 0x275   :  { %6860 = vmatprep.mubr.msk.f32.mxu1 %vm126_vm1, %v1765_v52  ;;  %v1780_v54 = vadd.f32 %v6767_v53, %v8072_v19 }
 0x276   :  { %v1774_v55 = vpop.f32.mrf.mxu0  ;;  %6861 = vmatmul.mubr.msk.f32.gmra.mxu1 %vm126_vm1, %v1770_v50 }
 0x277   :  { %v1775_v56 = vadd.f32 %v8072_v19, %v1774_v55 }
 0x278   :  { %v6770_v57 = vpop.f32.mrf.mxu0 }
 0x279   :  { %6863 = vmatprep.mubr.msk.f32.mxu1 %vm126_vm1, %v1775_v56  ;;  %v1790_v58 = vadd.f32 %v6770_v57, %v8072_v19 }
 0x27a   :  { %v1784_v59 = vpop.f32.mrf.mxu0  ;;  %6864 = vmatmul.mubr.msk.f32.gmra.mxu1 %vm126_vm1, %v1780_v54 }
 0x27b   :  { %v1785_v60 = vadd.f32 %v8072_v19, %v1784_v59 }
 0x27c   :  { %v6773_v61 = vpop.f32.mrf.mxu0 }
 0x27d   :  { %6866 = vmatprep.mubr.msk.f32.mxu1 %vm126_vm1, %v1785_v60  ;;  %v1800_v62 = vadd.f32 %v6773_v61, %v8072_v19 }
 0x27e   :  { %v1794_v63 = vpop.f32.mrf.mxu0  ;;  %6867 = vmatmul.mubr.msk.f32.gmra.mxu1 %vm126_vm1, %v1790_v58 }
 0x27f   :  { %v1795_v0 = vadd.f32 %v8072_v19, %v1794_v63 }
 0x280   :  { %v6776_v1 = vpop.f32.mrf.mxu0 }
 0x281   :  { %6869 = vmatprep.mubr.msk.f32.mxu1 %vm126_vm1, %v1795_v0  ;;  %v1810_v2 = vadd.f32 %v6776_v1, %v8072_v19 }
 0x282   :  { %v1804_v3 = vpop.f32.mrf.mxu0  ;;  %6870 = vmatmul.mubr.msk.f32.gmra.mxu1 %vm126_vm1, %v1800_v62 }
 0x283   :  { %v1805_v4 = vadd.f32 %v8072_v19, %v1804_v3 }
 0x284   :  { %v6779_v5 = vpop.f32.mrf.mxu0 }
 0x285   :  { %6872 = vmatprep.mubr.msk.f32.mxu1 %vm126_vm1, %v1805_v4  ;;  %v1820_v6 = vadd.f32 %v6779_v5, %v8072_v19 }
 0x286   :  { %v1814_v8 = vpop.f32.mrf.mxu0  ;;  %6873 = vmatmul.mubr.msk.f32.gmra.mxu1 %vm126_vm1, %v1810_v2 }
 0x287   :  { %v1815_v9 = vadd.f32 %v8072_v19, %v1814_v8 }
 0x288   :  { %v6782_v10 = vpop.f32.mrf.mxu0 }
 0x289   :  { %6875 = vmatprep.mubr.msk.f32.mxu1 %vm126_vm1, %v1815_v9  ;;  %v1830_v11 = vadd.f32 %v6782_v10, %v8072_v19 }
 0x28a   :  { %v1824_v12 = vpop.f32.mrf.mxu0  ;;  %6876 = vmatmul.mubr.msk.f32.gmra.mxu1 %vm126_vm1, %v1820_v6 }
 0x28b   :  { %v1825_v13 = vadd.f32 %v8072_v19, %v1824_v12 }
 0x28c   :  { %v6785_v14 = vpop.f32.mrf.mxu0 }
 0x28d   :  { %6878 = vmatprep.mubr.msk.f32.mxu1 %vm126_vm1, %v1825_v13  ;;  %v1840_v15 = vadd.f32 %v6785_v14, %v8072_v19 }
 0x28e   :  { %v1834_v16 = vpop.f32.mrf.mxu0  ;;  %6879 = vmatmul.mubr.msk.f32.gmra.mxu1 %vm126_vm1, %v1830_v11 }
 0x28f   :  { %v1835_v17 = vadd.f32 %v8072_v19, %v1834_v16 }
 0x290   :  { %v6788_v7 = vpop.f32.mrf.mxu0 }
 0x291   :  { %6881 = vmatprep.mubr.msk.f32.mxu1 %vm126_vm1, %v1835_v17  ;;  %v1850_v18 = vadd.f32 %v6788_v7, %v8072_v19 }
 0x292   :  { %v1844_v20 = vpop.f32.mrf.mxu0  ;;  %6882 = vmatmul.mubr.msk.f32.gmra.mxu1 %vm126_vm1, %v1840_v15 }
 0x293   :  { %v1845_v21 = vadd.f32 %v8072_v19, %v1844_v20 }
 0x294   :  { %v6791_v22 = vpop.f32.mrf.mxu0 }
 0x295   :  { %6884 = vmatprep.mubr.msk.f32.mxu1 %vm126_vm1, %v1845_v21  ;;  %v1860_v23 = vadd.f32 %v6791_v22, %v8072_v19 }
 0x296   :  { %v1854_v24 = vpop.f32.mrf.mxu0  ;;  %6885 = vmatmul.mubr.msk.f32.gmra.mxu1 %vm126_vm1, %v1850_v18 }
 0x297   :  { %v1855_v25 = vadd.f32 %v8072_v19, %v1854_v24  ;;  %v7429_v24 = vmov 0  }
 0x298   :  { %v6794_v26 = vpop.f32.mrf.mxu0  ;;  %7149 = vset.pattern.permute.xlu1 %v7429_v24  ;;  %7148 = vset.pattern.permute.xlu0 %v7429_v24  ;;  %v4701_v24 = vld [vmem:[%s10119_s1 + $0xe0] sm:$0xff] }
 0x299   :  { %6887 = vmatprep.mubr.msk.f32.mxu1 %vm126_vm1, %v1855_v25  ;;  %v1870_v27 = vadd.f32 %v6794_v26, %v8072_v19  ;;  %v4674_v25 = vld [vmem:[%s10119_s1 + $0x8] sm:$0xff]  ;;  %v4676_v26 = vld [vmem:[%s10119_s1 + $0x18] sm:$0xff] }
 0x29a   :  { %v1864_v28 = vpop.f32.mrf.mxu0  ;;  %6888 = vmatmul.mubr.msk.f32.gmra.mxu1 %vm126_vm1, %v1860_v23  ;;  %v3320_v23 = vld [vmem:[%s10130_s12 + $0x18] sm:$0xff]  ;;  %4743 = vperm.xlu1 %7149, %v4674_v25  }
 0x29b   :  { %v1865_v29 = vadd.f32 %v8072_v19, %v1864_v28  ;;  %7039 = vmatprep.subr.mxu1 %v3320_v23  ;;  %v4678_v28 = vld [vmem:[%s10119_s1 + $0x28] sm:$0xff] }
 0x29c   :  { %v6797_v30 = vpop.f32.mrf.mxu0  ;;  %7040 = vmatpush3.msra.mxu1 %v3320_v23 }
 0x29d   :  { %6890 = vmatprep.mubr.msk.f32.mxu1 %vm126_vm1, %v1865_v29  ;;  %v1880_v31 = vadd.f32 %v6797_v30, %v8072_v19  ;;  %v4679_v29 = vld [vmem:[%s10119_s1 + $0x30] sm:$0xff]  ;;  %v4680_v30 = vld [vmem:[%s10119_s1 + $0x38] sm:$0xff] }
 0x29e   :  { %v1874_v32 = vpop.f32.mrf.mxu0  ;;  %6891 = vmatmul.mubr.msk.f32.gmra.mxu1 %vm126_vm1, %v1870_v27  ;;  %v4677_v27 = vld [vmem:[%s10119_s1 + $0x20] sm:$0xff] }
 0x29f   :  { %v1875_v33 = vadd.f32 %v8072_v19, %v1874_v32  ;;  %v4681_v32 = vld [vmem:[%s10119_s1 + $0x40] sm:$0xff] }
 0x2a0   :  { %v6800_v34 = vpop.f32.mrf.mxu0 }
 0x2a1   :  { %6893 = vmatprep.mubr.msk.f32.mxu1 %vm126_vm1, %v1875_v33  ;;  %v1890_v35 = vadd.f32 %v6800_v34, %v8072_v19  ;;  %v4683_v33 = vld [vmem:[%s10119_s1 + $0x50] sm:$0xff]  ;;  %v4685_v34 = vld [vmem:[%s10119_s1 + $0x60] sm:$0xff] }
 0x2a2   :  { %v1884_v36 = vpop.f32.mrf.mxu0  ;;  %6894 = vmatmul.mubr.msk.f32.gmra.mxu1 %vm126_vm1, %v1880_v31  ;;  %v3319_v31 = vld [vmem:[%s10130_s12 + $0x10] sm:$0xff] }
 0x2a3   :  { %v1885_v37 = vadd.f32 %v8072_v19, %v1884_v36  ;;  %7041 = vmatprep.subr.mxu1 %v3319_v31 }
 0x2a4   :  { %v6803_v38 = vpop.f32.mrf.mxu0  ;;  %7042 = vmatpush3.msra.mxu1 %v3319_v31 }
 0x2a5   :  { %6896 = vmatprep.mubr.msk.f32.mxu1 %vm126_vm1, %v1885_v37  ;;  %v1900_v39 = vadd.f32 %v6803_v38, %v8072_v19  ;;  %v4687_v37 = vld [vmem:[%s10119_s1 + $0x70] sm:$0xff] }
 0x2a6   :  { %v1894_v40 = vpop.f32.mrf.mxu0  ;;  %6897 = vmatmul.mubr.msk.f32.gmra.mxu1 %vm126_vm1, %v1890_v35  ;;  %v8247_v35 = vld [vmem:[%s10127_s9] ss:$0 sm:$0xff] }
 0x2a7   :  { %v1895_v41 = vadd.f32 %v8072_v19, %v1894_v40 }
 0x2a8   :  { %v6806_v42 = vpop.f32.mrf.mxu0 }
 0x2a9   :  { %6899 = vmatprep.mubr.msk.f32.mxu1 %vm126_vm1, %v1895_v41  ;;  %v1910_v43 = vadd.f32 %v6806_v42, %v8072_v19  ;;  %v4689_v42 = vld [vmem:[%s10119_s1 + $0x80] sm:$0xff] }
 0x2aa   :  { %v1904_v44 = vpop.f32.mrf.mxu0  ;;  %6900 = vmatmul.mubr.msk.f32.gmra.mxu1 %vm126_vm1, %v1900_v39 }
 0x2ab   :  { %v1905_v45 = vadd.f32 %v8072_v19, %v1904_v44  ;;  %v3318_v44 = vld [vmem:[%s10130_s12 + $0x8] sm:$0xff] }
 0x2ac   :  { %v6809_v46 = vpop.f32.mrf.mxu0  ;;  %7043 = vmatprep.subr.mxu1 %v3318_v44 }
 0x2ad   :  { %6902 = vmatprep.mubr.msk.f32.mxu1 %vm126_vm1, %v1905_v45  ;;  %v1920_v47 = vadd.f32 %v6809_v46, %v8072_v19  ;;  %7044 = vmatpush3.msra.mxu1 %v3318_v44 }
 0x2ae   :  { %v1914_v48 = vpop.f32.mrf.mxu0  ;;  %6903 = vmatmul.mubr.msk.f32.gmra.mxu1 %vm126_vm1, %v1910_v43 }
 0x2af   :  { %v1915_v49 = vadd.f32 %v8072_v19, %v1914_v48  ;;  %v4691_v48 = vld [vmem:[%s10119_s1 + $0x90] sm:$0xff] }
 0x2b0   :  { %v6812_v50 = vpop.f32.mrf.mxu0 }
 0x2b1   :  { %6905 = vmatprep.mubr.msk.f32.mxu1 %vm126_vm1, %v1915_v49  ;;  %v1930_v51 = vadd.f32 %v6812_v50, %v8072_v19 }
 0x2b2   :  { %v1924_v52 = vpop.f32.mrf.mxu0  ;;  %6906 = vmatmul.mubr.msk.f32.gmra.mxu1 %vm126_vm1, %v1920_v47 }
 0x2b3   :  { %v1925_v53 = vadd.f32 %v8072_v19, %v1924_v52 }
 0x2b4   :  { %v6815_v54 = vpop.f32.mrf.mxu0 }
 0x2b5   :  { %6908 = vmatprep.mubr.msk.f32.mxu1 %vm126_vm1, %v1925_v53  ;;  %v1940_v55 = vadd.f32 %v6815_v54, %v8072_v19  ;;  %v4673_v53 = vld [vmem:[%s10119_s1] sm:$0xff] }
 0x2b6   :  { %v1934_v56 = vpop.f32.mrf.mxu0  ;;  %6909 = vmatmul.mubr.msk.f32.gmra.mxu1 %vm126_vm1, %v1930_v51  ;;  %v3317_v51 = vld [vmem:[%s10130_s12] sm:$0xff]  ;;  %4740 = vperm.xlu0 %7148, %v4673_v53  }
 0x2b7   :  { %v1935_v57 = vadd.f32 %v8072_v19, %v1934_v56  ;;  %7045 = vmatprep.subr.mxu1 %v3317_v51 }
 0x2b8   :  { %v6818_v58 = vpop.f32.mrf.mxu0  ;;  %7046 = vmatpush3.msra.mxu1 %v3317_v51 }
 0x2b9   :  { %6911 = vmatprep.mubr.msk.f32.mxu1 %vm126_vm1, %v1935_v57  ;;  %v1950_v59 = vadd.f32 %v6818_v58, %v8072_v19  ;;  %v4693_v57 = vld [vmem:[%s10119_s1 + $0xa0] sm:$0xff] }
 0x2ba   :  { %v1944_v60 = vpop.f32.mrf.mxu0  ;;  %6912 = vmatmul.mubr.msk.f32.gmra.mxu1 %vm126_vm1, %v1940_v55 }
 0x2bb   :  { %v1945_v61 = vadd.f32 %v8072_v19, %v1944_v60 }
 0x2bc   :  { %v6821_v62 = vpop.f32.mrf.mxu0 }
 0x2bd   :  { %6914 = vmatprep.mubr.msk.f32.mxu1 %vm126_vm1, %v1945_v61  ;;  %v1960_v63 = vadd.f32 %v6821_v62, %v8072_v19 }
 0x2be   :  { %v1954_v0 = vpop.f32.mrf.mxu0  ;;  %6915 = vmatmul.mubr.msk.f32.gmra.mxu1 %vm126_vm1, %v1950_v59  ;;  %v4682_v59 = vld [vmem:[%s10119_s1 + $0x48] sm:$0xff] }
 0x2bf   :  { %v1955_v1 = vadd.f32 %v8072_v19, %v1954_v0  ;;  %4767 = vperm.xlu0 %7148, %v4682_v59   ;;  %v4710_v59 = vld [vmem:[%s10119_s1 + $0x128] sm:$0xff] }
 0x2c0   :  { %v6824_v2 = vpop.f32.mrf.mxu0 }
 0x2c1   :  { %6917 = vmatprep.mubr.msk.f32.mxu1 %vm126_vm1, %v1955_v1  ;;  %v1970_v3 = vadd.f32 %v6824_v2, %v8072_v19  ;;  %v4695_v1 = vld [vmem:[%s10119_s1 + $0xb0] sm:$0xff] }
 0x2c2   :  { %v1964_v4 = vpop.f32.mrf.mxu0  ;;  %6918 = vmatmul.mubr.msk.f32.gmra.mxu1 %vm126_vm1, %v1960_v63 }
 0x2c3   :  { %v1965_v5 = vadd.f32 %v8072_v19, %v1964_v4 }
 0x2c4   :  { %v6827_v6 = vpop.f32.mrf.mxu0 }
 0x2c5   :  { %6920 = vmatprep.mubr.msk.f32.mxu1 %vm126_vm1, %v1965_v5  ;;  %v1980_v8 = vadd.f32 %v6827_v6, %v8072_v19 }
 0x2c6   :  { %v1974_v9 = vpop.f32.mrf.mxu0  ;;  %6921 = vmatmul.mubr.msk.f32.gmra.mxu1 %vm126_vm1, %v1970_v3  ;;  %v4684_v3 = vld [vmem:[%s10119_s1 + $0x58] sm:$0xff] }
 0x2c7   :  { %v1975_v10 = vadd.f32 %v8072_v19, %v1974_v9  ;;  %4773 = vperm.xlu0 %7148, %v4684_v3  }
 0x2c8   :  { %v6830_v11 = vpop.f32.mrf.mxu0 }
 0x2c9   :  { %6923 = vmatprep.mubr.msk.f32.mxu1 %vm126_vm1, %v1975_v10  ;;  %v1990_v12 = vadd.f32 %v6830_v11, %v8072_v19  ;;  %v4697_v10 = vld [vmem:[%s10119_s1 + $0xc0] sm:$0xff] }
 0x2ca   :  { %v1984_v13 = vpop.f32.mrf.mxu0  ;;  %6924 = vmatmul.mubr.msk.f32.gmra.mxu1 %vm126_vm1, %v1980_v8 }
 0x2cb   :  { %v1985_v14 = vadd.f32 %v8072_v19, %v1984_v13 }
 0x2cc   :  { %v6833_v15 = vpop.f32.mrf.mxu0 }
 0x2cd   :  { %6926 = vmatprep.mubr.msk.f32.mxu1 %vm126_vm1, %v1985_v14  ;;  %v2000_v16 = vadd.f32 %v6833_v15, %v8072_v19 }
 0x2ce   :  { %v1994_v17 = vpop.f32.mrf.mxu0  ;;  %6927 = vmatmul.mubr.msk.f32.gmra.mxu1 %vm126_vm1, %v1990_v12 }
 0x2cf   :  { %v1995_v7 = vadd.f32 %v8072_v19, %v1994_v17  ;;  %v4699_v17 = vld [vmem:[%s10119_s1 + $0xd0] sm:$0xff] }
 0x2d0   :  { %v6836_v18 = vpop.f32.mrf.mxu0 }
 0x2d1   :  { %6929 = vmatprep.mubr.msk.f32.mxu1 %vm126_vm1, %v1995_v7  ;;  %v2010_v20 = vadd.f32 %v6836_v18, %v8072_v19 }
 0x2d2   :  { %v2004_v21 = vpop.f32.mrf.mxu0  ;;  %6930 = vmatmul.mubr.msk.f32.gmra.mxu1 %vm126_vm1, %v2000_v16 }
 0x2d3   :  { %v2005_v22 = vadd.f32 %v8072_v19, %v2004_v21  ;;  %v4675_v19 = vld [vmem:[%s10119_s1 + $0x10] sm:$0xff] }
 0x2d4   :  { %4746 = vperm.xlu1 %7149, %v4675_v19  }
 0x2d5   :  { %6932 = vmatprep.mubr.msk.f32.mxu1 %vm126_vm1, %v2005_v22 }
 0x2d6   :  { %6933 = vmatmul.mubr.msk.f32.gmra.mxu1 %vm126_vm1, %v2010_v20 }
 0x2d8   :  { %4749 = vperm.xlu1 %7149, %v4676_v26  }
 0x2dc   :  { %4752 = vperm.xlu1 %7149, %v4677_v27  }
 0x2e0   :  { %4755 = vperm.xlu1 %7149, %v4678_v28  }
 0x2e4   :  { %4758 = vperm.xlu1 %7149, %v4679_v29  }
 0x2e8   :  { %4761 = vperm.xlu1 %7149, %v4680_v30   ;;  %v4703_v30 = vld [vmem:[%s10119_s1 + $0xf0] sm:$0xff] }
 0x2ec   :  { %4764 = vperm.xlu1 %7149, %v4681_v32  }
 0x2f0   :  { %4770 = vperm.xlu1 %7149, %v4683_v33  }
 0x2f4   :  { %4776 = vperm.xlu1 %7149, %v4685_v34  }
 0x2f8   :  { %4782 = vperm.xlu1 %7149, %v4687_v37  }
 0x2fc   :  { %4788 = vperm.xlu1 %7149, %v4689_v42  }
 0x300   :  { %4794 = vperm.xlu1 %7149, %v4691_v48  }
 0x304   :  { %4800 = vperm.xlu1 %7149, %v4693_v57  }
 0x308   :  { %4806 = vperm.xlu1 %7149, %v4695_v1  }
 0x30c   :  { %4812 = vperm.xlu1 %7149, %v4697_v10   ;;  %v4713_v10 = vld [vmem:[%s10119_s1 + $0x140] sm:$0xff] }
 0x310   :  { %4818 = vperm.xlu1 %7149, %v4699_v17   ;;  %v4715_v17 = vld [vmem:[%s10119_s1 + $0x150] sm:$0xff] }
 0x314   :  { %4824 = vperm.xlu1 %7149, %v4701_v24   ;;  %v4717_v24 = vld [vmem:[%s10119_s1 + $0x160] sm:$0xff] }
 0x318   :  { %4830 = vperm.xlu1 %7149, %v4703_v30   ;;  %v4719_v30 = vld [vmem:[%s10119_s1 + $0x170] sm:$0xff] }
 0x31a   :  { %v6841_v36 = vpop.f32.mrf.mxu1 }
 0x31b   :  { %v2288_v38 = vadd.f32 %v6841_v36, %v8247_v35 }
 0x31c   :  { %v2282_v39 = vpop.f32.mrf.mxu1 }
 0x31d   :  { %v2283_v40 = vadd.f32 %v8247_v35, %v2282_v39  ;;  %v2602_v45 = vmax.f32 %v2288_v38, 0.0  ;;  %v4705_v38 = vld [vmem:[%s10119_s1 + $0x100] sm:$0xff] }
 0x31e   :  { %v6844_v41 = vpop.f32.mrf.mxu1  ;;  %4836 = vperm.xlu1 %7149, %v4705_v38  }
 0x31f   :  { %v2601_v43 = vmax.f32 %v2283_v40, 0.0  ;;  %v2298_v46 = vadd.f32 %v6844_v41, %v8247_v35 }
 0x320   :  { %v2292_v47 = vpop.f32.mrf.mxu1 }
 0x321   :  { %v2293_v49 = vadd.f32 %v8247_v35, %v2292_v47  ;;  %6943 = vmatprep.mubr.msk.f32.mxu0 %vm783_vm2, %v2601_v43  ;;  %v2604_v54 = vmax.f32 %v2298_v46, 0.0 }
 0x322   :  { %v6847_v50 = vpop.f32.mrf.mxu1  ;;  %6944 = vmatmul.mubr.msk.f32.vlgmr.msra.gmra.mxu0 %vm783_vm2, %v2602_v45  ;;  %v4707_v45 = vld [vmem:[%s10119_s1 + $0x110] sm:$0xff] }
 0x323   :  { %v2603_v52 = vmax.f32 %v2293_v49, 0.0  ;;  %v2308_v55 = vadd.f32 %v6847_v50, %v8247_v35  ;;  %4842 = vperm.xlu1 %7149, %v4707_v45  }
 0x324   :  { %v2302_v56 = vpop.f32.mrf.mxu1 }
 0x325   :  { %v2303_v58 = vadd.f32 %v8247_v35, %v2302_v56  ;;  %6946 = vmatprep.mubr.msk.f32.mxu0 %vm783_vm2, %v2603_v52  ;;  %v2606_v63 = vmax.f32 %v2308_v55, 0.0  ;;  %v4709_v52 = vld [vmem:[%s10119_s1 + $0x120] sm:$0xff] }
 0x326   :  { %v6850_v60 = vpop.f32.mrf.mxu1  ;;  %6947 = vmatmul.mubr.msk.f32.gmra.mxu0 %vm783_vm2, %v2604_v54 }
 0x327   :  { %v2605_v61 = vmax.f32 %v2303_v58, 0.0  ;;  %v2318_v62 = vadd.f32 %v6850_v60, %v8247_v35  ;;  %4848 = vperm.xlu1 %7149, %v4709_v52  }
 0x328   :  { %v2312_v0 = vpop.f32.mrf.mxu1 }
 0x329   :  { %v2313_v2 = vadd.f32 %v8247_v35, %v2312_v0  ;;  %6949 = vmatprep.mubr.msk.f32.mxu0 %vm783_vm2, %v2605_v61  ;;  %v2608_v4 = vmax.f32 %v2318_v62, 0.0 }
 0x32a   :  { %v6853_v5 = vpop.f32.mrf.mxu1  ;;  %6950 = vmatmul.mubr.msk.f32.gmra.mxu0 %vm783_vm2, %v2606_v63 }
 0x32b   :  { %v2607_v6 = vmax.f32 %v2313_v2, 0.0  ;;  %v2328_v8 = vadd.f32 %v6853_v5, %v8247_v35  ;;  %4851 = vperm.xlu1 %7149, %v4710_v59   ;;  %v4712_v2 = vld [vmem:[%s10119_s1 + $0x138] sm:$0xff] }
 0x32c   :  { %v2322_v9 = vpop.f32.mrf.mxu1 }
 0x32d   :  { %v2323_v11 = vadd.f32 %v8247_v35, %v2322_v9  ;;  %6952 = vmatprep.mubr.msk.f32.mxu0 %vm783_vm2, %v2607_v6  ;;  %v2610_v12 = vmax.f32 %v2328_v8, 0.0 }
 0x32e   :  { %v6856_v13 = vpop.f32.mrf.mxu1  ;;  %6953 = vmatmul.mubr.msk.f32.gmra.mxu0 %vm783_vm2, %v2608_v4 }
 0x32f   :  { %v2609_v14 = vmax.f32 %v2323_v11, 0.0  ;;  %v2338_v15 = vadd.f32 %v6856_v13, %v8247_v35  ;;  %4857 = vperm.xlu1 %7149, %v4712_v2  }
 0x330   :  { %v2332_v16 = vpop.f32.mrf.mxu1 }
 0x331   :  { %v2333_v7 = vadd.f32 %v8247_v35, %v2332_v16  ;;  %6955 = vmatprep.mubr.msk.f32.mxu0 %vm783_vm2, %v2609_v14  ;;  %v2612_v18 = vmax.f32 %v2338_v15, 0.0 }
 0x332   :  { %v6859_v20 = vpop.f32.mrf.mxu1  ;;  %6956 = vmatmul.mubr.msk.f32.gmra.mxu0 %vm783_vm2, %v2610_v12 }
 0x333   :  { %v2611_v21 = vmax.f32 %v2333_v7, 0.0  ;;  %v2348_v22 = vadd.f32 %v6859_v20, %v8247_v35  ;;  %4860 = vperm.xlu1 %7149, %v4713_v10   ;;  %v4729_v10 = vld [vmem:[%s10119_s1 + $0x1c0] sm:$0xff] }
 0x334   :  { %v2342_v23 = vpop.f32.mrf.mxu1 }
 0x335   :  { %v2343_v25 = vadd.f32 %v8247_v35, %v2342_v23  ;;  %6958 = vmatprep.mubr.msk.f32.mxu0 %vm783_vm2, %v2611_v21  ;;  %v2614_v19 = vmax.f32 %v2348_v22, 0.0 }
 0x336   :  { %v6862_v26 = vpop.f32.mrf.mxu1  ;;  %6959 = vmatmul.mubr.msk.f32.gmra.mxu0 %vm783_vm2, %v2612_v18 }
 0x337   :  { %v2613_v27 = vmax.f32 %v2343_v25, 0.0  ;;  %v2358_v28 = vadd.f32 %v6862_v26, %v8247_v35  ;;  %4866 = vperm.xlu1 %7149, %v4715_v17  }
 0x338   :  { %v2352_v29 = vpop.f32.mrf.mxu1 }
 0x339   :  { %v2353_v31 = vadd.f32 %v8247_v35, %v2352_v29  ;;  %6961 = vmatprep.mubr.msk.f32.mxu0 %vm783_vm2, %v2613_v27  ;;  %v2616_v32 = vmax.f32 %v2358_v28, 0.0 }
 0x33a   :  { %v6865_v33 = vpop.f32.mrf.mxu1  ;;  %6962 = vmatmul.mubr.msk.f32.gmra.mxu0 %vm783_vm2, %v2614_v19 }
 0x33b   :  { %v2615_v34 = vmax.f32 %v2353_v31, 0.0  ;;  %v2368_v36 = vadd.f32 %v6865_v33, %v8247_v35  ;;  %4872 = vperm.xlu1 %7149, %v4717_v24  }
 0x33c   :  { %v2362_v37 = vpop.f32.mrf.mxu1 }
 0x33d   :  { %v2363_v39 = vadd.f32 %v8247_v35, %v2362_v37  ;;  %6964 = vmatprep.mubr.msk.f32.mxu0 %vm783_vm2, %v2615_v34  ;;  %v2618_v40 = vmax.f32 %v2368_v36, 0.0 }
 0x33e   :  { %v6868_v41 = vpop.f32.mrf.mxu1  ;;  %6965 = vmatmul.mubr.msk.f32.gmra.mxu0 %vm783_vm2, %v2616_v32 }
 0x33f   :  { %v2617_v42 = vmax.f32 %v2363_v39, 0.0  ;;  %v2378_v43 = vadd.f32 %v6868_v41, %v8247_v35  ;;  %4878 = vperm.xlu1 %7149, %v4719_v30   ;;  %v4721_v41 = vld [vmem:[%s10119_s1 + $0x180] sm:$0xff]  ;;  %v4698_v30 = vld [vmem:[%s10119_s1 + $0xc8] sm:$0xff] }
 0x340   :  { %v2372_v44 = vpop.f32.mrf.mxu1 }
 0x341   :  { %v2373_v46 = vadd.f32 %v8247_v35, %v2372_v44  ;;  %6967 = vmatprep.mubr.msk.f32.mxu0 %vm783_vm2, %v2617_v42  ;;  %v2620_v47 = vmax.f32 %v2378_v43, 0.0 }
 0x342   :  { %v6871_v48 = vpop.f32.mrf.mxu1  ;;  %6968 = vmatmul.mubr.msk.f32.gmra.mxu0 %vm783_vm2, %v2618_v40 }
 0x343   :  { %v2619_v49 = vmax.f32 %v2373_v46, 0.0  ;;  %v2388_v50 = vadd.f32 %v6871_v48, %v8247_v35  ;;  %4884 = vperm.xlu1 %7149, %v4721_v41   ;;  %v4686_v46 = vld [vmem:[%s10119_s1 + $0x68] sm:$0xff] }
 0x344   :  { %v2382_v51 = vpop.f32.mrf.mxu1  ;;  %4779 = vperm.xlu0 %7148, %v4686_v46   ;;  %v4702_v46 = vld [vmem:[%s10119_s1 + $0xe8] sm:$0xff] }
 0x345   :  { %v2383_v53 = vadd.f32 %v8247_v35, %v2382_v51  ;;  %6970 = vmatprep.mubr.msk.f32.mxu0 %vm783_vm2, %v2619_v49  ;;  %v2622_v54 = vmax.f32 %v2388_v50, 0.0  ;;  %v4723_v49 = vld [vmem:[%s10119_s1 + $0x190] sm:$0xff] }
 0x346   :  { %v6874_v55 = vpop.f32.mrf.mxu1  ;;  %6971 = vmatmul.mubr.msk.f32.gmra.mxu0 %vm783_vm2, %v2620_v47 }
 0x347   :  { %v2621_v56 = vmax.f32 %v2383_v53, 0.0  ;;  %v2398_v57 = vadd.f32 %v6874_v55, %v8247_v35  ;;  %4890 = vperm.xlu1 %7149, %v4723_v49  }
 0x348   :  { %v2392_v58 = vpop.f32.mrf.mxu1 }
 0x349   :  { %v2393_v60 = vadd.f32 %v8247_v35, %v2392_v58  ;;  %6973 = vmatprep.mubr.msk.f32.mxu0 %vm783_vm2, %v2621_v56  ;;  %v2624_v61 = vmax.f32 %v2398_v57, 0.0  ;;  %v4725_v57 = vld [vmem:[%s10119_s1 + $0x1a0] sm:$0xff] }
 0x34a   :  { %v6877_v62 = vpop.f32.mrf.mxu1  ;;  %6974 = vmatmul.mubr.msk.f32.gmra.mxu0 %vm783_vm2, %v2622_v54  ;;  %v4688_v54 = vld [vmem:[%s10119_s1 + $0x78] sm:$0xff] }
 0x34b   :  { %v2623_v63 = vmax.f32 %v2393_v60, 0.0  ;;  %v2408_v0 = vadd.f32 %v6877_v62, %v8247_v35  ;;  %4785 = vperm.xlu0 %7148, %v4688_v54   ;;  %4896 = vperm.xlu1 %7149, %v4725_v57   ;;  %v4690_v62 = vld [vmem:[%s10119_s1 + $0x88] sm:$0xff] }
 0x34c   :  { %v2402_v1 = vpop.f32.mrf.mxu1 }
 0x34d   :  { %v2403_v3 = vadd.f32 %v8247_v35, %v2402_v1  ;;  %6976 = vmatprep.mubr.msk.f32.mxu0 %vm783_vm2, %v2623_v63  ;;  %v2626_v4 = vmax.f32 %v2408_v0, 0.0  ;;  %v4727_v1 = vld [vmem:[%s10119_s1 + $0x1b0] sm:$0xff] }
 0x34e   :  { %v6880_v5 = vpop.f32.mrf.mxu1  ;;  %6977 = vmatmul.mubr.msk.f32.gmra.mxu0 %vm783_vm2, %v2624_v61 }
 0x34f   :  { %v2625_v6 = vmax.f32 %v2403_v3, 0.0  ;;  %v2418_v8 = vadd.f32 %v6880_v5, %v8247_v35  ;;  %4791 = vperm.xlu0 %7148, %v4690_v62   ;;  %4902 = vperm.xlu1 %7149, %v4727_v1  }
 0x350   :  { %v2412_v9 = vpop.f32.mrf.mxu1 }
 0x351   :  { %v2413_v11 = vadd.f32 %v8247_v35, %v2412_v9  ;;  %6979 = vmatprep.mubr.msk.f32.mxu0 %vm783_vm2, %v2625_v6  ;;  %v2628_v12 = vmax.f32 %v2418_v8, 0.0  ;;  %v4692_v6 = vld [vmem:[%s10119_s1 + $0x98] sm:$0xff] }
 0x352   :  { %v6883_v13 = vpop.f32.mrf.mxu1  ;;  %6980 = vmatmul.mubr.msk.f32.gmra.mxu0 %vm783_vm2, %v2626_v4 }
 0x353   :  { %v2627_v14 = vmax.f32 %v2413_v11, 0.0  ;;  %v2428_v15 = vadd.f32 %v6883_v13, %v8247_v35  ;;  %4797 = vperm.xlu0 %7148, %v4692_v6   ;;  %4908 = vperm.xlu1 %7149, %v4729_v10  }
 0x354   :  { %v2422_v16 = vpop.f32.mrf.mxu1 }
 0x355   :  { %v2423_v7 = vadd.f32 %v8247_v35, %v2422_v16  ;;  %6982 = vmatprep.mubr.msk.f32.mxu0 %vm783_vm2, %v2627_v14  ;;  %v2630_v18 = vmax.f32 %v2428_v15, 0.0  ;;  %v4694_v15 = vld [vmem:[%s10119_s1 + $0xa8] sm:$0xff] }
 0x356   :  { %v6886_v20 = vpop.f32.mrf.mxu1  ;;  %6983 = vmatmul.mubr.msk.f32.gmra.mxu0 %vm783_vm2, %v2628_v12 }
 0x357   :  { %v2629_v21 = vmax.f32 %v2423_v7, 0.0  ;;  %v2438_v22 = vadd.f32 %v6886_v20, %v8247_v35  ;;  %4803 = vperm.xlu0 %7148, %v4694_v15   ;;  %v4731_v7 = vld [vmem:[%s10119_s1 + $0x1d0] sm:$0xff] }
 0x358   :  { %v2432_v23 = vpop.f32.mrf.mxu1  ;;  %4914 = vperm.xlu1 %7149, %v4731_v7   ;;  %v4714_v7 = vld [vmem:[%s10119_s1 + $0x148] sm:$0xff] }
 0x359   :  { %v2433_v25 = vadd.f32 %v8247_v35, %v2432_v23  ;;  %6985 = vmatprep.mubr.msk.f32.mxu0 %vm783_vm2, %v2629_v21  ;;  %v2632_v19 = vmax.f32 %v2438_v22, 0.0  ;;  %v4696_v23 = vld [vmem:[%s10119_s1 + $0xb8] sm:$0xff] }
 0x35a   :  { %v6889_v26 = vpop.f32.mrf.mxu1  ;;  %6986 = vmatmul.mubr.msk.f32.gmra.mxu0 %vm783_vm2, %v2630_v18 }
 0x35b   :  { %v2631_v27 = vmax.f32 %v2433_v25, 0.0  ;;  %v2448_v28 = vadd.f32 %v6889_v26, %v8247_v35  ;;  %4809 = vperm.xlu0 %7148, %v4696_v23   ;;  %v4722_v23 = vld [vmem:[%s10119_s1 + $0x188] sm:$0xff] }
 0x35c   :  { %v2442_v29 = vpop.f32.mrf.mxu1 }
 0x35d   :  { %v2443_v31 = vadd.f32 %v8247_v35, %v2442_v29  ;;  %6988 = vmatprep.mubr.msk.f32.mxu0 %vm783_vm2, %v2631_v27  ;;  %v2634_v32 = vmax.f32 %v2448_v28, 0.0 }
 0x35e   :  { %v6892_v33 = vpop.f32.mrf.mxu1  ;;  %6989 = vmatmul.mubr.msk.f32.gmra.mxu0 %vm783_vm2, %v2632_v19  ;;  %v4733_v19 = vld [vmem:[%s10119_s1 + $0x1e0] sm:$0xff] }
 0x35f   :  { %v2633_v34 = vmax.f32 %v2443_v31, 0.0  ;;  %v2458_v36 = vadd.f32 %v6892_v33, %v8247_v35  ;;  %4920 = vperm.xlu1 %7149, %v4733_v19   ;;  %4815 = vperm.xlu0 %7148, %v4698_v30   ;;  %v4735_v33 = vld [vmem:[%s10119_s1 + $0x1f0] sm:$0xff]  ;;  %v4728_v19 = vld [vmem:[%s10119_s1 + $0x1b8] sm:$0xff]  ;;  %v8548_v30 = vld [vmem:[%s10129_s11] ss:$0 sm:$0xff] }
 0x360   :  { %v2452_v37 = vpop.f32.mrf.mxu1 }
 0x361   :  { %v2453_v38 = vadd.f32 %v8247_v35, %v2452_v37  ;;  %6991 = vmatprep.mubr.msk.f32.mxu0 %vm783_vm2, %v2633_v34  ;;  %v2636_v39 = vmax.f32 %v2458_v36, 0.0 }
 0x362   :  { %v6895_v40 = vpop.f32.mrf.mxu1  ;;  %6992 = vmatmul.mubr.msk.f32.gmra.mxu0 %vm783_vm2, %v2634_v32 }
 0x363   :  { %v2635_v42 = vmax.f32 %v2453_v38, 0.0  ;;  %v2468_v43 = vadd.f32 %v6895_v40, %v8247_v35  ;;  %4926 = vperm.xlu1 %7149, %v4735_v33  }
 0x364   :  { %v2462_v44 = vpop.f32.mrf.mxu1 }
 0x365   :  { %v2463_v45 = vadd.f32 %v8247_v35, %v2462_v44  ;;  %6994 = vmatprep.mubr.msk.f32.mxu0 %vm783_vm2, %v2635_v42  ;;  %v2638_v47 = vmax.f32 %v2468_v43, 0.0 }
 0x366   :  { %v6898_v48 = vpop.f32.mrf.mxu1  ;;  %6995 = vmatmul.mubr.msk.f32.gmra.mxu0 %vm783_vm2, %v2636_v39  ;;  %v4700_v39 = vld [vmem:[%s10119_s1 + $0xd8] sm:$0xff] }
 0x367   :  { %v2637_v50 = vmax.f32 %v2463_v45, 0.0  ;;  %v2478_v51 = vadd.f32 %v6898_v48, %v8247_v35  ;;  %4821 = vperm.xlu0 %7148, %v4700_v39  }
 0x368   :  { %v2472_v52 = vpop.f32.mrf.mxu1 }
 0x369   :  { %v2473_v53 = vadd.f32 %v8247_v35, %v2472_v52  ;;  %6997 = vmatprep.mubr.msk.f32.mxu0 %vm783_vm2, %v2637_v50  ;;  %v2640_v55 = vmax.f32 %v2478_v51, 0.0 }
 0x36a   :  { %v6901_v56 = vpop.f32.mrf.mxu1  ;;  %6998 = vmatmul.mubr.msk.f32.gmra.mxu0 %vm783_vm2, %v2638_v47 }
 0x36b   :  { %v2639_v58 = vmax.f32 %v2473_v53, 0.0  ;;  %v2488_v59 = vadd.f32 %v6901_v56, %v8247_v35  ;;  %4827 = vperm.xlu0 %7148, %v4702_v46   ;;  %v4704_v53 = vld [vmem:[%s10119_s1 + $0xf8] sm:$0xff] }
 0x36c   :  { %v2482_v60 = vpop.f32.mrf.mxu1 }
 0x36d   :  { %v2483_v61 = vadd.f32 %v8247_v35, %v2482_v60  ;;  %7000 = vmatprep.mubr.msk.f32.mxu0 %vm783_vm2, %v2639_v58  ;;  %v2642_v63 = vmax.f32 %v2488_v59, 0.0  ;;  %v4706_v60 = vld [vmem:[%s10119_s1 + $0x108] sm:$0xff] }
 0x36e   :  { %v6904_v0 = vpop.f32.mrf.mxu1  ;;  %7001 = vmatmul.mubr.msk.f32.gmra.mxu0 %vm783_vm2, %v2640_v55 }
 0x36f   :  { %v2641_v2 = vmax.f32 %v2483_v61, 0.0  ;;  %v2498_v3 = vadd.f32 %v6904_v0, %v8247_v35  ;;  %4833 = vperm.xlu0 %7148, %v4704_v53  }
 0x370   :  { %v2492_v4 = vpop.f32.mrf.mxu1 }
 0x371   :  { %v2493_v5 = vadd.f32 %v8247_v35, %v2492_v4  ;;  %7003 = vmatprep.mubr.msk.f32.mxu0 %vm783_vm2, %v2641_v2  ;;  %v2644_v8 = vmax.f32 %v2498_v3, 0.0  ;;  %v4708_v3 = vld [vmem:[%s10119_s1 + $0x118] sm:$0xff] }
 0x372   :  { %v6907_v9 = vpop.f32.mrf.mxu1  ;;  %7004 = vmatmul.mubr.msk.f32.gmra.mxu0 %vm783_vm2, %v2642_v63 }
 0x373   :  { %v2643_v11 = vmax.f32 %v2493_v5, 0.0  ;;  %v2508_v12 = vadd.f32 %v6907_v9, %v8247_v35  ;;  %4839 = vperm.xlu0 %7148, %v4706_v60  }
 0x374   :  { %v2502_v13 = vpop.f32.mrf.mxu1 }
 0x375   :  { %v2503_v14 = vadd.f32 %v8247_v35, %v2502_v13  ;;  %7006 = vmatprep.mubr.msk.f32.mxu0 %vm783_vm2, %v2643_v11  ;;  %v2646_v16 = vmax.f32 %v2508_v12, 0.0  ;;  %v4711_v11 = vld [vmem:[%s10119_s1 + $0x130] sm:$0xff] }
 0x376   :  { %v6910_v17 = vpop.f32.mrf.mxu1  ;;  %7007 = vmatmul.mubr.msk.f32.gmra.mxu0 %vm783_vm2, %v2644_v8 }
 0x377   :  { %v2645_v18 = vmax.f32 %v2503_v14, 0.0  ;;  %v2518_v20 = vadd.f32 %v6910_v17, %v8247_v35  ;;  %4845 = vperm.xlu0 %7148, %v4708_v3  }
 0x378   :  { %v2512_v21 = vpop.f32.mrf.mxu1 }
 0x379   :  { %v2513_v22 = vadd.f32 %v8247_v35, %v2512_v21  ;;  %7009 = vmatprep.mubr.msk.f32.mxu0 %vm783_vm2, %v2645_v18  ;;  %v2648_v24 = vmax.f32 %v2518_v20, 0.0  ;;  %v4716_v21 = vld [vmem:[%s10119_s1 + $0x158] sm:$0xff] }
 0x37a   :  { %v6913_v25 = vpop.f32.mrf.mxu1  ;;  %7010 = vmatmul.mubr.msk.f32.gmra.mxu0 %vm783_vm2, %v2646_v16 }
 0x37b   :  { %v2647_v26 = vmax.f32 %v2513_v22, 0.0  ;;  %v2528_v27 = vadd.f32 %v6913_v25, %v8247_v35  ;;  %4854 = vperm.xlu0 %7148, %v4711_v11   ;;  %v4720_v22 = vld [vmem:[%s10119_s1 + $0x178] sm:$0xff]  ;;  %v4726_v25 = vld [vmem:[%s10119_s1 + $0x1a8] sm:$0xff] }
 0x37c   :  { %v2522_v28 = vpop.f32.mrf.mxu1 }
 0x37d   :  { %v2523_v29 = vadd.f32 %v8247_v35, %v2522_v28  ;;  %7012 = vmatprep.mubr.msk.f32.mxu0 %vm783_vm2, %v2647_v26  ;;  %v2650_v31 = vmax.f32 %v2528_v27, 0.0  ;;  %v4730_v26 = vld [vmem:[%s10119_s1 + $0x1c8] sm:$0xff]  ;;  %v4732_v27 = vld [vmem:[%s10119_s1 + $0x1d8] sm:$0xff] }
 0x37e   :  { %v6916_v32 = vpop.f32.mrf.mxu1  ;;  %7013 = vmatmul.mubr.msk.f32.gmra.mxu0 %vm783_vm2, %v2648_v24  ;;  %v4724_v24 = vld [vmem:[%s10119_s1 + $0x198] sm:$0xff]  ;;  %v4734_v28 = vld [vmem:[%s10119_s1 + $0x1e8] sm:$0xff] }
 0x37f   :  { %v2649_v34 = vmax.f32 %v2523_v29, 0.0  ;;  %v2538_v36 = vadd.f32 %v6916_v32, %v8247_v35  ;;  %4863 = vperm.xlu0 %7148, %v4714_v7   ;;  %v4736_v29 = vld [vmem:[%s10119_s1 + $0x1f8] sm:$0xff] }
 0x380   :  { %v2532_v37 = vpop.f32.mrf.mxu1 }
 0x381   :  { %v2533_v38 = vadd.f32 %v8247_v35, %v2532_v37  ;;  %7015 = vmatprep.mubr.msk.f32.mxu0 %vm783_vm2, %v2649_v34  ;;  %v2652_v40 = vmax.f32 %v2538_v36, 0.0 }
 0x382   :  { %v6919_v41 = vpop.f32.mrf.mxu1  ;;  %7016 = vmatmul.mubr.msk.f32.gmra.mxu0 %vm783_vm2, %v2650_v31 }
 0x383   :  { %v2651_v42 = vmax.f32 %v2533_v38, 0.0  ;;  %v2548_v43 = vadd.f32 %v6919_v41, %v8247_v35  ;;  %4869 = vperm.xlu0 %7148, %v4716_v21  }
 0x384   :  { %v2542_v44 = vpop.f32.mrf.mxu1 }
 0x385   :  { %v2543_v45 = vadd.f32 %v8247_v35, %v2542_v44  ;;  %7018 = vmatprep.mubr.msk.f32.mxu0 %vm783_vm2, %v2651_v42  ;;  %v2654_v47 = vmax.f32 %v2548_v43, 0.0 }
 0x386   :  { %v6922_v48 = vpop.f32.mrf.mxu1  ;;  %7019 = vmatmul.mubr.msk.f32.gmra.mxu0 %vm783_vm2, %v2652_v40 }
 0x387   :  { %v2653_v49 = vmax.f32 %v2543_v45, 0.0  ;;  %v2558_v50 = vadd.f32 %v6922_v48, %v8247_v35 }
 0x388   :  { %v2552_v51 = vpop.f32.mrf.mxu1 }
 0x389   :  { %v2553_v52 = vadd.f32 %v8247_v35, %v2552_v51  ;;  %7021 = vmatprep.mubr.msk.f32.mxu0 %vm783_vm2, %v2653_v49  ;;  %v2656_v54 = vmax.f32 %v2558_v50, 0.0 }
 0x38a   :  { %v6925_v55 = vpop.f32.mrf.mxu1  ;;  %7022 = vmatmul.mubr.msk.f32.gmra.mxu0 %vm783_vm2, %v2654_v47 }
 0x38b   :  { %v2655_v56 = vmax.f32 %v2553_v52, 0.0  ;;  %v2568_v57 = vadd.f32 %v6925_v55, %v8247_v35 }
 0x38c   :  { %v2562_v58 = vpop.f32.mrf.mxu1 }
 0x38d   :  { %v2563_v59 = vadd.f32 %v8247_v35, %v2562_v58  ;;  %7024 = vmatprep.mubr.msk.f32.mxu0 %vm783_vm2, %v2655_v56  ;;  %v2658_v61 = vmax.f32 %v2568_v57, 0.0 }
 0x38e   :  { %v6928_v62 = vpop.f32.mrf.mxu1  ;;  %7025 = vmatmul.mubr.msk.f32.gmra.mxu0 %vm783_vm2, %v2656_v54 }
 0x38f   :  { %v2657_v63 = vmax.f32 %v2563_v59, 0.0  ;;  %v2578_v0 = vadd.f32 %v6928_v62, %v8247_v35 }
 0x390   :  { %v2572_v1 = vpop.f32.mrf.mxu1 }
 0x391   :  { %v2573_v2 = vadd.f32 %v8247_v35, %v2572_v1  ;;  %7027 = vmatprep.mubr.msk.f32.mxu0 %vm783_vm2, %v2657_v63  ;;  %v2660_v4 = vmax.f32 %v2578_v0, 0.0 }
 0x392   :  { %v6931_v5 = vpop.f32.mrf.mxu1  ;;  %7028 = vmatmul.mubr.msk.f32.gmra.mxu0 %vm783_vm2, %v2658_v61 }
 0x393   :  { %v2659_v6 = vmax.f32 %v2573_v2, 0.0  ;;  %v2588_v8 = vadd.f32 %v6931_v5, %v8247_v35 }
 0x394   :  { %v2582_v9 = vpop.f32.mrf.mxu1 }
 0x395   :  { %v2583_v10 = vadd.f32 %v8247_v35, %v2582_v9  ;;  %7030 = vmatprep.mubr.msk.f32.mxu0 %vm783_vm2, %v2659_v6  ;;  %v2662_v12 = vmax.f32 %v2588_v8, 0.0 }
 0x396   :  { %v6934_v13 = vpop.f32.mrf.mxu1  ;;  %7031 = vmatmul.mubr.msk.f32.gmra.mxu0 %vm783_vm2, %v2660_v4 }
 0x397   :  { %v2661_v14 = vmax.f32 %v2583_v10, 0.0  ;;  %v2598_v15 = vadd.f32 %v6934_v13, %v8247_v35 }
 0x398   :  { %v2592_v16 = vpop.f32.mrf.mxu1 }
 0x399   :  { %v2593_v17 = vadd.f32 %v8247_v35, %v2592_v16  ;;  %7033 = vmatprep.mubr.msk.f32.mxu0 %vm783_vm2, %v2661_v14  ;;  %v2664_v18 = vmax.f32 %v2598_v15, 0.0  ;;  %v4718_v35 = vld [vmem:[%s10119_s1 + $0x168] sm:$0xff] }
 0x39a   :  { %7034 = vmatmul.mubr.msk.f32.gmra.mxu0 %vm783_vm2, %v2662_v12  ;;  %4875 = vperm.xlu0 %7148, %v4718_v35  }
 0x39b   :  { %v2663_v20 = vmax.f32 %v2593_v17, 0.0 }
 0x39d   :  { %7036 = vmatprep.mubr.msk.f32.mxu0 %vm783_vm2, %v2663_v20 }
 0x39e   :  { %7037 = vmatmul.mubr.msk.f32.gmra.mxu0 %vm783_vm2, %v2664_v18  ;;  %4881 = vperm.xlu0 %7148, %v4720_v22  }
 0x3a2   :  { %4887 = vperm.xlu0 %7148, %v4722_v23  }
 0x3a6   :  { %4893 = vperm.xlu0 %7148, %v4724_v24  }
 0x3aa   :  { %4899 = vperm.xlu0 %7148, %v4726_v25  }
 0x3ae   :  { %4905 = vperm.xlu0 %7148, %v4728_v19  }
 0x3b2   :  { %4911 = vperm.xlu0 %7148, %v4730_v26  }
 0x3b6   :  { %4917 = vperm.xlu0 %7148, %v4732_v27  }
 0x3ba   :  { %4923 = vperm.xlu0 %7148, %v4734_v28  }
 0x3be   :  { %4929 = vperm.xlu0 %7148, %v4736_v29  }
 0x3e2   :  { %v6945_v31 = vpop.f32.mrf.mxu0 }
 0x3e3   :  { %v2940_v32 = vadd.f32 %v6945_v31, %v8548_v30 }
 0x3e4   :  { %v2934_v33 = vpop.f32.mrf.mxu0 }
 0x3e5   :  { %v2935_v34 = vadd.f32 %v8548_v30, %v2934_v33  ;;  %v3254_v38 = vmax.f32 %v2940_v32, 0.0 }
 0x3e6   :  { %v6948_v36 = vpop.f32.mrf.mxu0 }
 0x3e7   :  { %v3253_v37 = vmax.f32 %v2935_v34, 0.0  ;;  %v2950_v39 = vadd.f32 %v6948_v36, %v8548_v30 }
 0x3e8   :  { %v2944_v40 = vpop.f32.mrf.mxu0 }
 0x3e9   :  { %v2945_v41 = vadd.f32 %v8548_v30, %v2944_v40  ;;  %7047 = vmatprep.mubr.msk.f32.mxu1 %vm783_vm2, %v3253_v37  ;;  %v3256_v44 = vmax.f32 %v2950_v39, 0.0 }
 0x3ea   :  { %v6951_v42 = vpop.f32.mrf.mxu0  ;;  %7048 = vmatmul.mubr.msk.f32.vlgmr.msra.gmra.mxu1 %vm783_vm2, %v3254_v38 }
 0x3eb   :  { %v3255_v43 = vmax.f32 %v2945_v41, 0.0  ;;  %v2960_v45 = vadd.f32 %v6951_v42, %v8548_v30 }
 0x3ec   :  { %v2954_v46 = vpop.f32.mrf.mxu0 }
 0x3ed   :  { %v2955_v47 = vadd.f32 %v8548_v30, %v2954_v46  ;;  %7050 = vmatprep.mubr.msk.f32.mxu1 %vm783_vm2, %v3255_v43  ;;  %v3258_v51 = vmax.f32 %v2960_v45, 0.0 }
 0x3ee   :  { %v6954_v48 = vpop.f32.mrf.mxu0  ;;  %7051 = vmatmul.mubr.msk.f32.gmra.mxu1 %vm783_vm2, %v3256_v44 }
 0x3ef   :  { %v3257_v49 = vmax.f32 %v2955_v47, 0.0  ;;  %v2970_v50 = vadd.f32 %v6954_v48, %v8548_v30 }
 0x3f0   :  { %v2964_v52 = vpop.f32.mrf.mxu0 }
 0x3f1   :  { %v2965_v53 = vadd.f32 %v8548_v30, %v2964_v52  ;;  %7053 = vmatprep.mubr.msk.f32.mxu1 %vm783_vm2, %v3257_v49  ;;  %v3260_v54 = vmax.f32 %v2970_v50, 0.0 }
 0x3f2   :  { %v6957_v55 = vpop.f32.mrf.mxu0  ;;  %7054 = vmatmul.mubr.msk.f32.gmra.mxu1 %vm783_vm2, %v3258_v51 }
 0x3f3   :  { %v3259_v56 = vmax.f32 %v2965_v53, 0.0  ;;  %v2980_v57 = vadd.f32 %v6957_v55, %v8548_v30 }
 0x3f4   :  { %v2974_v58 = vpop.f32.mrf.mxu0 }
 0x3f5   :  { %v2975_v59 = vadd.f32 %v8548_v30, %v2974_v58  ;;  %7056 = vmatprep.mubr.msk.f32.mxu1 %vm783_vm2, %v3259_v56  ;;  %v3262_v60 = vmax.f32 %v2980_v57, 0.0 }
 0x3f6   :  { %v6960_v61 = vpop.f32.mrf.mxu0  ;;  %7057 = vmatmul.mubr.msk.f32.gmra.mxu1 %vm783_vm2, %v3260_v54 }
 0x3f7   :  { %v3261_v62 = vmax.f32 %v2975_v59, 0.0  ;;  %v2990_v63 = vadd.f32 %v6960_v61, %v8548_v30 }
 0x3f8   :  { %v2984_v0 = vpop.f32.mrf.mxu0 }
 0x3f9   :  { %v2985_v1 = vadd.f32 %v8548_v30, %v2984_v0  ;;  %7059 = vmatprep.mubr.msk.f32.mxu1 %vm783_vm2, %v3261_v62  ;;  %v3264_v2 = vmax.f32 %v2990_v63, 0.0 }
 0x3fa   :  { %v6963_v3 = vpop.f32.mrf.mxu0  ;;  %7060 = vmatmul.mubr.msk.f32.gmra.mxu1 %vm783_vm2, %v3262_v60 }
 0x3fb   :  { %v3263_v4 = vmax.f32 %v2985_v1, 0.0  ;;  %v3000_v5 = vadd.f32 %v6963_v3, %v8548_v30 }
 0x3fc   :  { %v2994_v6 = vpop.f32.mrf.mxu0 }
 0x3fd   :  { %v2995_v8 = vadd.f32 %v8548_v30, %v2994_v6  ;;  %7062 = vmatprep.mubr.msk.f32.mxu1 %vm783_vm2, %v3263_v4  ;;  %v3266_v9 = vmax.f32 %v3000_v5, 0.0 }
 0x3fe   :  { %v6966_v10 = vpop.f32.mrf.mxu0  ;;  %7063 = vmatmul.mubr.msk.f32.gmra.mxu1 %vm783_vm2, %v3264_v2 }
 0x3ff   :  { %v3265_v11 = vmax.f32 %v2995_v8, 0.0  ;;  %v3010_v12 = vadd.f32 %v6966_v10, %v8548_v30 }
 0x400   :  { %v3004_v13 = vpop.f32.mrf.mxu0 }
 0x401   :  { %v3005_v14 = vadd.f32 %v8548_v30, %v3004_v13  ;;  %7065 = vmatprep.mubr.msk.f32.mxu1 %vm783_vm2, %v3265_v11  ;;  %v3268_v15 = vmax.f32 %v3010_v12, 0.0 }
 0x402   :  { %v6969_v16 = vpop.f32.mrf.mxu0  ;;  %7066 = vmatmul.mubr.msk.f32.gmra.mxu1 %vm783_vm2, %v3266_v9 }
 0x403   :  { %v3267_v17 = vmax.f32 %v3005_v14, 0.0  ;;  %v3020_v7 = vadd.f32 %v6969_v16, %v8548_v30 }
 0x404   :  { %v3014_v18 = vpop.f32.mrf.mxu0 }
 0x405   :  { %v3015_v20 = vadd.f32 %v8548_v30, %v3014_v18  ;;  %7068 = vmatprep.mubr.msk.f32.mxu1 %vm783_vm2, %v3267_v17  ;;  %v3270_v21 = vmax.f32 %v3020_v7, 0.0 }
 0x406   :  { %v6972_v35 = vpop.f32.mrf.mxu0  ;;  %7069 = vmatmul.mubr.msk.f32.gmra.mxu1 %vm783_vm2, %v3268_v15 }
 0x407   :  { %v3269_v22 = vmax.f32 %v3015_v20, 0.0  ;;  %v3030_v23 = vadd.f32 %v6972_v35, %v8548_v30 }
 0x408   :  { %v3024_v24 = vpop.f32.mrf.mxu0 }
 0x409   :  { %v3025_v25 = vadd.f32 %v8548_v30, %v3024_v24  ;;  %7071 = vmatprep.mubr.msk.f32.mxu1 %vm783_vm2, %v3269_v22  ;;  %v3272_v19 = vmax.f32 %v3030_v23, 0.0 }
 0x40a   :  { %v6975_v26 = vpop.f32.mrf.mxu0  ;;  %7072 = vmatmul.mubr.msk.f32.gmra.mxu1 %vm783_vm2, %v3270_v21 }
 0x40b   :  { %v3271_v27 = vmax.f32 %v3025_v25, 0.0  ;;  %v3040_v28 = vadd.f32 %v6975_v26, %v8548_v30 }
 0x40c   :  { %v3034_v29 = vpop.f32.mrf.mxu0 }
 0x40d   :  { %v3035_v31 = vadd.f32 %v8548_v30, %v3034_v29  ;;  %7074 = vmatprep.mubr.msk.f32.mxu1 %vm783_vm2, %v3271_v27  ;;  %v3274_v32 = vmax.f32 %v3040_v28, 0.0 }
 0x40e   :  { %v6978_v33 = vpop.f32.mrf.mxu0  ;;  %7075 = vmatmul.mubr.msk.f32.gmra.mxu1 %vm783_vm2, %v3272_v19 }
 0x40f   :  { %v3273_v34 = vmax.f32 %v3035_v31, 0.0  ;;  %v3050_v36 = vadd.f32 %v6978_v33, %v8548_v30 }
 0x410   :  { %v3044_v37 = vpop.f32.mrf.mxu0 }
 0x411   :  { %v3045_v38 = vadd.f32 %v8548_v30, %v3044_v37  ;;  %7077 = vmatprep.mubr.msk.f32.mxu1 %vm783_vm2, %v3273_v34  ;;  %v3276_v39 = vmax.f32 %v3050_v36, 0.0 }
 0x412   :  { %v6981_v40 = vpop.f32.mrf.mxu0  ;;  %7078 = vmatmul.mubr.msk.f32.gmra.mxu1 %vm783_vm2, %v3274_v32 }
 0x413   :  { %v3275_v41 = vmax.f32 %v3045_v38, 0.0  ;;  %v3060_v42 = vadd.f32 %v6981_v40, %v8548_v30 }
 0x414   :  { %v3054_v43 = vpop.f32.mrf.mxu0 }
 0x415   :  { %v3055_v44 = vadd.f32 %v8548_v30, %v3054_v43  ;;  %7080 = vmatprep.mubr.msk.f32.mxu1 %vm783_vm2, %v3275_v41  ;;  %v3278_v45 = vmax.f32 %v3060_v42, 0.0 }
 0x416   :  { %v6984_v46 = vpop.f32.mrf.mxu0  ;;  %7081 = vmatmul.mubr.msk.f32.gmra.mxu1 %vm783_vm2, %v3276_v39 }
 0x417   :  { %v3277_v47 = vmax.f32 %v3055_v44, 0.0  ;;  %v3070_v48 = vadd.f32 %v6984_v46, %v8548_v30 }
 0x418   :  { %v3064_v49 = vpop.f32.mrf.mxu0 }
 0x419   :  { %v3065_v50 = vadd.f32 %v8548_v30, %v3064_v49  ;;  %7083 = vmatprep.mubr.msk.f32.mxu1 %vm783_vm2, %v3277_v47  ;;  %v3280_v51 = vmax.f32 %v3070_v48, 0.0 }
 0x41a   :  { %v6987_v52 = vpop.f32.mrf.mxu0  ;;  %7084 = vmatmul.mubr.msk.f32.gmra.mxu1 %vm783_vm2, %v3278_v45 }
 0x41b   :  { %v3279_v53 = vmax.f32 %v3065_v50, 0.0  ;;  %v3080_v54 = vadd.f32 %v6987_v52, %v8548_v30 }
 0x41c   :  { %v3074_v55 = vpop.f32.mrf.mxu0 }
 0x41d   :  { %v3075_v56 = vadd.f32 %v8548_v30, %v3074_v55  ;;  %7086 = vmatprep.mubr.msk.f32.mxu1 %vm783_vm2, %v3279_v53  ;;  %v3282_v57 = vmax.f32 %v3080_v54, 0.0 }
 0x41e   :  { %v6990_v58 = vpop.f32.mrf.mxu0  ;;  %7087 = vmatmul.mubr.msk.f32.gmra.mxu1 %vm783_vm2, %v3280_v51 }
 0x41f   :  { %v3281_v59 = vmax.f32 %v3075_v56, 0.0  ;;  %v3090_v60 = vadd.f32 %v6990_v58, %v8548_v30 }
 0x420   :  { %v3084_v61 = vpop.f32.mrf.mxu0 }
 0x421   :  { %v3085_v62 = vadd.f32 %v8548_v30, %v3084_v61  ;;  %7089 = vmatprep.mubr.msk.f32.mxu1 %vm783_vm2, %v3281_v59  ;;  %v3284_v63 = vmax.f32 %v3090_v60, 0.0 }
 0x422   :  { %v6993_v0 = vpop.f32.mrf.mxu0  ;;  %7090 = vmatmul.mubr.msk.f32.gmra.mxu1 %vm783_vm2, %v3282_v57 }
 0x423   :  { %v3283_v1 = vmax.f32 %v3085_v62, 0.0  ;;  %v3100_v2 = vadd.f32 %v6993_v0, %v8548_v30 }
 0x424   :  { %v3094_v3 = vpop.f32.mrf.mxu0 }
 0x425   :  { %v3095_v4 = vadd.f32 %v8548_v30, %v3094_v3  ;;  %7092 = vmatprep.mubr.msk.f32.mxu1 %vm783_vm2, %v3283_v1  ;;  %v3286_v5 = vmax.f32 %v3100_v2, 0.0 }
 0x426   :  { %v6996_v6 = vpop.f32.mrf.mxu0  ;;  %7093 = vmatmul.mubr.msk.f32.gmra.mxu1 %vm783_vm2, %v3284_v63 }
 0x427   :  { %v3285_v8 = vmax.f32 %v3095_v4, 0.0  ;;  %v3110_v9 = vadd.f32 %v6996_v6, %v8548_v30 }
 0x428   :  { %v3104_v10 = vpop.f32.mrf.mxu0 }
 0x429   :  { %v3105_v11 = vadd.f32 %v8548_v30, %v3104_v10  ;;  %7095 = vmatprep.mubr.msk.f32.mxu1 %vm783_vm2, %v3285_v8  ;;  %v3288_v12 = vmax.f32 %v3110_v9, 0.0 }
 0x42a   :  { %v6999_v13 = vpop.f32.mrf.mxu0  ;;  %7096 = vmatmul.mubr.msk.f32.gmra.mxu1 %vm783_vm2, %v3286_v5 }
 0x42b   :  { %v3287_v14 = vmax.f32 %v3105_v11, 0.0  ;;  %v3120_v15 = vadd.f32 %v6999_v13, %v8548_v30 }
 0x42c   :  { %v3114_v16 = vpop.f32.mrf.mxu0 }
 0x42d   :  { %v3115_v17 = vadd.f32 %v8548_v30, %v3114_v16  ;;  %7098 = vmatprep.mubr.msk.f32.mxu1 %vm783_vm2, %v3287_v14  ;;  %v3290_v7 = vmax.f32 %v3120_v15, 0.0 }
 0x42e   :  { %v7002_v18 = vpop.f32.mrf.mxu0  ;;  %7099 = vmatmul.mubr.msk.f32.gmra.mxu1 %vm783_vm2, %v3288_v12 }
 0x42f   :  { %v3289_v20 = vmax.f32 %v3115_v17, 0.0  ;;  %v3130_v21 = vadd.f32 %v7002_v18, %v8548_v30 }
 0x430   :  { %v3124_v35 = vpop.f32.mrf.mxu0 }
 0x431   :  { %v3125_v22 = vadd.f32 %v8548_v30, %v3124_v35  ;;  %7101 = vmatprep.mubr.msk.f32.mxu1 %vm783_vm2, %v3289_v20  ;;  %v3292_v23 = vmax.f32 %v3130_v21, 0.0 }
 0x432   :  { %v7005_v24 = vpop.f32.mrf.mxu0  ;;  %7102 = vmatmul.mubr.msk.f32.gmra.mxu1 %vm783_vm2, %v3290_v7 }
 0x433   :  { %v3291_v25 = vmax.f32 %v3125_v22, 0.0  ;;  %v3140_v19 = vadd.f32 %v7005_v24, %v8548_v30 }
 0x434   :  { %v3134_v26 = vpop.f32.mrf.mxu0 }
 0x435   :  { %v3135_v27 = vadd.f32 %v8548_v30, %v3134_v26  ;;  %7104 = vmatprep.mubr.msk.f32.mxu1 %vm783_vm2, %v3291_v25  ;;  %v3294_v28 = vmax.f32 %v3140_v19, 0.0 }
 0x436   :  { %v7008_v29 = vpop.f32.mrf.mxu0  ;;  %7105 = vmatmul.mubr.msk.f32.gmra.mxu1 %vm783_vm2, %v3292_v23 }
 0x437   :  { %v3293_v31 = vmax.f32 %v3135_v27, 0.0  ;;  %v3150_v32 = vadd.f32 %v7008_v29, %v8548_v30 }
 0x438   :  { %v3144_v33 = vpop.f32.mrf.mxu0 }
 0x439   :  { %v3145_v34 = vadd.f32 %v8548_v30, %v3144_v33  ;;  %7107 = vmatprep.mubr.msk.f32.mxu1 %vm783_vm2, %v3293_v31  ;;  %v3296_v36 = vmax.f32 %v3150_v32, 0.0  ;;  %v4744_v32 = vpop.permute.xlu1 %4743 }
 0x43a   :  { %v7011_v37 = vpop.f32.mrf.mxu0  ;;  %7108 = vmatmul.mubr.msk.f32.gmra.mxu1 %vm783_vm2, %v3294_v28 }
 0x43b   :  { %v3295_v38 = vmax.f32 %v3145_v34, 0.0  ;;  %v3160_v39 = vadd.f32 %v7011_v37, %v8548_v30 }
 0x43c   :  { %v3154_v40 = vpop.f32.mrf.mxu0 }
 0x43d   :  { %v3155_v41 = vadd.f32 %v8548_v30, %v3154_v40  ;;  %7110 = vmatprep.mubr.msk.f32.mxu1 %vm783_vm2, %v3295_v38  ;;  %v3298_v42 = vmax.f32 %v3160_v39, 0.0 }
 0x43e   :  { %v7014_v43 = vpop.f32.mrf.mxu0  ;;  %7111 = vmatmul.mubr.msk.f32.gmra.mxu1 %vm783_vm2, %v3296_v36  ;;  %v4747_v36 = vpop.permute.xlu1 %4746 }
 0x43f   :  { %v3297_v44 = vmax.f32 %v3155_v41, 0.0  ;;  %v3170_v45 = vadd.f32 %v7014_v43, %v8548_v30 }
 0x440   :  { %v3164_v46 = vpop.f32.mrf.mxu0 }
 0x441   :  { %v3165_v47 = vadd.f32 %v8548_v30, %v3164_v46  ;;  %7113 = vmatprep.mubr.msk.f32.mxu1 %vm783_vm2, %v3297_v44  ;;  %v3300_v48 = vmax.f32 %v3170_v45, 0.0 }
 0x442   :  { %v7017_v49 = vpop.f32.mrf.mxu0  ;;  %7114 = vmatmul.mubr.msk.f32.gmra.mxu1 %vm783_vm2, %v3298_v42  ;;  %v4750_v37 = vpop.permute.xlu1 %4749 }
 0x443   :  { %v3299_v50 = vmax.f32 %v3165_v47, 0.0  ;;  %v3180_v51 = vadd.f32 %v7017_v49, %v8548_v30  ;;  %v4741_v42 = vpop.permute.xlu0 %4740  ;;  %v4737_v49 = vlaneseq }
 0x444   :  { %v3174_v52 = vpop.f32.mrf.mxu0 }
 0x445   :  { %v3175_v53 = vadd.f32 %v8548_v30, %v3174_v52  ;;  %7116 = vmatprep.mubr.msk.f32.mxu1 %vm783_vm2, %v3299_v50  ;;  %v3302_v54 = vmax.f32 %v3180_v51, 0.0  ;;  %v8702_v51 = vand.u32 127, %v4737_v49  ;;  %v8707_v52 = vld [vmem:[%s10131_s13] ss:$0 sm:$0xff] }
 0x446   :  { %v7020_v55 = vpop.f32.mrf.mxu0  ;;  %7117 = vmatmul.mubr.msk.f32.gmra.mxu1 %vm783_vm2, %v3300_v48  ;;  %v8678_v38 = vpop.permute.xlu1 %4752 }
 0x447   :  { %v3301_v56 = vmax.f32 %v3175_v53, 0.0  ;;  %v3190_v57 = vadd.f32 %v7020_v55, %v8548_v30  ;;  %v8690_v44 = vpop.permute.xlu0 %4767  ;;  %vm4932_vm3 = vcmp.eq.s32.totalorder %v8702_v51, %v4744_v32  ;;  %vm4931_vm4 = vcmp.eq.s32.totalorder %v8702_v51, %v4741_v42 }
 0x448   :  { %v3184_v58 = vpop.f32.mrf.mxu0  ;;  %vm4934_vm5 = vcmp.eq.s32.totalorder %v8702_v51, %v4750_v37  ;;  %vm4933_vm6 = vcmp.eq.s32.totalorder %v8702_v51, %v4747_v36  ;;  %vm4935_vm9 = vcmp.eq.s32.totalorder %v8702_v51, %v8678_v38  ;;  %vm4940_vm12 = vcmp.eq.s32.totalorder %v8702_v51, %v8690_v44 }
 0x449   :  { %v3185_v59 = vadd.f32 %v8548_v30, %v3184_v58  ;;  %7119 = vmatprep.mubr.msk.f32.mxu1 %vm783_vm2, %v3301_v56  ;;  %v3304_v60 = vmax.f32 %v3190_v57, 0.0 }
 0x44a   :  { %v7023_v61 = vpop.f32.mrf.mxu0  ;;  %7120 = vmatmul.mubr.msk.f32.gmra.mxu1 %vm783_vm2, %v3302_v54  ;;  %v8680_v39 = vpop.permute.xlu1 %4755 }
 0x44b   :  { %v3303_v62 = vmax.f32 %v3185_v59, 0.0  ;;  %v3200_v63 = vadd.f32 %v7023_v61, %v8548_v30  ;;  %v8694_v46 = vpop.permute.xlu0 %4773  ;;  %vm4936_vm7 = vcmp.eq.s32.totalorder %v8702_v51, %v8680_v39 }
 0x44c   :  { %v3194_v0 = vpop.f32.mrf.mxu0  ;;  %vm4942_vm14 = vcmp.eq.s32.totalorder %v8702_v51, %v8694_v46 }
 0x44d   :  { %v3195_v1 = vadd.f32 %v8548_v30, %v3194_v0  ;;  %7122 = vmatprep.mubr.msk.f32.mxu1 %vm783_vm2, %v3303_v62  ;;  %v3306_v2 = vmax.f32 %v3200_v63, 0.0 }
 0x44e   :  { %v7026_v3 = vpop.f32.mrf.mxu0  ;;  %7123 = vmatmul.mubr.msk.f32.gmra.mxu1 %vm783_vm2, %v3304_v60  ;;  %v8682_v40 = vpop.permute.xlu1 %4758 }
 0x44f   :  { %v3305_v4 = vmax.f32 %v3195_v1, 0.0  ;;  %v3210_v5 = vadd.f32 %v7026_v3, %v8548_v30  ;;  %v8698_v48 = vpop.permute.xlu0 %4779  ;;  %vm4937_vm8 = vcmp.eq.s32.totalorder %v8702_v51, %v8682_v40 }
 0x450   :  { %v3204_v6 = vpop.f32.mrf.mxu0 }
 0x451   :  { %v3205_v8 = vadd.f32 %v8548_v30, %v3204_v6  ;;  %7125 = vmatprep.mubr.msk.f32.mxu1 %vm783_vm2, %v3305_v4  ;;  %v3308_v9 = vmax.f32 %v3210_v5, 0.0 }
 0x452   :  { %v7029_v10 = vpop.f32.mrf.mxu0  ;;  %7126 = vmatmul.mubr.msk.f32.gmra.mxu1 %vm783_vm2, %v3306_v2 }
 0x453   :  { %v3307_v11 = vmax.f32 %v3205_v8, 0.0  ;;  %v3220_v12 = vadd.f32 %v7029_v10, %v8548_v30  ;;  %v8709_v53 = vpop.permute.xlu0 %4785 }
 0x454   :  { %v3214_v13 = vpop.f32.mrf.mxu0 }
 0x455   :  { %v3215_v14 = vadd.f32 %v8548_v30, %v3214_v13  ;;  %7128 = vmatprep.mubr.msk.f32.mxu1 %vm783_vm2, %v3307_v11  ;;  %v3310_v15 = vmax.f32 %v3220_v12, 0.0 }
 0x456   :  { %v7032_v16 = vpop.f32.mrf.mxu0  ;;  %7129 = vmatmul.mubr.msk.f32.gmra.mxu1 %vm783_vm2, %v3308_v9 }
 0x457   :  { %v3309_v17 = vmax.f32 %v3215_v14, 0.0  ;;  %v3230_v7 = vadd.f32 %v7032_v16, %v8548_v30  ;;  %v8725_v63 = vpop.permute.xlu0 %4791 }
 0x458   :  { %v3224_v18 = vpop.f32.mrf.mxu0 }
 0x459   :  { %v3225_v20 = vadd.f32 %v8548_v30, %v3224_v18  ;;  %7131 = vmatprep.mubr.msk.f32.mxu1 %vm783_vm2, %v3309_v17  ;;  %v3312_v21 = vmax.f32 %v3230_v7, 0.0 }
 0x45a   :  { %v7035_v35 = vpop.f32.mrf.mxu0  ;;  %7132 = vmatmul.mubr.msk.f32.gmra.mxu1 %vm783_vm2, %v3310_v15 }
 0x45b   :  { %v3311_v22 = vmax.f32 %v3225_v20, 0.0  ;;  %v3240_v23 = vadd.f32 %v7035_v35, %v8548_v30  ;;  %v8741_v10 = vpop.permute.xlu0 %4797 }
 0x45c   :  { %v3234_v24 = vpop.f32.mrf.mxu0 }
 0x45d   :  { %v3235_v25 = vadd.f32 %v8548_v30, %v3234_v24  ;;  %7134 = vmatprep.mubr.msk.f32.mxu1 %vm783_vm2, %v3311_v22  ;;  %v3314_v19 = vmax.f32 %v3240_v23, 0.0 }
 0x45e   :  { %v7038_v26 = vpop.f32.mrf.mxu0  ;;  %7135 = vmatmul.mubr.msk.f32.gmra.mxu1 %vm783_vm2, %v3312_v21 }
 0x45f   :  { %v3313_v27 = vmax.f32 %v3235_v25, 0.0  ;;  %v3250_v28 = vadd.f32 %v7038_v26, %v8548_v30  ;;  %v8759_v22 = vpop.permute.xlu0 %4803 }
 0x460   :  { %v3244_v29 = vpop.f32.mrf.mxu0 }
 0x461   :  { %v3245_v31 = vadd.f32 %v8548_v30, %v3244_v29  ;;  %7137 = vmatprep.mubr.msk.f32.mxu1 %vm783_vm2, %v3313_v27  ;;  %v3316_v33 = vmax.f32 %v3250_v28, 0.0  ;;  %v8684_v30 = vpop.permute.xlu1 %4761 }
 0x462   :  { %7138 = vmatmul.mubr.msk.f32.gmra.mxu1 %vm783_vm2, %v3314_v19  ;;  %vm4938_vm11 = vcmp.eq.s32.totalorder %v8702_v51, %v8684_v30 }
 0x463   :  { %v3315_v34 = vmax.f32 %v3245_v31, 0.0  ;;  %v8777_v31 = vpop.permute.xlu0 %4809 }
 0x465   :  { %7140 = vmatprep.mubr.msk.f32.mxu1 %vm783_vm2, %v3315_v34  ;;  %v8686_v41 = vpop.permute.xlu1 %4764 }
 0x466   :  { %7141 = vmatmul.mubr.msk.f32.gmra.mxu1 %vm783_vm2, %v3316_v33  ;;  %vm4939_vm10 = vcmp.eq.s32.totalorder %v8702_v51, %v8686_v41  ;;  %vm4944_vm2 = vcmp.eq.s32.totalorder %v8702_v51, %v8698_v48 }
 0x469   :  { %v8688_v43 = vpop.permute.xlu1 %4770 }
 0x46a   :  { %vm4941_vm13 = vcmp.eq.s32.totalorder %v8702_v51, %v8688_v43 }
 0x46d   :  { %v8692_v45 = vpop.permute.xlu1 %4776 }
 0x46e   :  { %vm4943_vm15 = vcmp.eq.s32.totalorder %v8702_v51, %v8692_v45 }
 0x471   :  { %v8696_v47 = vpop.permute.xlu1 %4782 }
 0x472   :  { %vm4945_vm0 = vcmp.eq.s32.totalorder %v8702_v51, %v8696_v47 }
 0x475   :  { %v8700_v50 = vpop.permute.xlu1 %4788 }
 0x479   :  { %v8711_v54 = vpop.permute.xlu1 %4794 }
 0x47d   :  { %v8730_v1 = vpop.permute.xlu1 %4800 }
 0x481   :  { %v8745_v12 = vpop.permute.xlu1 %4806 }
 0x485   :  { %v8761_v23 = vpop.permute.xlu1 %4812 }
 0x489   :  { %v8783_v33 = vpop.permute.xlu1 %4818 }
 0x4aa   :  { %v7049_v55 = vpop.f32.mrf.mxu1 }
 0x4ab   :  { %v8714_v56 = vadd.f32 %v7049_v55, %v8707_v52 }
 0x4ac   :  { %v3586_v57 = vpop.f32.mrf.mxu1 }
 0x4ad   :  { %v8718_v58 = vadd.f32 %v8707_v52, %v3586_v57  ;;  %v3908_v59 = vsel %vm126_vm1, %v8714_v56, -inf  ;;  %v4996_v60 = vsel %vm4932_vm3, %v8714_v56, 0.0  ;;  %v8797_v57 = vpop.permute.xlu0 %4815  ;;  %vm4947_vm3 = vcmp.eq.s32.totalorder %v8702_v51, %v8700_v50 }
 0x4ae   :  { %3909 = vmax.xlane.f32.xlu0 %v3908_v59  ;;  %v7052_v61 = vpop.f32.mrf.mxu1  ;;  %v5062_v62 = vsel %vm126_vm1, %v4996_v60, 0.0  ;;  %v8802_v60 = vpop.permute.xlu1 %4824 }
 0x4af   :  { %v8728_v0 = vadd.f32 %v7052_v61, %v8707_v52  ;;  %5063 = vadd.xlane.f32.xlu1 %v5062_v62  ;;  %v3905_v3 = vsel %vm126_vm1, %v8718_v58, -inf  ;;  %v4995_v8 = vsel %vm4931_vm4, %v8718_v58, 0.0  ;;  %vm4946_vm4 = vcmp.eq.s32.totalorder %v8702_v51, %v8709_v53 }
 0x4b0   :  { %v3596_v2 = vpop.f32.mrf.mxu1  ;;  %v5059_v11 = vsel %vm126_vm1, %v4995_v8, 0.0 }
 0x4b1   :  { %v3914_v4 = vsel %vm126_vm1, %v8728_v0, -inf  ;;  %v8737_v5 = vadd.f32 %v8707_v52, %v3596_v2  ;;  %v4998_v15 = vsel %vm4934_vm5, %v8728_v0, 0.0  ;;  %vm4949_vm5 = vcmp.eq.s32.totalorder %v8702_v51, %v8711_v54 }
 0x4b2   :  { %v7055_v6 = vpop.f32.mrf.mxu1  ;;  %3906 = vmax.xlane.f32.xlu0 %v3905_v3  ;;  %v5068_v18 = vsel %vm126_vm1, %v4998_v15, 0.0 }
 0x4b3   :  { %3915 = vmax.xlane.f32.xlu1 %v3914_v4  ;;  %v3911_v14 = vsel %vm126_vm1, %v8737_v5, -inf  ;;  %v4997_v16 = vsel %vm4933_vm6, %v8737_v5, 0.0  ;;  %v8756_v20 = vadd.f32 %v7055_v6, %v8707_v52  ;;  %vm4948_vm6 = vcmp.eq.s32.totalorder %v8702_v51, %v8725_v63 }
 0x4b4   :  { %v3606_v9 = vpop.f32.mrf.mxu1  ;;  %v5065_v35 = vsel %vm126_vm1, %v4997_v16, 0.0 }
 0x4b5   :  { %v8752_v7 = vadd.f32 %v8707_v52, %v3606_v9  ;;  %v3920_v27 = vsel %vm126_vm1, %v8756_v20, -inf  ;;  %v5000_v28 = vsel %vm4936_vm7, %v8756_v20, 0.0  ;;  %v8816_v9 = vpop.permute.xlu0 %4821  ;;  %vm4951_vm7 = vcmp.eq.s32.totalorder %v8702_v51, %v8730_v1 }
 0x4b6   :  { %v7058_v13 = vpop.f32.mrf.mxu1  ;;  %5060 = vadd.xlane.f32.xlu0 %v5059_v11  ;;  %v5074_v36 = vsel %vm126_vm1, %v5000_v28, 0.0  ;;  %v8819_v11 = vpop.permute.xlu1 %4830 }
 0x4b7   :  { %3912 = vmax.xlane.f32.xlu1 %v3911_v14  ;;  %v3917_v19 = vsel %vm126_vm1, %v8752_v7, -inf  ;;  %v4999_v39 = vsel %vm4935_vm9, %v8752_v7, 0.0  ;;  %v8800_v59 = vadd.f32 %v7058_v13, %v8707_v52  ;;  %vm4953_vm9 = vcmp.eq.s32.totalorder %v8702_v51, %v8745_v12 }
 0x4b8   :  { %v3616_v17 = vpop.f32.mrf.mxu1  ;;  %v5071_v38 = vsel %vm126_vm1, %v4999_v39, 0.0 }
 0x4b9   :  { %v8764_v25 = vadd.f32 %v8707_v52, %v3616_v17  ;;  %v3926_v3 = vsel %vm126_vm1, %v8800_v59, -inf  ;;  %v5002_v6 = vsel %vm4938_vm11, %v8800_v59, 0.0  ;;  %vm4955_vm11 = vcmp.eq.s32.totalorder %v8702_v51, %v8761_v23 }
 0x4ba   :  { %v7061_v21 = vpop.f32.mrf.mxu1  ;;  %5069 = vadd.xlane.f32.xlu0 %v5068_v18  ;;  %v5080_v15 = vsel %vm126_vm1, %v5002_v6, 0.0 }
 0x4bb   :  { %5066 = vadd.xlane.f32.xlu1 %v5065_v35  ;;  %v3923_v32 = vsel %vm126_vm1, %v8764_v25, -inf  ;;  %v5001_v37 = vsel %vm4937_vm8, %v8764_v25, 0.0  ;;  %v8822_v30 = vadd.f32 %v7061_v21, %v8707_v52  ;;  %vm4950_vm8 = vcmp.eq.s32.totalorder %v8702_v51, %v8741_v10 }
 0x4bc   :  { %v3626_v24 = vpop.f32.mrf.mxu1  ;;  %v5077_v42 = vsel %vm126_vm1, %v5001_v37, 0.0 }
 0x4bd   :  { %v8792_v49 = vadd.f32 %v8707_v52, %v3626_v24  ;;  %10197 = vst [vmem:[#allocation5_spill] sm:$0xff] %v8822_v30  ;;  %v3932_v21 = vsel %vm126_vm1, %v8822_v30, -inf  ;;  %v8843_v24 = vpop.permute.xlu0 %4827  ;;  %v5004_v44 = vsel %vm4940_vm12, %v8822_v30, 0.0  ;;  %vm4954_vm12 = vcmp.eq.s32.totalorder %v8702_v51, %v8777_v31 }
 0x4be   :  { %v8770_v26 = vpop.f32.mrf.mxu1  ;;  %3918 = vmax.xlane.f32.xlu0 %v3917_v19  ;;  %v8846_v19 = vpop.permute.xlu1 %4836 }
 0x4bf   :  { %3921 = vmax.xlane.f32.xlu1 %v3920_v27  ;;  %v3929_v62 = vsel %vm126_vm1, %v8792_v49, -inf  ;;  %v5003_v4 = vsel %vm4939_vm10, %v8792_v49, 0.0  ;;  %vm4952_vm10 = vcmp.eq.s32.totalorder %v8702_v51, %v8759_v22 }
 0x4c0   :  { %v3636_v29 = vpop.f32.mrf.mxu1  ;;  %v5083_v41 = vsel %vm126_vm1, %v5003_v4, 0.0 }
 0x4c1   :  { %v8825_v13 = vadd.f32 %v8707_v52, %v3636_v29  ;;  %v5086_v29 = vsel %vm126_vm1, %v5004_v44, 0.0 }
 0x4c2   :  { %v8785_v34 = vpop.f32.mrf.mxu1  ;;  %3924 = vmax.xlane.f32.xlu0 %v3923_v32  ;;  %v8857_v32 = vadd.f32 %v8770_v26, %v8707_v52  ;;  %v8867_v39 = vpop.permute.xlu1 %4842 }
 0x4c3   :  { %5075 = vadd.xlane.f32.xlu1 %v5074_v36  ;;  %v3935_v17 = vsel %vm126_vm1, %v8825_v13, -inf  ;;  %v5005_v35 = vsel %vm4941_vm13, %v8825_v13, 0.0  ;;  %v8863_v36 = vpop.permute.xlu0 %4833  ;;  %v8886_v6 = vadd.f32 %v8785_v34, %v8707_v52  ;;  %vm4957_vm13 = vcmp.eq.s32.totalorder %v8702_v51, %v8783_v33 }
 0x4c4   :  { %v3646_v40 = vpop.f32.mrf.mxu1  ;;  %v5089_v43 = vsel %vm126_vm1, %v5005_v35, 0.0  ;;  %10198 = vst [vmem:[#allocation6_spill] sm:$0xff] %v8857_v32  ;;  %v3938_v26 = vsel %vm126_vm1, %v8857_v32, -inf  ;;  %v5006_v46 = vsel %vm4942_vm14, %v8857_v32, 0.0  ;;  %vm4956_vm14 = vcmp.eq.s32.totalorder %v8702_v51, %v8797_v57 }
 0x4c5   :  { %v8850_v27 = vadd.f32 %v8707_v52, %v3646_v40  ;;  %10199 = vst [vmem:[#allocation7_spill] sm:$0xff] %v8886_v6 }
 0x4c6   :  { %v8794_v55 = vpop.f32.mrf.mxu1  ;;  %5078 = vadd.xlane.f32.xlu0 %v5077_v42 }
 0x4c7   :  { %5072 = vadd.xlane.f32.xlu1 %v5071_v38  ;;  %v3941_v37 = vsel %vm126_vm1, %v8850_v27, -inf  ;;  %v5007_v42 = vsel %vm4943_vm15, %v8850_v27, 0.0  ;;  %v8882_v4 = vpop.permute.xlu0 %4839  ;;  %vm4959_vm15 = vcmp.eq.s32.totalorder %v8702_v51, %v8802_v60 }
 0x4c8   :  { %v3656_v61 = vpop.f32.mrf.mxu1  ;;  %v5095_v45 = vsel %vm126_vm1, %v5007_v42, 0.0 }
 0x4c9   :  { %v8877_v38 = vadd.f32 %v8707_v52, %v3656_v61 }
 0x4ca   :  { %v8810_v2 = vpop.f32.mrf.mxu1  ;;  %3930 = vmax.xlane.f32.xlu0 %v3929_v62 }
 0x4cb   :  { %3927 = vmax.xlane.f32.xlu1 %v3926_v3  ;;  %v5092_v3 = vsel %vm126_vm1, %v5006_v46, 0.0  ;;  %v3947_v61 = vsel %vm126_vm1, %v8877_v38, -inf  ;;  %v5009_v34 = vsel %vm4945_vm0, %v8877_v38, 0.0  ;;  %v8902_v35 = vpop.permute.xlu0 %4845  ;;  %vm4958_vm0 = vcmp.eq.s32.totalorder %v8702_v51, %v8816_v9 }
 0x4cc   :  { %v3666_v8 = vpop.f32.mrf.mxu1  ;;  %v5101_v47 = vsel %vm126_vm1, %v5009_v34, 0.0  ;;  %v8943_v34 = vadd.f32 %v8810_v2, %v8707_v52 }
 0x4ce   :  { %v8827_v14 = vpop.f32.mrf.mxu1  ;;  %5084 = vadd.xlane.f32.xlu0 %v5083_v41  ;;  %v8888_v41 = vpop.permute.xlu1 %4848  ;;  %10201 = vst [vmem:[#allocation9_spill] sm:$0xff] %v8943_v34  ;;  %v3956_v2 = vsel %vm126_vm1, %v8943_v34, -inf  ;;  %v5012_v54 = vsel %vm4948_vm6, %v8943_v34, 0.0  ;;  %vm4964_vm6 = vcmp.eq.s32.totalorder %v8702_v51, %v8882_v4 }
 0x4cf   :  { %5081 = vadd.xlane.f32.xlu1 %v5080_v15  ;;  %v5110_v63 = vsel %vm126_vm1, %v5012_v54, 0.0 }
 0x4d0   :  { %v8832_v16 = vpop.f32.mrf.mxu1 }
 0x4d1   :  { %v8936_v53 = vadd.f32 %v8707_v52, %v8832_v16 }
 0x4d2   :  { %v8838_v18 = vpop.f32.mrf.mxu1  ;;  %3936 = vmax.xlane.f32.xlu0 %v3935_v17  ;;  %v3944_v17 = vsel %vm126_vm1, %v8886_v6, -inf  ;;  %v8905_v44 = vpop.permute.xlu1 %4851 }
 0x4d3   :  { %3933 = vmax.xlane.f32.xlu1 %v3932_v21  ;;  %v5008_v21 = vsel %vm4944_vm2, %v8886_v6, 0.0  ;;  %vm4961_vm2 = vcmp.eq.s32.totalorder %v8702_v51, %v8819_v11 }
 0x4d4   :  { %v8852_v28 = vpop.f32.mrf.mxu1 }
 0x4d6   :  { %5090 = vadd.xlane.f32.xlu0 %v5089_v43  ;;  %v8869_v40 = vpop.f32.mrf.mxu1  ;;  %v8908_v43 = vadd.f32 %v8707_v52, %v3666_v8  ;;  %v8931_v50 = vpop.permute.xlu1 %4857 }
 0x4d7   :  { %5087 = vadd.xlane.f32.xlu1 %v5086_v29  ;;  %v5098_v29 = vsel %vm126_vm1, %v5008_v21, 0.0  ;;  %v9031_v6 = vadd.f32 %v8869_v40, %v8707_v52 }
 0x4d8   :  { %v8879_v62 = vpop.f32.mrf.mxu1  ;;  %v5011_v46 = vsel %vm4947_vm3, %v8908_v43, 0.0  ;;  %vm4960_vm3 = vcmp.eq.s32.totalorder %v8702_v51, %v8843_v24 }
 0x4d9   :  { %v8996_v10 = vadd.f32 %v8707_v52, %v8879_v62  ;;  %10205 = vst [vmem:[#allocation13_spill] sm:$0xff] %v9031_v6  ;;  %v3974_v40 = vsel %vm126_vm1, %v9031_v6, -inf  ;;  %v5018_v23 = vsel %vm4954_vm12, %v9031_v6, 0.0 }
 0x4da   :  { %3942 = vmax.xlane.f32.xlu0 %v3941_v37  ;;  %v8896_v15 = vpop.f32.mrf.mxu1  ;;  %v8915_v37 = vadd.f32 %v8794_v55, %v8707_v52  ;;  %v8928_v55 = vpop.permute.xlu0 %4854  ;;  %v5128_v31 = vsel %vm126_vm1, %v5018_v23, 0.0 }
 0x4db   :  { %3939 = vmax.xlane.f32.xlu1 %v3938_v26  ;;  %v3953_v26 = vsel %vm126_vm1, %v8908_v43, -inf  ;;  %v8951_v16 = vpop.permute.xlu1 %4860  ;;  %v9061_v30 = vadd.f32 %v8896_v15, %v8707_v52 }
 0x4dc   :  { %v8910_v48 = vpop.f32.mrf.mxu1  ;;  %10200 = vst [vmem:[#allocation8_spill] sm:$0xff] %v8915_v37  ;;  %v3950_v42 = vsel %vm126_vm1, %v8915_v37, -inf }
 0x4dd   :  { %v9024_v22 = vadd.f32 %v8707_v52, %v8910_v48  ;;  %10207 = vst [vmem:[#allocation15_spill] sm:$0xff] %v9061_v30  ;;  %v3980_v23 = vsel %vm126_vm1, %v9061_v30, -inf }
 0x4de   :  { %5096 = vadd.xlane.f32.xlu0 %v5095_v45  ;;  %v8923_v8 = vpop.f32.mrf.mxu1  ;;  %v5010_v45 = vsel %vm4946_vm4, %v8915_v37, 0.0  ;;  %v8947_v21 = vpop.permute.xlu0 %4863  ;;  %vm4962_vm4 = vcmp.eq.s32.totalorder %v8702_v51, %v8863_v36 }
 0x4df   :  { %5093 = vadd.xlane.f32.xlu1 %v5092_v3  ;;  %v5107_v3 = vsel %vm126_vm1, %v5011_v46, 0.0  ;;  %v8964_v46 = vadd.f32 %v8707_v52, %v8852_v28  ;;  %10204 = vst [vmem:[#allocation12_spill] sm:$0xff] %v9024_v22 }
 0x4e1   :  { %v3965_v28 = vsel %vm126_vm1, %v8964_v46, -inf }
 0x4e2   :  { %3948 = vmax.xlane.f32.xlu0 %v3947_v61  ;;  %v8938_v61 = vpop.f32.mrf.mxu1 }
 0x4e3   :  { %3945 = vmax.xlane.f32.xlu1 %v3944_v17  ;;  %v5104_v17 = vsel %vm126_vm1, %v5010_v45, 0.0 }
 0x4e6   :  { %5102 = vadd.xlane.f32.xlu0 %v5101_v47  ;;  %v3959_v47 = vsel %vm126_vm1, %v8936_v53, -inf }
 0x4e7   :  { %5099 = vadd.xlane.f32.xlu1 %v5098_v29  ;;  %v8955_v29 = vpop.f32.mrf.mxu1 }
 0x4e9   :  { %v8966_v45 = vpop.f32.mrf.mxu1 }
 0x4ea   :  { %3954 = vmax.xlane.f32.xlu0 %v3953_v26  ;;  %v5013_v26 = vsel %vm4949_vm5, %v8936_v53, 0.0  ;;  %v9084_v57 = vadd.f32 %v8707_v52, %v8966_v45  ;;  %vm4970_vm5 = vcmp.eq.s32.totalorder %v8702_v51, %v8931_v50 }
 0x4eb   :  { %3951 = vmax.xlane.f32.xlu1 %v3950_v42  ;;  %v5113_v42 = vsel %vm126_vm1, %v5013_v26, 0.0 }
 0x4ec   :  { %10208 = vst [vmem:[#allocation16_spill] sm:$0xff] %v9084_v57 }
 0x4ee   :  { %5108 = vadd.xlane.f32.xlu0 %v5107_v3  ;;  %v8969_v3 = vpop.permute.xlu0 %4869 }
 0x4ef   :  { %5105 = vadd.xlane.f32.xlu1 %v5104_v17  ;;  %v8973_v17 = vadd.f32 %v8827_v14, %v8707_v52  ;;  %v5015_v14 = vsel %vm4951_vm7, %v8964_v46, 0.0  ;;  %vm4963_vm7 = vcmp.eq.s32.totalorder %v8702_v51, %v8846_v19 }
 0x4f0   :  { %v5119_v1 = vsel %vm126_vm1, %v5015_v14, 0.0  ;;  %v3971_v14 = vsel %vm126_vm1, %v8996_v10, -inf }
 0x4f1   :  { %10202 = vst [vmem:[#allocation10_spill] sm:$0xff] %v8973_v17  ;;  %v3962_v26 = vsel %vm126_vm1, %v8973_v17, -inf  ;;  %v5014_v54 = vsel %vm4950_vm8, %v8973_v17, 0.0  ;;  %vm4972_vm8 = vcmp.eq.s32.totalorder %v8702_v51, %v8947_v21 }
 0x4f2   :  { %3960 = vmax.xlane.f32.xlu0 %v3959_v47  ;;  %v8975_v47 = vpop.permute.xlu1 %4866 }
 0x4f3   :  { %3957 = vmax.xlane.f32.xlu1 %v3956_v2  ;;  %v8983_v2 = vpop.f32.mrf.mxu1 }
 0x4f4   :  { %v9135_v24 = vadd.f32 %v8983_v2, %v8707_v52 }
 0x4f5   :  { %v8998_v34 = vpop.f32.mrf.mxu1 }
 0x4f6   :  { %5114 = vadd.xlane.f32.xlu0 %v5113_v42  ;;  %v8989_v42 = vpop.permute.xlu0 %4875  ;;  %10215 = vst [vmem:[#allocation23_spill] sm:$0xff] %v9135_v24  ;;  %v3998_v2 = vsel %vm126_vm1, %v9135_v24, -inf }
 0x4f7   :  { %5111 = vadd.xlane.f32.xlu1 %v5110_v63  ;;  %v8992_v63 = vpop.permute.xlu1 %4872  ;;  %v9011_v62 = vpop.f32.mrf.mxu1  ;;  %vm4976_vm12 = vcmp.eq.s32.totalorder %v8702_v51, %v8989_v42 }
 0x4f9   :  { %v9026_v37 = vpop.f32.mrf.mxu1 }
 0x4fa   :  { %3966 = vmax.xlane.f32.xlu0 %v3965_v28  ;;  %v5116_v28 = vsel %vm126_vm1, %v5014_v54, 0.0 }
 0x4fb   :  { %3963 = vmax.xlane.f32.xlu1 %v3962_v26  ;;  %v9003_v26 = vadd.f32 %v8838_v18, %v8707_v52  ;;  %v9016_v18 = vpop.permute.xlu0 %4881  ;;  %v9019_v12 = vpop.permute.xlu1 %4878 }
 0x4fd   :  { %10203 = vst [vmem:[#allocation11_spill] sm:$0xff] %v9003_v26  ;;  %v3968_v54 = vsel %vm126_vm1, %v9003_v26, -inf }
 0x4fe   :  { %5120 = vadd.xlane.f32.xlu0 %v5119_v1  ;;  %v5017_v1 = vsel %vm4953_vm9, %v8996_v10, 0.0  ;;  %vm4966_vm9 = vcmp.eq.s32.totalorder %v8702_v51, %v8902_v35 }
 0x4ff   :  { %5117 = vadd.xlane.f32.xlu1 %v5116_v28  ;;  %v5016_v28 = vsel %vm4952_vm10, %v9003_v26, 0.0  ;;  %v5125_v17 = vsel %vm126_vm1, %v5017_v1, 0.0  ;;  %v3977_v1 = vsel %vm126_vm1, %v9024_v22, -inf  ;;  %v9039_v48 = vpop.permute.xlu1 %4884  ;;  %v9052_v26 = vadd.f32 %v8707_v52, %v8938_v61 }
 0x500   :  { %vm4974_vm10 = vcmp.eq.s32.totalorder %v8702_v51, %v8969_v3 }
 0x501   :  { %10206 = vst [vmem:[#allocation14_spill] sm:$0xff] %v9052_v26  ;;  %v3983_v61 = vsel %vm126_vm1, %v9052_v26, -inf  ;;  %v5021_v15 = vsel %vm4957_vm13, %v9052_v26, 0.0  ;;  %v9089_v26 = vadd.f32 %v8923_v8, %v8707_v52  ;;  %vm4968_vm13 = vcmp.eq.s32.totalorder %v8702_v51, %v8905_v44 }
 0x502   :  { %3972 = vmax.xlane.f32.xlu0 %v3971_v14  ;;  %v5122_v14 = vsel %vm126_vm1, %v5016_v28, 0.0  ;;  %v5019_v28 = vsel %vm4955_vm11, %v9024_v22, 0.0  ;;  %v5137_v33 = vsel %vm126_vm1, %v5021_v15, 0.0  ;;  %vm4965_vm11 = vcmp.eq.s32.totalorder %v8702_v51, %v8867_v39 }
 0x503   :  { %3969 = vmax.xlane.f32.xlu1 %v3968_v54  ;;  %v9035_v54 = vpop.permute.xlu0 %4887  ;;  %10209 = vst [vmem:[#allocation17_spill] sm:$0xff] %v9089_v26  ;;  %v3986_v15 = vsel %vm126_vm1, %v9089_v26, -inf  ;;  %v5022_v8 = vsel %vm4958_vm0, %v9089_v26, 0.0  ;;  %vm4969_vm0 = vcmp.eq.s32.totalorder %v8702_v51, %v8928_v55 }
 0x506   :  { %5126 = vadd.xlane.f32.xlu0 %v5125_v17  ;;  %v9043_v17 = vpop.f32.mrf.mxu1 }
 0x507   :  { %5123 = vadd.xlane.f32.xlu1 %v5122_v14  ;;  %v5131_v14 = vsel %vm126_vm1, %v5019_v28, 0.0 }
 0x508   :  { %v9054_v32 = vpop.f32.mrf.mxu1 }
 0x50a   :  { %3978 = vmax.xlane.f32.xlu0 %v3977_v1  ;;  %v9057_v1 = vpop.permute.xlu0 %4893  ;;  %v9071_v28 = vpop.f32.mrf.mxu1 }
 0x50b   :  { %3975 = vmax.xlane.f32.xlu1 %v3974_v40  ;;  %v9063_v40 = vpop.permute.xlu1 %4890 }
 0x50c   :  { %v3766_v22 = vpop.f32.mrf.mxu1 }
 0x50e   :  { %5132 = vadd.xlane.f32.xlu0 %v5131_v14  ;;  %v5020_v14 = vsel %vm4956_vm14, %v9061_v30, 0.0  ;;  %v7106_v45 = vpop.f32.mrf.mxu1  ;;  %v9108_v30 = vadd.f32 %v8707_v52, %v8998_v34  ;;  %vm4967_vm14 = vcmp.eq.s32.totalorder %v8702_v51, %v8888_v41 }
 0x50f   :  { %5129 = vadd.xlane.f32.xlu1 %v5128_v31  ;;  %v9077_v31 = vpop.permute.xlu0 %4899  ;;  %v9080_v6 = vpop.permute.xlu1 %4896  ;;  %v9164_v36 = vadd.f32 %v7106_v45, %v8707_v52 }
 0x510   :  { %v3776_v9 = vpop.f32.mrf.mxu1 }
 0x511   :  { %10221 = vst [vmem:[#allocation29_spill] sm:$0xff] %v9164_v36 }
 0x512   :  { %3984 = vmax.xlane.f32.xlu0 %v3983_v61  ;;  %v5134_v61 = vsel %vm126_vm1, %v5020_v14, 0.0  ;;  %v5023_v14 = vsel %vm4959_vm15, %v9084_v57, 0.0  ;;  %v7109_v34 = vpop.f32.mrf.mxu1  ;;  %vm4978_vm15 = vcmp.eq.s32.totalorder %v8702_v51, %v9016_v18 }
 0x513   :  { %3981 = vmax.xlane.f32.xlu1 %v3980_v23  ;;  %v3989_v23 = vsel %vm126_vm1, %v9084_v57, -inf  ;;  %v5143_v60 = vsel %vm126_vm1, %v5023_v14, 0.0  ;;  %v9113_v57 = vadd.f32 %v8955_v29, %v8707_v52  ;;  %v3995_v14 = vsel %vm126_vm1, %v9108_v30, -inf }
 0x514   :  { %v9192_v4 = vadd.f32 %v7109_v34, %v8707_v52 }
 0x515   :  { %10211 = vst [vmem:[#allocation19_spill] sm:$0xff] %v9113_v57  ;;  %v3992_v29 = vsel %vm126_vm1, %v9113_v57, -inf  ;;  %v5024_v11 = vsel %vm4960_vm3, %v9113_v57, 0.0  ;;  %vm4971_vm3 = vcmp.eq.s32.totalorder %v8702_v51, %v8951_v16 }
 0x516   :  { %5138 = vadd.xlane.f32.xlu0 %v5137_v33  ;;  %v9100_v33 = vpop.permute.xlu0 %4905  ;;  %10226 = vst [vmem:[#allocation34_spill] sm:$0xff] %v9192_v4 }
 0x517   :  { %5135 = vadd.xlane.f32.xlu1 %v5134_v61  ;;  %10210 = vst [vmem:[#allocation18_spill] sm:$0xff] %v9100_v33  ;;  %v9103_v61 = vpop.permute.xlu1 %4902 }
 0x51a   :  { %3990 = vmax.xlane.f32.xlu0 %v3989_v23  ;;  %v5140_v23 = vsel %vm126_vm1, %v5022_v8, 0.0  ;;  %v5025_v8 = vsel %vm4961_vm2, %v9108_v30, 0.0  ;;  %vm4980_vm2 = vcmp.eq.s32.totalorder %v8702_v51, %v9035_v54 }
 0x51b   :  { %3987 = vmax.xlane.f32.xlu1 %v3986_v15  ;;  %v9117_v15 = vpop.permute.xlu0 %4911  ;;  %v9121_v33 = vpop.permute.xlu1 %4908 }
 0x51c   :  { %10212 = vst [vmem:[#allocation20_spill] sm:$0xff] %v9117_v15  ;;  %10213 = vst [vmem:[#allocation21_spill] sm:$0xff] %v9121_v33  ;;  %v5146_v15 = vsel %vm126_vm1, %v5024_v11, 0.0 }
 0x51e   :  { %5144 = vadd.xlane.f32.xlu0 %v5143_v60  ;;  %v5149_v60 = vsel %vm126_vm1, %v5025_v8, 0.0  ;;  %v9145_v8 = vadd.f32 %v8707_v52, %v9054_v32  ;;  %v9159_v32 = vadd.f32 %v8707_v52, %v3766_v22 }
 0x51f   :  { %5141 = vadd.xlane.f32.xlu1 %v5140_v23  ;;  %v3786_v23 = vpop.f32.mrf.mxu1  ;;  %v9131_v33 = vpop.permute.xlu0 %4917 }
 0x520   :  { %10214 = vst [vmem:[#allocation22_spill] sm:$0xff] %v9131_v33  ;;  %10218 = vst [vmem:[#allocation26_spill] sm:$0xff] %v9145_v8 }
 0x522   :  { %3996 = vmax.xlane.f32.xlu0 %v3995_v14  ;;  %v9139_v14 = vadd.f32 %v8707_v52, %v9026_v37  ;;  %v4007_v37 = vsel %vm126_vm1, %v9145_v8, -inf }
 0x523   :  { %3993 = vmax.xlane.f32.xlu1 %v3992_v29  ;;  %v9141_v29 = vpop.permute.xlu1 %4914 }
 0x524   :  { %10216 = vst [vmem:[#allocation24_spill] sm:$0xff] %v9139_v14  ;;  %10217 = vst [vmem:[#allocation25_spill] sm:$0xff] %v9141_v29  ;;  %v4001_v11 = vsel %vm126_vm1, %v9139_v14, -inf  ;;  %v9156_v29 = vpop.permute.xlu0 %4923 }
 0x525   :  { %10219 = vst [vmem:[#allocation27_spill] sm:$0xff] %v9156_v29  ;;  %v4013_v29 = vsel %vm126_vm1, %v9159_v32, -inf }
 0x526   :  { %5150 = vadd.xlane.f32.xlu0 %v5149_v60  ;;  %v7112_v60 = vpop.f32.mrf.mxu1 }
 0x527   :  { %5147 = vadd.xlane.f32.xlu1 %v5146_v15  ;;  %v5026_v15 = vsel %vm4962_vm4, %v9135_v24, 0.0  ;;  %v9161_v33 = vpop.permute.xlu1 %4920  ;;  %vm4982_vm4 = vcmp.eq.s32.totalorder %v8702_v51, %v9057_v1 }
 0x528   :  { %10220 = vst [vmem:[#allocation28_spill] sm:$0xff] %v9161_v33  ;;  %v5152_v57 = vsel %vm126_vm1, %v5026_v15, 0.0  ;;  %v9180_v15 = vpop.permute.xlu0 %4929  ;;  %v9186_v33 = vadd.f32 %v8707_v52, %v3776_v9  ;;  %v5027_v9 = vsel %vm4963_vm7, %v9139_v14, 0.0  ;;  %vm4975_vm7 = vcmp.eq.s32.totalorder %v8702_v51, %v8992_v63 }
 0x529   :  { %10223 = vst [vmem:[#allocation31_spill] sm:$0xff] %v9180_v15  ;;  %v5155_v34 = vsel %vm126_vm1, %v5027_v9, 0.0 }
 0x52a   :  { %4002 = vmax.xlane.f32.xlu0 %v4001_v11  ;;  %v3796_v11 = vpop.f32.mrf.mxu1  ;;  %10225 = vst [vmem:[#allocation33_spill] sm:$0xff] %v9186_v33 }
 0x52b   :  { %3999 = vmax.xlane.f32.xlu1 %v3998_v2  ;;  %v9169_v2 = vadd.f32 %v9011_v62, %v8707_v52  ;;  %v9244_v26 = vadd.f32 %v8707_v52, %v3796_v11 }
 0x52c   :  { %v7115_v22 = vpop.f32.mrf.mxu1 }
 0x52d   :  { %10222 = vst [vmem:[#allocation30_spill] sm:$0xff] %v9169_v2  ;;  %v4004_v45 = vsel %vm126_vm1, %v9169_v2, -inf  ;;  %v5028_v62 = vsel %vm4964_vm6, %v9169_v2, 0.0  ;;  %10236 = vst [vmem:[#allocation44_spill] sm:$0xff] %v9244_v26  ;;  %v9248_v39 = vadd.f32 %v7115_v22, %v8707_v52  ;;  %v4031_v11 = vsel %vm126_vm1, %v9244_v26, -inf }
 0x52e   :  { %4008 = vmax.xlane.f32.xlu0 %v4007_v37  ;;  %v5034_v37 = vsel %vm4970_vm5, %v9164_v36, 0.0  ;;  %v5158_v15 = vsel %vm126_vm1, %v5028_v62, 0.0  ;;  %v9208_v62 = vadd.f32 %v9043_v17, %v8707_v52  ;;  %vm4973_vm5 = vcmp.eq.s32.totalorder %v8702_v51, %v8975_v47 }
 0x52f   :  { %5153 = vadd.xlane.f32.xlu1 %v5152_v57  ;;  %v9183_v57 = vpop.permute.xlu1 %4926  ;;  %v5176_v50 = vsel %vm126_vm1, %v5034_v37, 0.0  ;;  %v5036_v37 = vsel %vm4972_vm8, %v9192_v4, 0.0  ;;  %10237 = vst [vmem:[#allocation45_spill] sm:$0xff] %v9248_v39  ;;  %vm4984_vm6 = vcmp.eq.s32.totalorder %v8702_v51, %v9077_v31  ;;  %vm4977_vm8 = vcmp.eq.s32.totalorder %v8702_v51, %v9019_v12 }
 0x530   :  { %10224 = vst [vmem:[#allocation32_spill] sm:$0xff] %v9183_v57  ;;  %v4019_v57 = vsel %vm126_vm1, %v9186_v33, -inf  ;;  %10228 = vst [vmem:[#allocation36_spill] sm:$0xff] %v9208_v62  ;;  %v5182_v21 = vsel %vm126_vm1, %v5036_v37, 0.0  ;;  %v4010_v17 = vsel %vm126_vm1, %v9208_v62, -inf  ;;  %v5030_v24 = vsel %vm4966_vm9, %v9208_v62, 0.0 }
 0x531   :  { %vm4979_vm9 = vcmp.eq.s32.totalorder %v8702_v51, %v9039_v48 }
 0x532   :  { %4014 = vmax.xlane.f32.xlu0 %v4013_v29  ;;  %v3806_v29 = vpop.f32.mrf.mxu1 }
 0x533   :  { %4005 = vmax.xlane.f32.xlu1 %v4004_v45 }
 0x534   :  { %v7118_v19 = vpop.f32.mrf.mxu1 }
 0x535   :  { %v9280_v44 = vadd.f32 %v7118_v19, %v8707_v52 }
 0x536   :  { %5177 = vadd.xlane.f32.xlu0 %v5176_v50  ;;  %v3816_v9 = vpop.f32.mrf.mxu1 }
 0x537   :  { %v9195_v45 = vpop.xlane.xlu0 %3909  ;;  %5159 = vadd.xlane.f32.xlu1 %v5158_v15 }
 0x538   :  { %v9200_v2 = vpop.xlane.xlu1 %5063  ;;  %v7121_v35 = vpop.f32.mrf.mxu1 }
 0x539   :  { %10227 = vst [vmem:[#allocation35_spill] sm:$0xff] %v9200_v2  ;;  %v9215_v2 = vadd.f32 %v8707_v52, %v3786_v23  ;;  %v9305_v18 = vadd.f32 %v7121_v35, %v8707_v52 }
 0x53a   :  { %4020 = vmax.xlane.f32.xlu0 %v4019_v57  ;;  %v9221_v57 = vadd.f32 %v7112_v60, %v8707_v52  ;;  %v5164_v60 = vsel %vm126_vm1, %v5030_v24, 0.0 }
 0x53b   :  { %5156 = vadd.xlane.f32.xlu1 %v5155_v34  ;;  %v9210_v15 = vpop.xlane.xlu0 %3906  ;;  %10230 = vst [vmem:[#allocation38_spill] sm:$0xff] %v9215_v2  ;;  %v4025_v23 = vsel %vm126_vm1, %v9215_v2, -inf  ;;  %v5044_v35 = vsel %vm4980_vm2, %v9305_v18, 0.0 }
 0x53c   :  { %10229 = vst [vmem:[#allocation37_spill] sm:$0xff] %v9210_v15  ;;  %v9212_v50 = vpop.xlane.xlu1 %3915  ;;  %10231 = vst [vmem:[#allocation39_spill] sm:$0xff] %v9221_v57  ;;  %v4097_v63 = vsub.f32 %v8718_v58, %v9210_v15 }
 0x53e   :  { %5183 = vadd.xlane.f32.xlu0 %v5182_v21  ;;  %v5038_v21 = vsel %vm4974_vm10, %v9221_v57, 0.0  ;;  %vm4981_vm10 = vcmp.eq.s32.totalorder %v8702_v51, %v9063_v40 }
 0x53f   :  { %4011 = vmax.xlane.f32.xlu1 %v4010_v17  ;;  %v9225_v34 = vpop.xlane.xlu0 %5060  ;;  %v5188_v3 = vsel %vm126_vm1, %v5038_v21, 0.0 }
 0x540   :  { %10232 = vst [vmem:[#allocation40_spill] sm:$0xff] %v9225_v34  ;;  %v9230_v37 = vpop.xlane.xlu1 %3912  ;;  %v5029_v34 = vsel %vm4965_vm11, %v9145_v8, 0.0  ;;  %v9274_v8 = vadd.f32 %v8707_v52, %v3806_v29  ;;  %v5031_v29 = vsel %vm4967_vm14, %v9159_v32, 0.0  ;;  %vm4983_vm11 = vcmp.eq.s32.totalorder %v8702_v51, %v9080_v6 }
 0x541   :  { %10233 = vst [vmem:[#allocation41_spill] sm:$0xff] %v9230_v37  ;;  %v5161_v24 = vsel %vm126_vm1, %v5029_v34, 0.0  ;;  %v5040_v34 = vsel %vm4976_vm12, %v9248_v39, 0.0  ;;  %v5167_v19 = vsel %vm126_vm1, %v5031_v29, 0.0  ;;  %v4022_v29 = vsel %vm126_vm1, %v9164_v36, -inf }
 0x542   :  { %4026 = vmax.xlane.f32.xlu0 %v4025_v23  ;;  %v3826_v23 = vpop.f32.mrf.mxu1  ;;  %10241 = vst [vmem:[#allocation49_spill] sm:$0xff] %v9274_v8  ;;  %v5194_v42 = vsel %vm126_vm1, %v5040_v34, 0.0  ;;  %v5042_v34 = vsel %vm4978_vm15, %v9280_v44, 0.0  ;;  %v4099_v58 = vsub.f32 %v8737_v5, %v9230_v37  ;;  %vm4985_vm12 = vcmp.eq.s32.totalorder %v8702_v51, %v9103_v61 }
 0x543   :  { %5165 = vadd.xlane.f32.xlu1 %v5164_v60  ;;  %v9238_v17 = vpop.xlane.xlu0 %5069  ;;  %v9253_v60 = vadd.f32 %v9071_v28, %v8707_v52  ;;  %v9327_v36 = vadd.f32 %v8707_v52, %v3826_v23 }
 0x544   :  { %10234 = vst [vmem:[#allocation42_spill] sm:$0xff] %v9238_v17  ;;  %v9241_v62 = vpop.xlane.xlu1 %5066  ;;  %v7124_v22 = vpop.f32.mrf.mxu1  ;;  %v4165_v12 = vmul.f32 1.442695, %v4099_v58  ;;  %v4052_v58 = vsel %vm126_vm1, %v9305_v18, -inf }
 0x545   :  { %10235 = vst [vmem:[#allocation43_spill] sm:$0xff] %v9241_v62  ;;  %10238 = vst [vmem:[#allocation46_spill] sm:$0xff] %v9253_v60  ;;  %v4016_v28 = vsel %vm126_vm1, %v9253_v60, -inf  ;;  %v9333_v54 = vadd.f32 %v7124_v22, %v8707_v52  ;;  %v4049_v23 = vsel %vm126_vm1, %v9327_v36, -inf }
 0x546   :  { %5189 = vadd.xlane.f32.xlu0 %v5188_v3  ;;  %v5032_v3 = vsel %vm4968_vm13, %v9253_v60, 0.0 }
 0x547   :  { %5162 = vadd.xlane.f32.xlu1 %v5161_v24  ;;  %v9255_v17 = vpop.xlane.xlu0 %3918 }
 0x548   :  { %v9259_v62 = vpop.xlane.xlu1 %3921 }
 0x54a   :  { %4032 = vmax.xlane.f32.xlu0 %v4031_v11  ;;  %v3836_v11 = vpop.f32.mrf.mxu1 }
 0x54b   :  { %4017 = vmax.xlane.f32.xlu1 %v4016_v28  ;;  %v9268_v21 = vpop.xlane.xlu0 %3924  ;;  %v5170_v28 = vsel %vm126_vm1, %v5032_v3, 0.0 }
 0x54c   :  { %10239 = vst [vmem:[#allocation47_spill] sm:$0xff] %v9268_v21  ;;  %v9271_v24 = vpop.xlane.xlu1 %5075  ;;  %v7127_v41 = vpop.f32.mrf.mxu1 }
 0x54d   :  { %10240 = vst [vmem:[#allocation48_spill] sm:$0xff] %v9271_v24  ;;  %v4037_v24 = vsel %vm126_vm1, %v9274_v8, -inf  ;;  %v9361_v1 = vadd.f32 %v7127_v41, %v8707_v52 }
 0x54e   :  { %5195 = vadd.xlane.f32.xlu0 %v5194_v42 }
 0x54f   :  { %5171 = vadd.xlane.f32.xlu1 %v5170_v28  ;;  %v9283_v14 = vpop.xlane.xlu0 %5078  ;;  %v9299_v28 = vadd.f32 %v8707_v52, %v3816_v9 }
 0x550   :  { %10242 = vst [vmem:[#allocation50_spill] sm:$0xff] %v9283_v14  ;;  %v9288_v60 = vpop.xlane.xlu1 %5072  ;;  %v5200_v14 = vsel %vm126_vm1, %v5042_v34, 0.0 }
 0x551   :  { %10243 = vst [vmem:[#allocation51_spill] sm:$0xff] %v9288_v60  ;;  %v4043_v9 = vsel %vm126_vm1, %v9299_v28, -inf  ;;  %v5033_v60 = vsel %vm4969_vm0, %v9186_v33, 0.0  ;;  %v5035_v33 = vsel %vm4971_vm3, %v9215_v2, 0.0  ;;  %v5037_v2 = vsel %vm4973_vm5, %v9244_v26, 0.0 }
 0x552   :  { %4038 = vmax.xlane.f32.xlu0 %v4037_v24  ;;  %v3846_v24 = vpop.f32.mrf.mxu1  ;;  %v5179_v22 = vsel %vm126_vm1, %v5035_v33, 0.0  ;;  %v4034_v33 = vsel %vm126_vm1, %v9221_v57, -inf  ;;  %v5185_v41 = vsel %vm126_vm1, %v5037_v2, 0.0  ;;  %v4040_v2 = vsel %vm126_vm1, %v9248_v39, -inf }
 0x553   :  { %5168 = vadd.xlane.f32.xlu1 %v5167_v19  ;;  %v9294_v3 = vpop.xlane.xlu0 %3930  ;;  %v9383_v57 = vadd.f32 %v8707_v52, %v3846_v24  ;;  %v5039_v26 = vsel %vm4975_vm7, %v9274_v8, 0.0  ;;  %vm5575_vm5 = vcmask 7168  }
 0x554   :  { %v9296_v42 = vpop.xlane.xlu1 %3927  ;;  %v9318_v55 = vpop.f32.mrf.mxu1 }
 0x556   :  { %5201 = vadd.xlane.f32.xlu0 %v5200_v14  ;;  %v5173_v14 = vsel %vm126_vm1, %v5033_v60, 0.0  ;;  %v4028_v60 = vsel %vm126_vm1, %v9192_v4, -inf  ;;  %v9355_v4 = vadd.f32 %v8707_v52, %v3836_v11 }
 0x557   :  { %4023 = vmax.xlane.f32.xlu1 %v4022_v29  ;;  %v9309_v19 = vpop.xlane.xlu0 %5084 }
 0x558   :  { %10244 = vst [vmem:[#allocation52_spill] sm:$0xff] %v9309_v19  ;;  %v9314_v34 = vpop.xlane.xlu1 %5081  ;;  %v4055_v11 = vsel %vm126_vm1, %v9355_v4, -inf }
 0x559   :  { %10245 = vst [vmem:[#allocation53_spill] sm:$0xff] %v9314_v34  ;;  %v5206_v34 = vsel %vm126_vm1, %v5044_v35, 0.0 }
 0x55a   :  { %4044 = vmax.xlane.f32.xlu0 %v4043_v9  ;;  %v3856_v9 = vpop.f32.mrf.mxu1 }
 0x55b   :  { %5174 = vadd.xlane.f32.xlu1 %v5173_v14  ;;  %v9322_v29 = vpop.xlane.xlu0 %3936 }
 0x55c   :  { %v9324_v19 = vpop.xlane.xlu1 %3933  ;;  %v9346_v16 = vpop.f32.mrf.mxu1 }
 0x55e   :  { %5207 = vadd.xlane.f32.xlu0 %v5206_v34  ;;  %v5046_v34 = vsel %vm4982_vm4, %v9333_v54, 0.0 }
 0x55f   :  { %4029 = vmax.xlane.f32.xlu1 %v4028_v60  ;;  %v9337_v14 = vpop.xlane.xlu0 %5090 }
 0x560   :  { %10246 = vst [vmem:[#allocation54_spill] sm:$0xff] %v9337_v14  ;;  %v9342_v35 = vpop.xlane.xlu1 %5087 }
 0x561   :  { %10247 = vst [vmem:[#allocation55_spill] sm:$0xff] %v9342_v35  ;;  %v5212_v35 = vsel %vm126_vm1, %v5046_v34, 0.0 }
 0x562   :  { %4050 = vmax.xlane.f32.xlu0 %v4049_v23  ;;  %v3866_v23 = vpop.f32.mrf.mxu1 }
 0x563   :  { %5180 = vadd.xlane.f32.xlu1 %v5179_v22  ;;  %v9350_v60 = vpop.xlane.xlu0 %3942 }
 0x564   :  { %v9352_v14 = vpop.xlane.xlu1 %3939  ;;  %v9374_v47 = vpop.f32.mrf.mxu1 }
 0x566   :  { %5213 = vadd.xlane.f32.xlu0 %v5212_v35  ;;  %v5048_v35 = vsel %vm4984_vm6, %v9361_v1, 0.0  ;;  %v3876_v31 = vpop.f32.mrf.mxu1 }
 0x567   :  { %4035 = vmax.xlane.f32.xlu1 %v4034_v33  ;;  %v9365_v22 = vpop.xlane.xlu0 %5096  ;;  %v9428_v5 = vadd.f32 %v8707_v52, %v3876_v31  ;;  %v4103_v31 = vsub.f32 %v8764_v25, %v9268_v21 }
 0x568   :  { %10248 = vst [vmem:[#allocation56_spill] sm:$0xff] %v9365_v22  ;;  %v9370_v34 = vpop.xlane.xlu1 %5093 }
 0x569   :  { %10249 = vst [vmem:[#allocation57_spill] sm:$0xff] %v9370_v34  ;;  %v5218_v34 = vsel %vm126_vm1, %v5048_v35, 0.0  ;;  %v9398_v35 = vadd.f32 %v8707_v52, %v3856_v9  ;;  %v4161_v9 = vmul.f32 1.442695, %v4097_v63  ;;  %v4173_v48 = vmul.f32 1.442695, %v4103_v31 }
 0x56a   :  { %4056 = vmax.xlane.f32.xlu0 %v4055_v11 }
 0x56b   :  { %5186 = vadd.xlane.f32.xlu1 %v5185_v41  ;;  %v9378_v33 = vpop.xlane.xlu0 %3948  ;;  %v4061_v41 = vsel %vm126_vm1, %v9383_v57, -inf  ;;  %v4067_v39 = vsel %vm126_vm1, %v9398_v35, -inf  ;;  %7150 = vpow2.f32 %v4161_v9 }
 0x56c   :  { %v9380_v22 = vpop.xlane.xlu1 %3945  ;;  %7152 = vpow2.f32 %v4165_v12  ;;  %v5043_v12 = vsel %vm4979_vm9, %v9327_v36, 0.0 }
 0x56e   :  { %5219 = vadd.xlane.f32.xlu0 %v5218_v34  ;;  %v9402_v34 = vpop.f32.mrf.mxu1 }
 0x56f   :  { %4041 = vmax.xlane.f32.xlu1 %v4040_v2  ;;  %v9390_v11 = vpop.xlane.xlu0 %5102  ;;  %v5191_v2 = vsel %vm126_vm1, %v5039_v26, 0.0  ;;  %v4046_v26 = vsel %vm126_vm1, %v9280_v44, -inf }
 0x570   :  { %10250 = vst [vmem:[#allocation58_spill] sm:$0xff] %v9390_v11  ;;  %v9395_v24 = vpop.xlane.xlu1 %5099 }
 0x571   :  { %10251 = vst [vmem:[#allocation59_spill] sm:$0xff] %v9395_v24  ;;  %v9412_v24 = vadd.f32 %v8707_v52, %v3866_v23  ;;  %v5041_v23 = vsel %vm4977_vm8, %v9299_v28, 0.0  ;;  %v9444_v52 = vld [vmem:[%s10131_s13] ss:$0 sm:$0xff] }
 0x572   :  { %4062 = vmax.xlane.f32.xlu0 %v4061_v41  ;;  %v3886_v41 = vpop.f32.mrf.mxu1 }
 0x573   :  { %5192 = vadd.xlane.f32.xlu1 %v5191_v2  ;;  %v9405_v11 = vpop.xlane.xlu0 %3954  ;;  %10252 = vst [vmem:[#allocation60_spill] sm:$0xff] %v9412_v24  ;;  %v4073_v15 = vsel %vm126_vm1, %v9412_v24, -inf  ;;  %v4079_v24 = vsel %vm126_vm1, %v9428_v5, -inf }
 0x574   :  { %v9409_v8 = vpop.xlane.xlu1 %3951  ;;  %v9432_v37 = vpop.f32.mrf.mxu1 }
 0x576   :  { %4068 = vmax.xlane.f32.xlu0 %v4067_v39  ;;  %v4101_v39 = vsub.f32 %v8752_v7, %v9255_v17  ;;  %v9447_v7 = vadd.f32 %v9444_v52, %v3886_v41  ;;  %v3896_v9 = vpop.f32.mrf.mxu1 }
 0x577   :  { %4047 = vmax.xlane.f32.xlu1 %v4046_v26  ;;  %v9420_v2 = vpop.xlane.xlu0 %5108  ;;  %v5197_v26 = vsel %vm126_vm1, %v5041_v23, 0.0  ;;  %v9463_v25 = vadd.f32 %v9444_v52, %v3896_v9 }
 0x578   :  { %10253 = vst [vmem:[#allocation61_spill] sm:$0xff] %v9420_v2  ;;  %v9425_v63 = vpop.xlane.xlu1 %5105  ;;  %v4085_v41 = vsel %vm126_vm1, %v9447_v7, -inf  ;;  %v7151_v31 = vpop.eup %7150 }
 0x579   :  { %10254 = vst [vmem:[#allocation62_spill] sm:$0xff] %v9425_v63 }
 0x57a   :  { %4074 = vmax.xlane.f32.xlu0 %v4073_v15  ;;  %v4169_v15 = vmul.f32 1.442695, %v4101_v39 }
 0x57b   :  { %5198 = vadd.xlane.f32.xlu1 %v5197_v26  ;;  %v9435_v2 = vpop.xlane.xlu0 %3960  ;;  %v5203_v26 = vsel %vm126_vm1, %v5043_v12, 0.0 }
 0x57c   :  { %v9439_v63 = vpop.xlane.xlu1 %3957  ;;  %7154 = vpow2.f32 %v4169_v15  ;;  %v4107_v15 = vsub.f32 %v8825_v13, %v9322_v29  ;;  %v4109_v13 = vsub.f32 %v8850_v27, %v9350_v60  ;;  %v4064_v27 = vsel %vm126_vm1, %v9361_v1, -inf }
 0x57d   :  { %7156 = vpow2.f32 %v4173_v48 }
 0x57e   :  { %4080 = vmax.xlane.f32.xlu0 %v4079_v24  ;;  %v4105_v24 = vsub.f32 %v8792_v49, %v9294_v3  ;;  %v4058_v49 = vsel %vm126_vm1, %v9333_v54, -inf  ;;  %v4181_v48 = vmul.f32 1.442695, %v4107_v15 }
 0x57f   :  { %4053 = vmax.xlane.f32.xlu1 %v4052_v58  ;;  %v9455_v23 = vpop.xlane.xlu0 %5114 }
 0x580   :  { %10255 = vst [vmem:[#allocation63_spill] sm:$0xff] %v9455_v23  ;;  %v9460_v39 = vpop.xlane.xlu1 %5111  ;;  %v4091_v23 = vsel %vm126_vm1, %v9463_v25, -inf }
 0x581   :  { %10256 = vst [vmem:[#allocation64_spill] sm:$0xff] %v9460_v39  ;;  %v4177_v39 = vmul.f32 1.442695, %v4105_v24  ;;  %v4289_v24 = vsel %vm126_vm1, %v7151_v31, 0.0 }
 0x582   :  { %4086 = vmax.xlane.f32.xlu0 %v4085_v41  ;;  %v5045_v41 = vsel %vm4981_vm10, %v9355_v4, 0.0 }
 0x583   :  { %5204 = vadd.xlane.f32.xlu1 %v5203_v26  ;;  %v9468_v58 = vpop.xlane.xlu0 %3966  ;;  %7158 = vpow2.f32 %v4177_v39  ;;  %v7153_v26 = vpop.eup %7152  ;;  %v5209_v40 = vsel %vm126_vm1, %v5045_v41, 0.0  ;;  %v4111_v39 = vsub.f32 %v8877_v38, %v9378_v33  ;;  %v5047_v41 = vsel %vm4983_vm11, %v9383_v57, 0.0 }
 0x584   :  { %v9472_v21 = vpop.xlane.xlu1 %3963  ;;  %7160 = vpow2.f32 %v4181_v48  ;;  %v4295_v15 = vsel %vm126_vm1, %v7153_v26, 0.0  ;;  %v4113_v38 = vsub.f32 %v8908_v43, %v9405_v11  ;;  %v5215_v6 = vsel %vm126_vm1, %v5047_v41, 0.0 }
 0x585   :  { %v4115_v43 = vsub.f32 %v8936_v53, %v9435_v2  ;;  %v4098_v41 = vsub.f32 %v8714_v56, %v9195_v45 }
 0x586   :  { %4092 = vmax.xlane.f32.xlu0 %v4091_v23 }
 0x587   :  { %4059 = vmax.xlane.f32.xlu1 %v4058_v49  ;;  %v9480_v9 = vpop.xlane.xlu0 %5120  ;;  %v4197_v53 = vmul.f32 1.442695, %v4115_v43  ;;  %v4163_v56 = vmul.f32 1.442695, %v4098_v41 }
 0x588   :  { %10257 = vst [vmem:[#allocation65_spill] sm:$0xff] %v9480_v9  ;;  %v9483_v12 = vpop.xlane.xlu1 %5117  ;;  %v4185_v9 = vmul.f32 1.442695, %v4109_v13  ;;  %v4189_v13 = vmul.f32 1.442695, %v4111_v39 }
 0x589   :  { %10258 = vst [vmem:[#allocation66_spill] sm:$0xff] %v9483_v12  ;;  %v7155_v12 = vpop.eup %7154 }
 0x58a   :  { %4290 = vadd.xlane.f32.xlu0 %v4289_v24  ;;  %7162 = vpow2.f32 %v4185_v9  ;;  %v4301_v24 = vsel %vm126_vm1, %v7155_v12, 0.0  ;;  %v7157_v26 = vpop.eup %7156  ;;  %v4193_v9 = vmul.f32 1.442695, %v4113_v38 }
 0x58b   :  { %5210 = vadd.xlane.f32.xlu1 %v5209_v40  ;;  %v9489_v23 = vpop.xlane.xlu0 %3972  ;;  %7164 = vpow2.f32 %v4189_v13  ;;  %v4307_v12 = vsel %vm126_vm1, %v7157_v26, 0.0  ;;  %v5049_v13 = vsel %vm4985_vm12, %v9398_v35, 0.0  ;;  %v4117_v26 = vsub.f32 %v8964_v46, %v9468_v58 }
 0x58c   :  { %v9491_v49 = vpop.xlane.xlu1 %3969  ;;  %7166 = vpow2.f32 %v4193_v9  ;;  %v9541_v9 = vadd.f32 %v9444_v52, %v9346_v16  ;;  %v4102_v46 = vsub.f32 %v8756_v20, %v9259_v62  ;;  %v9556_v20 = vadd.f32 %v9444_v52, %v9374_v47 }
 0x58d   :  { %7168 = vpow2.f32 %v4197_v53 }
 0x58e   :  { %4296 = vadd.xlane.f32.xlu0 %v4295_v15  ;;  %v9513_v15 = vadd.f32 %v9444_v52, %v9318_v55  ;;  %7170 = vpow2.f32 %v4163_v56  ;;  %v4076_v16 = vsel %vm126_vm1, %v9541_v9, -inf  ;;  %v4171_v53 = vmul.f32 1.442695, %v4102_v46  ;;  %v10265_v56 = vld [vmem:[#allocation12_spill] sm:$0xff] }
 0x58f   :  { %4065 = vmax.xlane.f32.xlu1 %v4064_v27  ;;  %v9500_v31 = vpop.xlane.xlu0 %5126  ;;  %v4082_v47 = vsel %vm126_vm1, %v9556_v20, -inf }
 0x590   :  { %v9503_v48 = vpop.xlane.xlu1 %5123  ;;  %v7159_v39 = vpop.eup %7158  ;;  %v4070_v55 = vsel %vm126_vm1, %v9513_v15, -inf }
 0x591   :  { %v4313_v61 = vsel %vm126_vm1, %v7159_v39, 0.0  ;;  %v4201_v39 = vmul.f32 1.442695, %v4117_v26 }
 0x592   :  { %4302 = vadd.xlane.f32.xlu0 %v4301_v24 }
 0x593   :  { %5216 = vadd.xlane.f32.xlu1 %v5215_v6  ;;  %v9509_v40 = vpop.xlane.xlu0 %3978  ;;  %v7161_v6 = vpop.eup %7160  ;;  %7172 = vpow2.f32 %v4201_v39 }
 0x594   :  { %10259 = vst [vmem:[#allocation67_spill] sm:$0xff] %v9509_v40  ;;  %v9515_v27 = vpop.xlane.xlu1 %3975  ;;  %v4319_v41 = vsel %vm126_vm1, %v7161_v6, 0.0 }
 0x596   :  { %4308 = vadd.xlane.f32.xlu0 %v4307_v12  ;;  %v4100_v12 = vsub.f32 %v8728_v0, %v9212_v50  ;;  %v4119_v0 = vsub.f32 %v8996_v10, %v9489_v23  ;;  %v4104_v10 = vsub.f32 %v8800_v59, %v9296_v42  ;;  %v9571_v59 = vadd.f32 %v9444_v52, %v9402_v34 }
 0x597   :  { %4071 = vmax.xlane.f32.xlu1 %v4070_v55  ;;  %v9526_v24 = vpop.xlane.xlu0 %5132  ;;  %v5221_v55 = vsel %vm126_vm1, %v5049_v13, 0.0  ;;  %v7163_v13 = vpop.eup %7162 }
 0x598   :  { %10260 = vst [vmem:[#allocation68_spill] sm:$0xff] %v9526_v24  ;;  %v9529_v38 = vpop.xlane.xlu1 %5129  ;;  %v4205_v6 = vmul.f32 1.442695, %v4119_v0  ;;  %v4175_v39 = vmul.f32 1.442695, %v4104_v10  ;;  %v10267_v0 = vld [vmem:[#allocation5_spill] sm:$0xff]  ;;  %v9586_v10 = vadd.f32 %v9444_v52, %v9432_v37 }
 0x599   :  { %10261 = vst [vmem:[#allocation69_spill] sm:$0xff] %v9529_v38  ;;  %v4088_v34 = vsel %vm126_vm1, %v9571_v59, -inf }
 0x59a   :  { %4314 = vadd.xlane.f32.xlu0 %v4313_v61  ;;  %v4167_v61 = vmul.f32 1.442695, %v4100_v12  ;;  %v4121_v12 = vsub.f32 %v10265_v56, %v9509_v40  ;;  %v4106_v56 = vsub.f32 %v10267_v0, %v9324_v19  ;;  %v4094_v37 = vsel %vm126_vm1, %v9586_v10, -inf }
 0x59b   :  { %5222 = vadd.xlane.f32.xlu1 %v5221_v55  ;;  %v9537_v24 = vpop.xlane.xlu0 %3984 }
 0x59c   :  { %10262 = vst [vmem:[#allocation70_spill] sm:$0xff] %v9537_v24  ;;  %v9545_v43 = vpop.xlane.xlu1 %3981  ;;  %7174 = vpow2.f32 %v4167_v61  ;;  %v10268_v61 = vld [vmem:[#allocation14_spill] sm:$0xff] }
 0x59d   :  { %7176 = vpow2.f32 %v4171_v53 }
 0x59e   :  { %4320 = vadd.xlane.f32.xlu0 %v4319_v41  ;;  %v4325_v41 = vsel %vm126_vm1, %v7163_v13, 0.0  ;;  %7178 = vpow2.f32 %v4205_v6  ;;  %v4209_v13 = vmul.f32 1.442695, %v4121_v12  ;;  %v4179_v6 = vmul.f32 1.442695, %v4106_v56 }
 0x59f   :  { %4077 = vmax.xlane.f32.xlu1 %v4076_v16  ;;  %v9552_v55 = vpop.xlane.xlu0 %5138  ;;  %v7165_v16 = vpop.eup %7164  ;;  %7180 = vpow2.f32 %v4175_v39 }
 0x5a0   :  { %10263 = vst [vmem:[#allocation71_spill] sm:$0xff] %v9552_v55  ;;  %v9560_v26 = vpop.xlane.xlu1 %5135  ;;  %7182 = vpow2.f32 %v4209_v13 }
 0x5a1   :  { %10264 = vst [vmem:[#allocation72_spill] sm:$0xff] %v9560_v26  ;;  %v7167_v26 = vpop.eup %7166  ;;  %7184 = vpow2.f32 %v4179_v6 }
 0x5a2   :  { %4326 = vadd.xlane.f32.xlu0 %v4325_v41  ;;  %v4123_v41 = vsub.f32 %v10268_v61, %v9537_v24  ;;  %v7169_v24 = vpop.eup %7168 }
 0x5a3   :  { %4083 = vmax.xlane.f32.xlu1 %v4082_v47  ;;  %v9567_v46 = vpop.xlane.xlu0 %3990  ;;  %v4331_v47 = vsel %vm126_vm1, %v7165_v16, 0.0  ;;  %v10271_v16 = vld [vmem:[#allocation16_spill] sm:$0xff]  ;;  %v7171_v52 = vpop.eup %7170 }
 0x5a4   :  { %10266 = vst [vmem:[#allocation12_spill] sm:$0xff] %v9567_v46  ;;  %v9575_v55 = vpop.xlane.xlu1 %3987  ;;  %v4213_v0 = vmul.f32 1.442695, %v4123_v41  ;;  %v4125_v61 = vsub.f32 %v10271_v16, %v9567_v46  ;;  %v4343_v41 = vsel %vm126_vm1, %v7169_v24, 0.0  ;;  %v7173_v16 = vpop.eup %7172 }
 0x5a6   :  { %4332 = vadd.xlane.f32.xlu0 %v4331_v47  ;;  %v4337_v47 = vsel %vm126_vm1, %v7167_v26, 0.0  ;;  %7186 = vpow2.f32 %v4213_v0  ;;  %v4217_v13 = vmul.f32 1.442695, %v4125_v61 }
 0x5a7   :  { %4089 = vmax.xlane.f32.xlu1 %v4088_v34  ;;  %v9582_v53 = vpop.xlane.xlu0 %5144  ;;  %v10272_v34 = vld [vmem:[#allocation6_spill] sm:$0xff] }
 0x5a8   :  { %10269 = vst [vmem:[#allocation5_spill] sm:$0xff] %v9582_v53  ;;  %v9588_v12 = vpop.xlane.xlu1 %5141  ;;  %v4108_v38 = vsub.f32 %v10272_v34, %v9352_v14  ;;  %7188 = vpow2.f32 %v4217_v13 }
 0x5a9   :  { %10270 = vst [vmem:[#allocation14_spill] sm:$0xff] %v9588_v12  ;;  %v7175_v12 = vpop.eup %7174 }
 0x5aa   :  { %4338 = vadd.xlane.f32.xlu0 %v4337_v47  ;;  %v4183_v34 = vmul.f32 1.442695, %v4108_v38  ;;  %v10274_v47 = vld [vmem:[#allocation7_spill] sm:$0xff]  ;;  %v7177_v0 = vpop.eup %7176 }
 0x5ab   :  { %4095 = vmax.xlane.f32.xlu1 %v4094_v37  ;;  %v9597_v39 = vpop.xlane.xlu0 %3996  ;;  %v4110_v53 = vsub.f32 %v10274_v47, %v9380_v22  ;;  %v4292_v37 = vsel %vm126_vm1, %v7171_v52, 0.0  ;;  %v7179_v24 = vpop.eup %7178  ;;  %v4298_v52 = vsel %vm126_vm1, %v7175_v12, 0.0 }
 0x5ac   :  { %10273 = vst [vmem:[#allocation16_spill] sm:$0xff] %v9597_v39  ;;  %v9599_v56 = vpop.xlane.xlu1 %3993  ;;  %v4127_v26 = vsub.f32 %v9108_v30, %v9597_v39  ;;  %v4349_v30 = vsel %vm126_vm1, %v7173_v16, 0.0  ;;  %7190 = vpow2.f32 %v4183_v34  ;;  %v10277_v39 = vld [vmem:[#allocation8_spill] sm:$0xff]  ;;  %v7181_v13 = vpop.eup %7180  ;;  %v10280_v34 = vld [vmem:[#allocation9_spill] sm:$0xff] }
 0x5ad   :  { %v4187_v38 = vmul.f32 1.442695, %v4110_v53  ;;  %v4112_v47 = vsub.f32 %v10277_v39, %v9409_v8  ;;  %v4304_v53 = vsel %vm126_vm1, %v7177_v0, 0.0  ;;  %v7183_v16 = vpop.eup %7182  ;;  %v4114_v12 = vsub.f32 %v10280_v34, %v9439_v63 }
 0x5ae   :  { %4344 = vadd.xlane.f32.xlu0 %v4343_v41  ;;  %v4221_v61 = vmul.f32 1.442695, %v4127_v26  ;;  %v4355_v26 = vsel %vm126_vm1, %v7179_v24, 0.0  ;;  %v4361_v0 = vsel %vm126_vm1, %v7183_v16, 0.0  ;;  %v4310_v24 = vsel %vm126_vm1, %v7181_v13, 0.0 }
 0x5af   :  { %4293 = vadd.xlane.f32.xlu1 %v4292_v37  ;;  %v9607_v6 = vpop.xlane.xlu0 %5150  ;;  %v10279_v37 = vld [vmem:[#allocation24_spill] sm:$0xff]  ;;  %v4191_v39 = vmul.f32 1.442695, %v4112_v47  ;;  %v4195_v47 = vmul.f32 1.442695, %v4114_v12 }
 0x5b0   :  { %10275 = vst [vmem:[#allocation6_spill] sm:$0xff] %v9607_v6  ;;  %v9609_v46 = vpop.xlane.xlu1 %5147  ;;  %7192 = vpow2.f32 %v4221_v61  ;;  %v7185_v61 = vpop.eup %7184 }
 0x5b1   :  { %10276 = vst [vmem:[#allocation7_spill] sm:$0xff] %v9609_v46  ;;  %7194 = vpow2.f32 %v4187_v38  ;;  %v4316_v13 = vsel %vm126_vm1, %v7185_v61, 0.0 }
 0x5b2   :  { %4350 = vadd.xlane.f32.xlu0 %v4349_v30 }
 0x5b3   :  { %4299 = vadd.xlane.f32.xlu1 %v4298_v52  ;;  %v9615_v41 = vpop.xlane.xlu0 %4002  ;;  %v7187_v38 = vpop.eup %7186 }
 0x5b4   :  { %10278 = vst [vmem:[#allocation8_spill] sm:$0xff] %v9615_v41  ;;  %v4129_v6 = vsub.f32 %v10279_v37, %v9615_v41  ;;  %v9619_v46 = vpop.xlane.xlu1 %3999  ;;  %v10282_v37 = vld [vmem:[#allocation26_spill] sm:$0xff]  ;;  %v4367_v16 = vsel %vm126_vm1, %v7187_v38, 0.0 }
 0x5b6   :  { %v4225_v30 = vmul.f32 1.442695, %v4129_v6  ;;  %4356 = vadd.xlane.f32.xlu0 %v4355_v26  ;;  %v10284_v6 = vld [vmem:[#allocation10_spill] sm:$0xff] }
 0x5b7   :  { %4305 = vadd.xlane.f32.xlu1 %v4304_v53  ;;  %v9625_v52 = vpop.xlane.xlu0 %4008  ;;  %v4116_v26 = vsub.f32 %v10284_v6, %v9472_v21 }
 0x5b8   :  { %10281 = vst [vmem:[#allocation24_spill] sm:$0xff] %v9625_v52  ;;  %v4131_v41 = vsub.f32 %v10282_v37, %v9625_v52  ;;  %v9629_v40 = vpop.xlane.xlu1 %5153  ;;  %7196 = vpow2.f32 %v4225_v30  ;;  %v10286_v30 = vld [vmem:[#allocation11_spill] sm:$0xff] }
 0x5b9   :  { %10283 = vst [vmem:[#allocation9_spill] sm:$0xff] %v9629_v40  ;;  %7198 = vpow2.f32 %v4191_v39  ;;  %v7189_v39 = vpop.eup %7188  ;;  %v4199_v12 = vmul.f32 1.442695, %v4116_v26 }
 0x5ba   :  { %v4229_v53 = vmul.f32 1.442695, %v4131_v41  ;;  %4362 = vadd.xlane.f32.xlu0 %v4361_v0  ;;  %v4118_v41 = vsub.f32 %v10286_v30, %v9491_v49 }
 0x5bb   :  { %4311 = vadd.xlane.f32.xlu1 %v4310_v24  ;;  %v9635_v34 = vpop.xlane.xlu0 %4014  ;;  %v7191_v24 = vpop.eup %7190 }
 0x5bc   :  { %10285 = vst [vmem:[#allocation26_spill] sm:$0xff] %v9635_v34  ;;  %v4133_v37 = vsub.f32 %v9159_v32, %v9635_v34  ;;  %v9639_v52 = vpop.xlane.xlu1 %4005  ;;  %7200 = vpow2.f32 %v4229_v53  ;;  %v4373_v53 = vsel %vm126_vm1, %v7189_v39, 0.0  ;;  %v4203_v61 = vmul.f32 1.442695, %v4118_v41  ;;  %v10293_v39 = vld [vmem:[#allocation15_spill] sm:$0xff] }
 0x5bd   :  { %7202 = vpow2.f32 %v4195_v47  ;;  %v7193_v38 = vpop.eup %7192  ;;  %v10289_v47 = vld [vmem:[#allocation13_spill] sm:$0xff]  ;;  %v4322_v30 = vsel %vm126_vm1, %v7191_v24, 0.0 }
 0x5be   :  { %v4233_v0 = vmul.f32 1.442695, %v4133_v37  ;;  %4368 = vadd.xlane.f32.xlu0 %v4367_v16  ;;  %v4120_v26 = vsub.f32 %v10289_v47, %v9515_v27  ;;  %v7195_v37 = vpop.eup %7194 }
 0x5bf   :  { %4317 = vadd.xlane.f32.xlu1 %v4316_v13  ;;  %v9645_v6 = vpop.xlane.xlu0 %5177  ;;  %v10291_v13 = vld [vmem:[#allocation33_spill] sm:$0xff]  ;;  %v4328_v24 = vsel %vm126_vm1, %v7195_v37, 0.0 }
 0x5c0   :  { %10287 = vst [vmem:[#allocation10_spill] sm:$0xff] %v9645_v6  ;;  %v9647_v32 = vpop.xlane.xlu1 %5159  ;;  %7204 = vpow2.f32 %v4233_v0  ;;  %v4122_v0 = vsub.f32 %v10293_v39, %v9545_v43  ;;  %v4207_v47 = vmul.f32 1.442695, %v4120_v26 }
 0x5c1   :  { %10288 = vst [vmem:[#allocation11_spill] sm:$0xff] %v9647_v32  ;;  %7206 = vpow2.f32 %v4199_v12  ;;  %v4379_v12 = vsel %vm126_vm1, %v7193_v38, 0.0  ;;  %v10295_v38 = vld [vmem:[#allocation17_spill] sm:$0xff] }
 0x5c2   :  { %4374 = vadd.xlane.f32.xlu0 %v4373_v53  ;;  %7208 = vpow2.f32 %v4203_v61  ;;  %v4124_v61 = vsub.f32 %v10295_v38, %v9575_v55 }
 0x5c3   :  { %4323 = vadd.xlane.f32.xlu1 %v4322_v30  ;;  %v9653_v16 = vpop.xlane.xlu0 %4020 }
 0x5c4   :  { %10290 = vst [vmem:[#allocation13_spill] sm:$0xff] %v9653_v16  ;;  %v4135_v6 = vsub.f32 %v10291_v13, %v9653_v16  ;;  %v9657_v34 = vpop.xlane.xlu1 %5156  ;;  %v4211_v16 = vmul.f32 1.442695, %v4122_v0  ;;  %v10299_v0 = vld [vmem:[#allocation19_spill] sm:$0xff]  ;;  %v4215_v38 = vmul.f32 1.442695, %v4124_v61 }
 0x5c5   :  { %10292 = vst [vmem:[#allocation33_spill] sm:$0xff] %v9657_v34  ;;  %v7197_v41 = vpop.eup %7196 }
 0x5c6   :  { %v4237_v53 = vmul.f32 1.442695, %v4135_v6  ;;  %4380 = vadd.xlane.f32.xlu0 %v4379_v12  ;;  %v7199_v30 = vpop.eup %7198  ;;  %v4385_v34 = vsel %vm126_vm1, %v7197_v41, 0.0  ;;  %v10297_v12 = vld [vmem:[#allocation38_spill] sm:$0xff]  ;;  %v4126_v41 = vsub.f32 %v10299_v0, %v9599_v56  ;;  %v10302_v0 = vld [vmem:[#allocation23_spill] sm:$0xff] }
 0x5c7   :  { %4329 = vadd.xlane.f32.xlu1 %v4328_v24  ;;  %v9663_v32 = vpop.xlane.xlu0 %5183  ;;  %v4334_v6 = vsel %vm126_vm1, %v7199_v30, 0.0 }
 0x5c8   :  { %10294 = vst [vmem:[#allocation15_spill] sm:$0xff] %v9663_v32  ;;  %7210 = vpow2.f32 %v4237_v53  ;;  %v9665_v13 = vpop.xlane.xlu1 %4011 }
 0x5c9   :  { %v7201_v39 = vpop.eup %7200  ;;  %7212 = vpow2.f32 %v4207_v47 }
 0x5ca   :  { %4386 = vadd.xlane.f32.xlu0 %v4385_v34  ;;  %v7203_v26 = vpop.eup %7202  ;;  %7214 = vpow2.f32 %v4211_v16  ;;  %v4391_v47 = vsel %vm126_vm1, %v7201_v39, 0.0  ;;  %v4128_v39 = vsub.f32 %v10302_v0, %v9619_v46 }
 0x5cb   :  { %4335 = vadd.xlane.f32.xlu1 %v4334_v6  ;;  %v9671_v37 = vpop.xlane.xlu0 %4026  ;;  %v4340_v30 = vsel %vm126_vm1, %v7203_v26, 0.0 }
 0x5cc   :  { %10296 = vst [vmem:[#allocation17_spill] sm:$0xff] %v9671_v37  ;;  %v4137_v53 = vsub.f32 %v10297_v12, %v9671_v37  ;;  %v9675_v24 = vpop.xlane.xlu1 %5165  ;;  %v4219_v37 = vmul.f32 1.442695, %v4126_v41 }
 0x5cd   :  { %10298 = vst [vmem:[#allocation38_spill] sm:$0xff] %v9675_v24  ;;  %v7205_v32 = vpop.eup %7204 }
 0x5ce   :  { %v4241_v34 = vmul.f32 1.442695, %v4137_v53  ;;  %4392 = vadd.xlane.f32.xlu0 %v4391_v47  ;;  %v7207_v6 = vpop.eup %7206  ;;  %v4397_v16 = vsel %vm126_vm1, %v7205_v32, 0.0  ;;  %v10304_v47 = vld [vmem:[#allocation44_spill] sm:$0xff]  ;;  %v10305_v32 = vld [vmem:[#allocation30_spill] sm:$0xff] }
 0x5cf   :  { %4341 = vadd.xlane.f32.xlu1 %v4340_v30  ;;  %v9681_v40 = vpop.xlane.xlu0 %5189  ;;  %v4346_v61 = vsel %vm126_vm1, %v7207_v6, 0.0  ;;  %v7209_v53 = vpop.eup %7208  ;;  %v4130_v41 = vsub.f32 %v10305_v32, %v9639_v52 }
 0x5d0   :  { %10300 = vst [vmem:[#allocation19_spill] sm:$0xff] %v9681_v40  ;;  %7216 = vpow2.f32 %v4241_v34  ;;  %v9683_v12 = vpop.xlane.xlu1 %5162 }
 0x5d1   :  { %10301 = vst [vmem:[#allocation73_spill] sm:$0xff] %v9683_v12  ;;  %7218 = vpow2.f32 %v4215_v38  ;;  %v4223_v38 = vmul.f32 1.442695, %v4128_v39 }
 0x5d2   :  { %4398 = vadd.xlane.f32.xlu0 %v4397_v16  ;;  %7220 = vpow2.f32 %v4219_v37  ;;  %v4352_v16 = vsel %vm126_vm1, %v7209_v53, 0.0  ;;  %v10308_v37 = vld [vmem:[#allocation36_spill] sm:$0xff] }
 0x5d3   :  { %4347 = vadd.xlane.f32.xlu1 %v4346_v61  ;;  %v9689_v26 = vpop.xlane.xlu0 %4032  ;;  %v4132_v32 = vsub.f32 %v10308_v37, %v9665_v13 }
 0x5d4   :  { %10303 = vst [vmem:[#allocation23_spill] sm:$0xff] %v9689_v26  ;;  %v4139_v30 = vsub.f32 %v10304_v47, %v9689_v26  ;;  %v9693_v34 = vpop.xlane.xlu1 %4017  ;;  %v4227_v26 = vmul.f32 1.442695, %v4130_v41 }
 0x5d5   :  { %v7211_v40 = vpop.eup %7210  ;;  %v4231_v41 = vmul.f32 1.442695, %v4132_v32 }
 0x5d6   :  { %v4245_v24 = vmul.f32 1.442695, %v4139_v30  ;;  %v4403_v6 = vsel %vm126_vm1, %v7211_v40, 0.0  ;;  %v7213_v0 = vpop.eup %7212  ;;  %v10310_v40 = vld [vmem:[#allocation49_spill] sm:$0xff] }
 0x5d7   :  { %4353 = vadd.xlane.f32.xlu1 %v4352_v16  ;;  %4404 = vadd.xlane.f32.xlu0 %v4403_v6  ;;  %v9699_v61 = vpop.xlane.xlu0 %5195  ;;  %v7215_v12 = vpop.eup %7214  ;;  %v4358_v39 = vsel %vm126_vm1, %v7213_v0, 0.0 }
 0x5d8   :  { %10306 = vst [vmem:[#allocation44_spill] sm:$0xff] %v9699_v61  ;;  %7222 = vpow2.f32 %v4245_v24  ;;  %v9701_v47 = vpop.xlane.xlu1 %5171  ;;  %v4364_v24 = vsel %vm126_vm1, %v7215_v12, 0.0  ;;  %v10314_v12 = vld [vmem:[#allocation29_spill] sm:$0xff] }
 0x5d9   :  { %10307 = vst [vmem:[#allocation30_spill] sm:$0xff] %v9701_v47  ;;  %7224 = vpow2.f32 %v4223_v38  ;;  %v10312_v38 = vld [vmem:[#allocation46_spill] sm:$0xff] }
 0x5da   :  { %7226 = vpow2.f32 %v4227_v26  ;;  %v4134_v61 = vsub.f32 %v10312_v38, %v9693_v34 }
 0x5db   :  { %4359 = vadd.xlane.f32.xlu1 %v4358_v39  ;;  %v9706_v53 = vpop.xlane.xlu0 %4038 }
 0x5dc   :  { %10309 = vst [vmem:[#allocation36_spill] sm:$0xff] %v9706_v53  ;;  %v4141_v30 = vsub.f32 %v10310_v40, %v9706_v53  ;;  %v9710_v16 = vpop.xlane.xlu1 %5168  ;;  %v4235_v26 = vmul.f32 1.442695, %v4134_v61 }
 0x5dd   :  { %10311 = vst [vmem:[#allocation49_spill] sm:$0xff] %v9710_v16  ;;  %v7217_v6 = vpop.eup %7216 }
 0x5de   :  { %v4249_v47 = vmul.f32 1.442695, %v4141_v30  ;;  %v4409_v37 = vsel %vm126_vm1, %v7217_v6, 0.0  ;;  %v7219_v0 = vpop.eup %7218 }
 0x5df   :  { %4365 = vadd.xlane.f32.xlu1 %v4364_v24  ;;  %4410 = vadd.xlane.f32.xlu0 %v4409_v37  ;;  %v9716_v39 = vpop.xlane.xlu0 %5201  ;;  %v7221_v53 = vpop.eup %7220  ;;  %v4370_v16 = vsel %vm126_vm1, %v7219_v0, 0.0 }
 0x5e0   :  { %10313 = vst [vmem:[#allocation46_spill] sm:$0xff] %v9716_v39  ;;  %7228 = vpow2.f32 %v4249_v47  ;;  %v9718_v40 = vpop.xlane.xlu1 %4023  ;;  %v4376_v47 = vsel %vm126_vm1, %v7221_v53, 0.0 }
 0x5e1   :  { %7230 = vpow2.f32 %v4231_v41  ;;  %v4136_v32 = vsub.f32 %v10314_v12, %v9718_v40 }
 0x5e2   :  { %7232 = vpow2.f32 %v4235_v26 }
 0x5e3   :  { %4371 = vadd.xlane.f32.xlu1 %v4370_v16  ;;  %v9723_v30 = vpop.xlane.xlu0 %4044  ;;  %v4239_v37 = vmul.f32 1.442695, %v4136_v32 }
 0x5e4   :  { %10315 = vst [vmem:[#allocation29_spill] sm:$0xff] %v9723_v30  ;;  %v4143_v6 = vsub.f32 %v9299_v28, %v9723_v30  ;;  %v9727_v24 = vpop.xlane.xlu1 %5174  ;;  %v10317_v28 = vld [vmem:[#allocation34_spill] sm:$0xff] }
 0x5e5   :  { %v7223_v38 = vpop.eup %7222 }
 0x5e6   :  { %v4253_v41 = vmul.f32 1.442695, %v4143_v6  ;;  %v4415_v61 = vsel %vm126_vm1, %v7223_v38, 0.0  ;;  %v7225_v39 = vpop.eup %7224 }
 0x5e7   :  { %4377 = vadd.xlane.f32.xlu1 %v4376_v47  ;;  %4416 = vadd.xlane.f32.xlu0 %v4415_v61  ;;  %v9731_v0 = vpop.xlane.xlu0 %5207  ;;  %v7227_v30 = vpop.eup %7226  ;;  %v4382_v53 = vsel %vm126_vm1, %v7225_v39, 0.0 }
 0x5e8   :  { %10316 = vst [vmem:[#allocation74_spill] sm:$0xff] %v9731_v0  ;;  %7234 = vpow2.f32 %v4253_v41  ;;  %v9733_v16 = vpop.xlane.xlu1 %4029  ;;  %v4388_v61 = vsel %vm126_vm1, %v7227_v30, 0.0 }
 0x5e9   :  { %v4138_v12 = vsub.f32 %v10317_v28, %v9733_v16  ;;  %7236 = vpow2.f32 %v4239_v37 }
 0x5eb   :  { %v4243_v26 = vmul.f32 1.442695, %v4138_v12  ;;  %4383 = vadd.xlane.f32.xlu1 %v4382_v53  ;;  %v9738_v32 = vpop.xlane.xlu0 %4050  ;;  %v10320_v12 = vld [vmem:[#allocation39_spill] sm:$0xff] }
 0x5ec   :  { %10318 = vst [vmem:[#allocation34_spill] sm:$0xff] %v9738_v32  ;;  %v4145_v6 = vsub.f32 %v9327_v36, %v9738_v32  ;;  %v9742_v38 = vpop.xlane.xlu1 %5180 }
 0x5ed   :  { %v7229_v47 = vpop.eup %7228  ;;  %7238 = vpow2.f32 %v4243_v26 }
 0x5ee   :  { %v4257_v41 = vmul.f32 1.442695, %v4145_v6  ;;  %v4421_v28 = vsel %vm126_vm1, %v7229_v47, 0.0  ;;  %v7231_v0 = vpop.eup %7230 }
 0x5ef   :  { %4389 = vadd.xlane.f32.xlu1 %v4388_v61  ;;  %4422 = vadd.xlane.f32.xlu0 %v4421_v28  ;;  %v9746_v39 = vpop.xlane.xlu0 %5213  ;;  %v4394_v53 = vsel %vm126_vm1, %v7231_v0, 0.0  ;;  %v7233_v32 = vpop.eup %7232 }
 0x5f0   :  { %10319 = vst [vmem:[#allocation75_spill] sm:$0xff] %v9746_v39  ;;  %7240 = vpow2.f32 %v4257_v41  ;;  %v9748_v37 = vpop.xlane.xlu1 %4035  ;;  %v4400_v28 = vsel %vm126_vm1, %v7233_v32, 0.0 }
 0x5f1   :  { %v4140_v36 = vsub.f32 %v10320_v12, %v9748_v37 }
 0x5f3   :  { %v4247_v26 = vmul.f32 1.442695, %v4140_v36  ;;  %4395 = vadd.xlane.f32.xlu1 %v4394_v53  ;;  %v9753_v6 = vpop.xlane.xlu0 %4056  ;;  %v10325_v53 = vld [vmem:[#allocation45_spill] sm:$0xff] }
 0x5f4   :  { %10321 = vst [vmem:[#allocation39_spill] sm:$0xff] %v9753_v6  ;;  %v4147_v30 = vsub.f32 %v9355_v4, %v9753_v6  ;;  %v9757_v47 = vpop.xlane.xlu1 %5186 }
 0x5f5   :  { %10322 = vst [vmem:[#allocation76_spill] sm:$0xff] %v9757_v47  ;;  %v7235_v61 = vpop.eup %7234  ;;  %7242 = vpow2.f32 %v4247_v26 }
 0x5f6   :  { %v4261_v41 = vmul.f32 1.442695, %v4147_v30  ;;  %v4427_v39 = vsel %vm126_vm1, %v7235_v61, 0.0  ;;  %v7237_v12 = vpop.eup %7236 }
 0x5f7   :  { %4401 = vadd.xlane.f32.xlu1 %v4400_v28  ;;  %4428 = vadd.xlane.f32.xlu0 %v4427_v39  ;;  %v9761_v0 = vpop.xlane.xlu0 %5219  ;;  %v4406_v6 = vsel %vm126_vm1, %v7237_v12, 0.0 }
 0x5f8   :  { %10323 = vst [vmem:[#allocation77_spill] sm:$0xff] %v9761_v0  ;;  %7244 = vpow2.f32 %v4261_v41  ;;  %v9763_v36 = vpop.xlane.xlu1 %4041 }
 0x5f9   :  { %10324 = vst [vmem:[#allocation78_spill] sm:$0xff] %v9763_v36  ;;  %v4142_v4 = vsub.f32 %v10325_v53, %v9763_v36 }
 0x5fa   :  { %v7239_v47 = vpop.eup %7238 }
 0x5fb   :  { %v4251_v26 = vmul.f32 1.442695, %v4142_v4  ;;  %4407 = vadd.xlane.f32.xlu1 %v4406_v6  ;;  %v9768_v30 = vpop.xlane.xlu0 %4062  ;;  %v4412_v28 = vsel %vm126_vm1, %v7239_v47, 0.0 }
 0x5fc   :  { %10326 = vst [vmem:[#allocation45_spill] sm:$0xff] %v9768_v30  ;;  %v4149_v32 = vsub.f32 %v9383_v57, %v9768_v30  ;;  %v9772_v61 = vpop.xlane.xlu1 %5192 }
 0x5fd   :  { %10327 = vst [vmem:[#allocation79_spill] sm:$0xff] %v9772_v61  ;;  %v7241_v39 = vpop.eup %7240  ;;  %7246 = vpow2.f32 %v4251_v26 }
 0x5fe   :  { %v4265_v41 = vmul.f32 1.442695, %v4149_v32  ;;  %v4433_v0 = vsel %vm126_vm1, %v7241_v39, 0.0 }
 0x5ff   :  { %4413 = vadd.xlane.f32.xlu1 %v4412_v28  ;;  %4434 = vadd.xlane.f32.xlu0 %v4433_v0  ;;  %v9776_v12 = vpop.xlane.xlu0 %4068  ;;  %v10331_v0 = vld [vmem:[#allocation60_spill] sm:$0xff] }
 0x600   :  { %10328 = vst [vmem:[#allocation80_spill] sm:$0xff] %v9776_v12  ;;  %7248 = vpow2.f32 %v4265_v41  ;;  %v4151_v6 = vsub.f32 %v9398_v35, %v9776_v12  ;;  %v9780_v53 = vpop.xlane.xlu1 %4047 }
 0x601   :  { %10329 = vst [vmem:[#allocation81_spill] sm:$0xff] %v9780_v53  ;;  %v4144_v57 = vsub.f32 %v9280_v44, %v9780_v53 }
 0x602   :  { %v7243_v4 = vpop.eup %7242  ;;  %v4269_v26 = vmul.f32 1.442695, %v4151_v6 }
 0x603   :  { %v4255_v32 = vmul.f32 1.442695, %v4144_v57  ;;  %v9784_v30 = vpop.xlane.xlu0 %4074  ;;  %v4418_v47 = vsel %vm126_vm1, %v7243_v4, 0.0 }
 0x604   :  { %10330 = vst [vmem:[#allocation82_spill] sm:$0xff] %v9784_v30  ;;  %7250 = vpow2.f32 %v4269_v26  ;;  %v4153_v39 = vsub.f32 %v10331_v0, %v9784_v30  ;;  %4419 = vadd.xlane.f32.xlu1 %v4418_v47  ;;  %v9789_v41 = vpop.xlane.xlu1 %5198 }
 0x605   :  { %10332 = vst [vmem:[#allocation60_spill] sm:$0xff] %v9789_v41  ;;  %v7245_v35 = vpop.eup %7244  ;;  %7252 = vpow2.f32 %v4255_v32 }
 0x606   :  { %v4273_v28 = vmul.f32 1.442695, %v4153_v39  ;;  %v4439_v12 = vsel %vm126_vm1, %v7245_v35, 0.0 }
 0x607   :  { %4440 = vadd.xlane.f32.xlu0 %v4439_v12  ;;  %v9792_v44 = vpop.xlane.xlu0 %4080 }
 0x608   :  { %10333 = vst [vmem:[#allocation83_spill] sm:$0xff] %v9792_v44  ;;  %7254 = vpow2.f32 %v4273_v28  ;;  %v4155_v6 = vsub.f32 %v9428_v5, %v9792_v44  ;;  %v9796_v57 = vpop.xlane.xlu1 %4053 }
 0x609   :  { %10334 = vst [vmem:[#allocation84_spill] sm:$0xff] %v9796_v57  ;;  %v4146_v4 = vsub.f32 %v9305_v18, %v9796_v57  ;;  %v10345_v57 = vld [vmem:[#allocation20_spill] sm:$0xff] }
 0x60a   :  { %v7247_v26 = vpop.eup %7246  ;;  %v4277_v47 = vmul.f32 1.442695, %v4155_v6  ;;  %vm4988_vm14 = vcmp.eq.s32.totalorder %v8702_v51, %v10345_v57 }
 0x60b   :  { %v4259_v30 = vmul.f32 1.442695, %v4146_v4  ;;  %v9800_v41 = vpop.xlane.xlu0 %4086  ;;  %v4424_v32 = vsel %vm126_vm1, %v7247_v26, 0.0 }
 0x60c   :  { %10335 = vst [vmem:[#allocation85_spill] sm:$0xff] %v9800_v41  ;;  %7256 = vpow2.f32 %v4277_v47  ;;  %v4157_v12 = vsub.f32 %v9447_v7, %v9800_v41  ;;  %4425 = vadd.xlane.f32.xlu1 %v4424_v32  ;;  %v9805_v39 = vpop.xlane.xlu1 %5204 }
 0x60d   :  { %10336 = vst [vmem:[#allocation86_spill] sm:$0xff] %v9805_v39  ;;  %v7249_v35 = vpop.eup %7248  ;;  %7258 = vpow2.f32 %v4259_v30 }
 0x60e   :  { %v4281_v28 = vmul.f32 1.442695, %v4157_v12  ;;  %v4445_v44 = vsel %vm126_vm1, %v7249_v35, 0.0 }
 0x60f   :  { %4446 = vadd.xlane.f32.xlu0 %v4445_v44  ;;  %v9808_v18 = vpop.xlane.xlu0 %4092 }
 0x610   :  { %10337 = vst [vmem:[#allocation87_spill] sm:$0xff] %v9808_v18  ;;  %7260 = vpow2.f32 %v4281_v28  ;;  %v4159_v6 = vsub.f32 %v9463_v25, %v9808_v18  ;;  %v9812_v4 = vpop.xlane.xlu1 %4059 }
 0x611   :  { %10338 = vst [vmem:[#allocation88_spill] sm:$0xff] %v9812_v4  ;;  %v7251_v26 = vpop.eup %7250  ;;  %v4148_v47 = vsub.f32 %v9333_v54, %v9812_v4 }
 0x612   :  { %v7253_v32 = vpop.eup %7252  ;;  %v4285_v41 = vmul.f32 1.442695, %v4159_v6  ;;  %v4451_v30 = vsel %vm126_vm1, %v7251_v26, 0.0 }
 0x613   :  { %v4263_v12 = vmul.f32 1.442695, %v4148_v47  ;;  %4452 = vadd.xlane.f32.xlu0 %v4451_v30  ;;  %v9817_v35 = vpop.xlane.xlu0 %4290  ;;  %v4430_v44 = vsel %vm126_vm1, %v7253_v32, 0.0 }
 0x614   :  { %7262 = vpow2.f32 %v4285_v41  ;;  %4431 = vadd.xlane.f32.xlu1 %v4430_v44  ;;  %v9820_v28 = vpop.xlane.xlu1 %5210 }
 0x615   :  { %10339 = vst [vmem:[#allocation89_spill] sm:$0xff] %v9820_v28  ;;  %v7255_v18 = vpop.eup %7254  ;;  %7264 = vpow2.f32 %v4263_v12 }
 0x616   :  { %v4457_v39 = vsel %vm126_vm1, %v7255_v18, 0.0 }
 0x617   :  { %4458 = vadd.xlane.f32.xlu0 %v4457_v39  ;;  %v9823_v54 = vpop.xlane.xlu0 %4296 }
 0x618   :  { %v9825_v6 = vpop.xlane.xlu1 %4065 }
 0x619   :  { %10340 = vst [vmem:[#allocation90_spill] sm:$0xff] %v9825_v6  ;;  %v7257_v26 = vpop.eup %7256  ;;  %v4150_v47 = vsub.f32 %v9361_v1, %v9825_v6 }
 0x61a   :  { %v7259_v30 = vpop.eup %7258  ;;  %v4463_v32 = vsel %vm126_vm1, %v7257_v26, 0.0 }
 0x61b   :  { %v4267_v41 = vmul.f32 1.442695, %v4150_v47  ;;  %4464 = vadd.xlane.f32.xlu0 %v4463_v32  ;;  %v9830_v44 = vpop.xlane.xlu0 %4302  ;;  %v4436_v12 = vsel %vm126_vm1, %v7259_v30, 0.0  ;;  %v10343_v32 = vld [vmem:[#allocation18_spill] sm:$0xff] }
 0x61c   :  { %4437 = vadd.xlane.f32.xlu1 %v4436_v12  ;;  %v9833_v18 = vpop.xlane.xlu1 %5216  ;;  %vm4986_vm13 = vcmp.eq.s32.totalorder %v8702_v51, %v10343_v32 }
 0x61d   :  { %10341 = vst [vmem:[#allocation91_spill] sm:$0xff] %v9833_v18  ;;  %v7261_v39 = vpop.eup %7260  ;;  %7266 = vpow2.f32 %v4267_v41 }
 0x61e   :  { %v4469_v28 = vsel %vm126_vm1, %v7261_v39, 0.0  ;;  %v5050_v39 = vsel %vm4986_vm13, %v9513_v15, 0.0 }
 0x61f   :  { %4470 = vadd.xlane.f32.xlu0 %v4469_v28  ;;  %v9836_v4 = vpop.xlane.xlu0 %4308 }
 0x620   :  { %v9838_v1 = vpop.xlane.xlu1 %4071 }
 0x621   :  { %10342 = vst [vmem:[#allocation92_spill] sm:$0xff] %v9838_v1  ;;  %v7263_v6 = vpop.eup %7262  ;;  %v4152_v26 = vsub.f32 %v9513_v15, %v9838_v1  ;;  %v5224_v1 = vsel %vm126_vm1, %v5050_v39, 0.0 }
 0x622   :  { %v7265_v47 = vpop.eup %7264  ;;  %v4475_v30 = vsel %vm126_vm1, %v7263_v6, 0.0  ;;  %v5052_v6 = vsel %vm4988_vm14, %v9541_v9, 0.0 }
 0x623   :  { %v4271_v12 = vmul.f32 1.442695, %v4152_v26  ;;  %4476 = vadd.xlane.f32.xlu0 %v4475_v30  ;;  %v9845_v41 = vpop.xlane.xlu0 %4314  ;;  %v4442_v28 = vsel %vm126_vm1, %v7265_v47, 0.0  ;;  %v10347_v30 = vld [vmem:[#allocation22_spill] sm:$0xff] }
 0x624   :  { %4443 = vadd.xlane.f32.xlu1 %v4442_v28  ;;  %v9849_v18 = vpop.xlane.xlu1 %5222  ;;  %vm4990_vm15 = vcmp.eq.s32.totalorder %v8702_v51, %v10347_v30 }
 0x625   :  { %10344 = vst [vmem:[#allocation18_spill] sm:$0xff] %v9849_v18  ;;  %7268 = vpow2.f32 %v4271_v12  ;;  %v5230_v12 = vsel %vm126_vm1, %v5052_v6, 0.0 }
 0x627   :  { %5225 = vadd.xlane.f32.xlu0 %v5224_v1  ;;  %v9857_v32 = vpop.xlane.xlu0 %4320  ;;  %v5054_v1 = vsel %vm4990_vm15, %v9556_v20, 0.0 }
 0x628   :  { %v9855_v26 = vpop.xlane.xlu1 %4077  ;;  %v5236_v30 = vsel %vm126_vm1, %v5054_v1, 0.0 }
 0x629   :  { %10346 = vst [vmem:[#allocation20_spill] sm:$0xff] %v9855_v26  ;;  %v4154_v47 = vsub.f32 %v9541_v9, %v9855_v26  ;;  %v10349_v9 = vld [vmem:[#allocation27_spill] sm:$0xff] }
 0x62a   :  { %v7267_v15 = vpop.eup %7266  ;;  %vm4992_vm0 = vcmp.eq.s32.totalorder %v8702_v51, %v10349_v9 }
 0x62b   :  { %v4275_v28 = vmul.f32 1.442695, %v4154_v47  ;;  %5231 = vadd.xlane.f32.xlu0 %v5230_v12  ;;  %v4448_v57 = vsel %vm126_vm1, %v7267_v15, 0.0  ;;  %v4327_v26 = vpop.xlane.xlu0 %4326  ;;  %v5056_v47 = vsel %vm4992_vm0, %v9571_v59, 0.0 }
 0x62c   :  { %4449 = vadd.xlane.f32.xlu1 %v4448_v57  ;;  %v9866_v39 = vpop.xlane.xlu1 %4083  ;;  %v10351_v57 = vld [vmem:[#allocation31_spill] sm:$0xff] }
 0x62d   :  { %10348 = vst [vmem:[#allocation22_spill] sm:$0xff] %v9866_v39  ;;  %7270 = vpow2.f32 %v4275_v28  ;;  %v4156_v18 = vsub.f32 %v9556_v20, %v9866_v39  ;;  %vm4994_vm2 = vcmp.eq.s32.totalorder %v8702_v51, %v10351_v57  ;;  %v5242_v20 = vsel %vm126_vm1, %v5056_v47, 0.0 }
 0x62e   :  { %v5058_v9 = vsel %vm4994_vm2, %v9586_v10, 0.0 }
 0x62f   :  { %v4279_v6 = vmul.f32 1.442695, %v4156_v18  ;;  %5237 = vadd.xlane.f32.xlu0 %v5236_v30 }
 0x630   :  { %v9874_v15 = vpop.xlane.xlu1 %4089 }
 0x631   :  { %10350 = vst [vmem:[#allocation27_spill] sm:$0xff] %v9874_v15  ;;  %7272 = vpow2.f32 %v4279_v6  ;;  %v4158_v12 = vsub.f32 %v9571_v59, %v9874_v15  ;;  %v4333_v59 = vpop.xlane.xlu0 %4332 }
 0x632   :  { %v7269_v28 = vpop.eup %7268  ;;  %7274 = vlog2.f32 %v9817_v35  ;;  %v5248_v35 = vsel %vm126_vm1, %v5058_v9, 0.0 }
 0x633   :  { %v4283_v1 = vmul.f32 1.442695, %v4158_v12  ;;  %5243 = vadd.xlane.f32.xlu0 %v5242_v20  ;;  %v4454_v18 = vsel %vm126_vm1, %v7269_v28, 0.0  ;;  %7276 = vlog2.f32 %v9823_v54 }
 0x634   :  { %4455 = vadd.xlane.f32.xlu1 %v4454_v18  ;;  %v9885_v30 = vpop.xlane.xlu1 %4095 }
 0x635   :  { %10352 = vst [vmem:[#allocation31_spill] sm:$0xff] %v9885_v30  ;;  %7278 = vpow2.f32 %v4283_v1  ;;  %v4160_v6 = vsub.f32 %v9586_v10, %v9885_v30  ;;  %v9891_v57 = vpop.xlane.xlu0 %4338 }
 0x636   :  { %7280 = vlog2.f32 %v9830_v44 }
 0x637   :  { %v4287_v47 = vmul.f32 1.442695, %v4160_v6  ;;  %5249 = vadd.xlane.f32.xlu0 %v5248_v35 }
 0x638   :  { %v4294_v12 = vpop.xlane.xlu1 %4293 }
 0x639   :  { %7282 = vpow2.f32 %v4287_v47  ;;  %v9897_v6 = vpop.xlane.xlu0 %4344 }
 0x63a   :  { %v7271_v28 = vpop.eup %7270  ;;  %7284 = vlog2.f32 %v4294_v12 }
 0x63b   :  { %v4460_v54 = vsel %vm126_vm1, %v7271_v28, 0.0  ;;  %7286 = vlog2.f32 %v9836_v4 }
 0x63c   :  { %4461 = vadd.xlane.f32.xlu1 %v4460_v54  ;;  %v4300_v20 = vpop.xlane.xlu1 %4299 }
 0x63d   :  { %7288 = vlog2.f32 %v4300_v20  ;;  %v9904_v15 = vpop.xlane.xlu0 %4350 }
 0x63e   :  { %v7273_v10 = vpop.eup %7272  ;;  %7290 = vlog2.f32 %v9845_v41  ;;  %v10354_v41 = vld [vmem:[#allocation37_spill] sm:$0xff] }
 0x63f   :  { %v7275_v1 = vpop.eup %7274  ;;  %v4466_v18 = vsel %vm126_vm1, %v7273_v10, 0.0  ;;  %v10353_v10 = vld [vmem:[#allocation21_spill] sm:$0xff] }
 0x640   :  { %4467 = vadd.xlane.f32.xlu1 %v4466_v18  ;;  %v4306_v44 = vpop.xlane.xlu1 %4305  ;;  %v7277_v9 = vpop.eup %7276  ;;  %v4482_v47 = vmul.f32 0.6931472, %v7275_v1  ;;  %vm4987_vm3 = vcmp.eq.s32.totalorder %v8702_v51, %v10353_v10  ;;  %v10356_v10 = vld [vmem:[#allocation25_spill] sm:$0xff] }
 0x641   :  { %7292 = vlog2.f32 %v4306_v44  ;;  %v4486_v28 = vmul.f32 0.6931472, %v7277_v9  ;;  %v5051_v9 = vsel %vm4987_vm3, %v10331_v0, 0.0  ;;  %vm4989_vm4 = vcmp.eq.s32.totalorder %v8702_v51, %v10356_v10 }
 0x642   :  { %v7279_v35 = vpop.eup %7278  ;;  %7294 = vlog2.f32 %v9857_v32  ;;  %v4609_v18 = vadd.f32 %v4482_v47, %v10354_v41  ;;  %v5227_v41 = vsel %vm126_vm1, %v5051_v9, 0.0 }
 0x643   :  { %v4472_v12 = vsel %vm126_vm1, %v7279_v35, 0.0  ;;  %v7281_v4 = vpop.eup %7280  ;;  %v10355_v35 = vld [vmem:[#allocation41_spill] sm:$0xff] }
 0x644   :  { %4473 = vadd.xlane.f32.xlu1 %v4472_v12  ;;  %v4312_v54 = vpop.xlane.xlu1 %4311  ;;  %v4490_v44 = vmul.f32 0.6931472, %v7281_v4  ;;  %v4611_v32 = vadd.f32 %v4486_v28, %v10355_v35  ;;  %v10358_v28 = vld [vmem:[#allocation43_spill] sm:$0xff] }
 0x645   :  { %7296 = vlog2.f32 %v4312_v54 }
 0x646   :  { %v7283_v20 = vpop.eup %7282  ;;  %7298 = vlog2.f32 %v4327_v26  ;;  %v10357_v26 = vld [vmem:[#allocation40_spill] sm:$0xff]  ;;  %v4613_v0 = vadd.f32 %v4490_v44, %v9255_v17 }
 0x647   :  { %v7285_v30 = vpop.eup %7284  ;;  %v4478_v1 = vsel %vm126_vm1, %v7283_v20, 0.0  ;;  %v5251_v47 = vsub.f32 %v4609_v18, %v10357_v26  ;;  %v10360_v18 = vld [vmem:[#allocation28_spill] sm:$0xff] }
 0x648   :  { %v4484_v12 = vmul.f32 0.6931472, %v7285_v30  ;;  %4479 = vadd.xlane.f32.xlu1 %v4478_v1  ;;  %v4318_v54 = vpop.xlane.xlu1 %4317  ;;  %v7287_v39 = vpop.eup %7286  ;;  %v5053_v30 = vsel %vm4989_vm4, %v9428_v5, 0.0  ;;  %v5253_v1 = vsub.f32 %v4611_v32, %v10358_v28  ;;  %vm4991_vm6 = vcmp.eq.s32.totalorder %v8702_v51, %v10360_v18  ;;  %v10362_v32 = vld [vmem:[#allocation51_spill] sm:$0xff] }
 0x649   :  { %7300 = vlog2.f32 %v4318_v54  ;;  %v4494_v35 = vmul.f32 0.6931472, %v7287_v39  ;;  %v10359_v54 = vld [vmem:[#allocation35_spill] sm:$0xff]  ;;  %v5576_v39 = vsel %vm5575_vm5, %v5251_v47, 0.0  ;;  %v5233_v44 = vsel %vm126_vm1, %v5053_v30, 0.0 }
 0x64a   :  { %v7289_v53 = vpop.eup %7288  ;;  %v4610_v4 = vadd.f32 %v4484_v12, %v9195_v45  ;;  %7302 = vlog2.f32 %v4333_v59  ;;  %v10361_v45 = vld [vmem:[#allocation32_spill] sm:$0xff]  ;;  %v5055_v9 = vsel %vm4991_vm6, %v9447_v7, 0.0  ;;  %v5255_v12 = vsub.f32 %v4613_v0, %v10362_v32  ;;  %v10366_v32 = vld [vmem:[#allocation50_spill] sm:$0xff] }
 0x64b   :  { %v4488_v20 = vmul.f32 0.6931472, %v7289_v53  ;;  %v7291_v36 = vpop.eup %7290  ;;  %vm4993_vm7 = vcmp.eq.s32.totalorder %v8702_v51, %v10361_v45  ;;  %v9923_v53 = vpop.xlane.xlu0 %4356 }
 0x64c   :  { %v5252_v61 = vsub.f32 %v4610_v4, %v10359_v54  ;;  %5228 = vadd.xlane.f32.xlu1 %v5227_v41  ;;  %v4324_v10 = vpop.xlane.xlu1 %4323  ;;  %v10363_v4 = vld [vmem:[#allocation42_spill] sm:$0xff] }
 0x64d   :  { %v4612_v17 = vadd.f32 %v4488_v20, %v9212_v50  ;;  %7304 = vlog2.f32 %v4324_v10  ;;  %v5579_v50 = vsel %vm5575_vm5, %v5253_v1, 0.0  ;;  %v10364_v20 = vld [vmem:[#allocation47_spill] sm:$0xff]  ;;  %v4498_v10 = vmul.f32 0.6931472, %v7291_v36 }
 0x64e   :  { %v7293_v5 = vpop.eup %7292  ;;  %v5577_v59 = vsel %vm5575_vm5, %v5252_v61, 0.0  ;;  %v4615_v54 = vadd.f32 %v4494_v35, %v10364_v20  ;;  %7306 = vlog2.f32 %v9891_v57  ;;  %v5057_v1 = vsel %vm4993_vm7, %v9463_v25, 0.0  ;;  %v10367_v20 = vld [vmem:[#allocation53_spill] sm:$0xff] }
 0x64f   :  { %v5578_v26 = vadd.f32 %v5577_v59, %v5576_v39  ;;  %v5254_v41 = vsub.f32 %v4612_v17, %v10363_v4  ;;  %v4492_v28 = vmul.f32 0.6931472, %v7293_v5  ;;  %v7295_v61 = vpop.eup %7294  ;;  %v5239_v17 = vsel %vm126_vm1, %v5055_v9, 0.0  ;;  %v10365_v5 = vld [vmem:[#allocation48_spill] sm:$0xff]  ;;  %v4363_v59 = vpop.xlane.xlu0 %4362 }
 0x650   :  { %5234 = vadd.xlane.f32.xlu1 %v5233_v44  ;;  %v4330_v47 = vpop.xlane.xlu1 %4329  ;;  %v5583_v57 = vsel %vm5575_vm5, %v5255_v12, 0.0  ;;  %v4502_v4 = vmul.f32 0.6931472, %v7295_v61 }
 0x651   :  { %v5580_v18 = vadd.f32 %v5579_v50, %v5578_v26  ;;  %v5581_v30 = vsel %vm5575_vm5, %v5254_v41, 0.0  ;;  %v4614_v7 = vadd.f32 %v4492_v28, %v9259_v62  ;;  %7308 = vlog2.f32 %v4330_v47 }
 0x652   :  { %v7297_v0 = vpop.eup %7296  ;;  %v5257_v26 = vsub.f32 %v4615_v54, %v10366_v32  ;;  %v4617_v62 = vadd.f32 %v4498_v10, %v9294_v3  ;;  %7310 = vlog2.f32 %v9897_v6  ;;  %v5245_v28 = vsel %vm126_vm1, %v5057_v1, 0.0  ;;  %v10368_v10 = vld [vmem:[#allocation52_spill] sm:$0xff] }
 0x653   :  { %v7299_v36 = vpop.eup %7298  ;;  %v5582_v35 = vadd.f32 %v5581_v30, %v5580_v18  ;;  %v5256_v39 = vsub.f32 %v4614_v7, %v10365_v5  ;;  %v4496_v44 = vmul.f32 0.6931472, %v7297_v0  ;;  %v4619_v61 = vadd.f32 %v4502_v4, %v9322_v29  ;;  %v4369_v0 = vpop.xlane.xlu0 %4368  ;;  %v10370_v29 = vld [vmem:[#allocation54_spill] sm:$0xff] }
 0x654   :  { %5240 = vadd.xlane.f32.xlu1 %v5239_v17  ;;  %v4336_v9 = vpop.xlane.xlu1 %4335  ;;  %v4506_v12 = vmul.f32 0.6931472, %v7299_v36  ;;  %v5587_v6 = vsel %vm5575_vm5, %v5257_v26, 0.0  ;;  %v5259_v47 = vsub.f32 %v4617_v62, %v10368_v10  ;;  %vm52_vm1 = vcmask 0  }
 0x655   :  { %v5584_v41 = vadd.f32 %v5583_v57, %v5582_v35  ;;  %v5585_v51 = vsel %vm5575_vm5, %v5256_v39, 0.0  ;;  %v4616_v25 = vadd.f32 %v4496_v44, %v9296_v42  ;;  %7312 = vlog2.f32 %v4336_v9  ;;  %v10369_v57 = vld [vmem:[#allocation55_spill] sm:$0xff] }
 0x656   :  { %v7301_v45 = vpop.eup %7300  ;;  %7314 = vlog2.f32 %v9904_v15  ;;  %v4621_v1 = vadd.f32 %v4506_v12, %v9350_v60  ;;  %v5591_v39 = vsel %vm5575_vm5, %v5259_v47, 0.0  ;;  %v5261_v44 = vsub.f32 %v4619_v61, %v10370_v29  ;;  %v10372_v12 = vld [vmem:[#allocation57_spill] sm:$0xff] }
 0x657   :  { %v5586_v50 = vadd.f32 %v5585_v51, %v5584_v41  ;;  %v5258_v3 = vsub.f32 %v4616_v25, %v10367_v20  ;;  %v4500_v54 = vmul.f32 0.6931472, %v7301_v45  ;;  %v7303_v42 = vpop.eup %7302  ;;  %v10371_v41 = vld [vmem:[#allocation56_spill] sm:$0xff]  ;;  %v4375_v45 = vpop.xlane.xlu0 %4374 }
 0x658   :  { %5246 = vadd.xlane.f32.xlu1 %v5245_v28  ;;  %v4342_v18 = vpop.xlane.xlu1 %4341  ;;  %v4510_v32 = vmul.f32 0.6931472, %v7303_v42  ;;  %v5263_v51 = vsub.f32 %v4621_v1, %v10371_v41  ;;  %v5595_v20 = vsel %vm5575_vm5, %v5261_v44, 0.0  ;;  %v10374_v1 = vld [vmem:[#allocation58_spill] sm:$0xff] }
 0x659   :  { %v5588_v30 = vadd.f32 %v5587_v6, %v5586_v50  ;;  %v5589_v7 = vsel %vm5575_vm5, %v5258_v3, 0.0  ;;  %v4618_v17 = vadd.f32 %v4500_v54, %v9324_v19  ;;  %7316 = vlog2.f32 %v4342_v18 }
 0x65a   :  { %v7305_v15 = vpop.eup %7304  ;;  %7318 = vlog2.f32 %v9923_v53  ;;  %v4623_v53 = vadd.f32 %v4510_v32, %v9378_v33  ;;  %v5599_v18 = vsel %vm5575_vm5, %v5263_v51, 0.0 }
 0x65b   :  { %v5590_v36 = vadd.f32 %v5589_v7, %v5588_v30  ;;  %v5260_v35 = vsub.f32 %v4618_v17, %v10369_v57  ;;  %v4504_v5 = vmul.f32 0.6931472, %v7305_v15  ;;  %v7307_v62 = vpop.eup %7306  ;;  %v10373_v30 = vld [vmem:[#allocation59_spill] sm:$0xff] }
 0x65c   :  { %v4348_v26 = vpop.xlane.xlu1 %4347  ;;  %v4514_v3 = vmul.f32 0.6931472, %v7307_v62  ;;  %v5265_v33 = vsub.f32 %v4623_v53, %v10374_v1  ;;  %v10377_v53 = vld [vmem:[#allocation64_spill] sm:$0xff] }
 0x65d   :  { %v5592_v4 = vadd.f32 %v5591_v39, %v5590_v36  ;;  %v5593_v19 = vsel %vm5575_vm5, %v5260_v35, 0.0  ;;  %v4620_v9 = vadd.f32 %v4504_v5, %v9352_v14  ;;  %7320 = vlog2.f32 %v4348_v26  ;;  %v4381_v35 = vpop.xlane.xlu0 %4380  ;;  %v10375_v26 = vld [vmem:[#allocation62_spill] sm:$0xff] }
 0x65e   :  { %v7309_v60 = vpop.eup %7308  ;;  %7322 = vlog2.f32 %v4363_v59  ;;  %v4625_v59 = vadd.f32 %v4514_v3, %v9405_v11 }
 0x65f   :  { %v5594_v25 = vadd.f32 %v5593_v19, %v5592_v4  ;;  %v5262_v28 = vsub.f32 %v4620_v9, %v10372_v12  ;;  %v4508_v50 = vmul.f32 0.6931472, %v7309_v60  ;;  %v7311_v6 = vpop.eup %7310  ;;  %v5603_v19 = vsel %vm5575_vm5, %v5265_v33, 0.0  ;;  %v10376_v9 = vld [vmem:[#allocation61_spill] sm:$0xff] }
 0x660   :  { %v4354_v54 = vpop.xlane.xlu1 %4353  ;;  %v4518_v36 = vmul.f32 0.6931472, %v7311_v6  ;;  %v5267_v11 = vsub.f32 %v4625_v59, %v10376_v9 }
 0x661   :  { %v5596_v10 = vadd.f32 %v5595_v20, %v5594_v25  ;;  %v5597_v14 = vsel %vm5575_vm5, %v5262_v28, 0.0  ;;  %v4622_v47 = vadd.f32 %v4508_v50, %v9380_v22  ;;  %7324 = vlog2.f32 %v4354_v54  ;;  %v4387_v50 = vpop.xlane.xlu0 %4386 }
 0x662   :  { %v7313_v61 = vpop.eup %7312  ;;  %7326 = vlog2.f32 %v4369_v0  ;;  %v4627_v0 = vadd.f32 %v4518_v36, %v9435_v2  ;;  %v5607_v6 = vsel %vm5575_vm5, %v5267_v11, 0.0  ;;  %v10378_v2 = vld [vmem:[#allocation63_spill] sm:$0xff] }
 0x663   :  { %v5598_v42 = vadd.f32 %v5597_v14, %v5596_v10  ;;  %v5264_v7 = vsub.f32 %v4622_v47, %v10373_v30  ;;  %v4512_v17 = vmul.f32 0.6931472, %v7313_v61  ;;  %v7315_v15 = vpop.eup %7314 }
 0x664   :  { %v4360_v57 = vpop.xlane.xlu1 %4359  ;;  %v4522_v44 = vmul.f32 0.6931472, %v7315_v15 }
 0x665   :  { %v5600_v5 = vadd.f32 %v5599_v18, %v5598_v42  ;;  %v5601_v22 = vsel %vm5575_vm5, %v5264_v7, 0.0  ;;  %v4624_v39 = vadd.f32 %v4512_v17, %v9409_v8  ;;  %7328 = vlog2.f32 %v4360_v57  ;;  %v10379_v42 = vld [vmem:[#allocation65_spill] sm:$0xff]  ;;  %v10380_v17 = vld [vmem:[#allocation66_spill] sm:$0xff] }
 0x666   :  { %v7317_v29 = vpop.eup %7316  ;;  %7330 = vlog2.f32 %v4375_v45  ;;  %v4629_v28 = vadd.f32 %v4522_v44, %v9468_v58  ;;  %v5269_v45 = vsub.f32 %v4627_v0, %v10378_v2 }
 0x667   :  { %v5602_v32 = vadd.f32 %v5601_v22, %v5600_v5  ;;  %v5266_v62 = vsub.f32 %v4624_v39, %v10375_v26  ;;  %v4516_v4 = vmul.f32 0.6931472, %v7317_v29  ;;  %v7319_v41 = vpop.eup %7318  ;;  %v4393_v5 = vpop.xlane.xlu0 %4392 }
 0x668   :  { %v4366_v60 = vpop.xlane.xlu1 %4365  ;;  %v4526_v10 = vmul.f32 0.6931472, %v7319_v41  ;;  %v5271_v30 = vsub.f32 %v4629_v28, %v10379_v42  ;;  %v5611_v33 = vsel %vm5575_vm5, %v5269_v45, 0.0  ;;  %v10386_v42 = vld [vmem:[#allocation71_spill] sm:$0xff] }
 0x669   :  { %v5604_v51 = vadd.f32 %v5603_v19, %v5602_v32  ;;  %v5605_v25 = vsel %vm5575_vm5, %v5266_v62, 0.0  ;;  %v4626_v8 = vadd.f32 %v4516_v4, %v9439_v63  ;;  %7332 = vlog2.f32 %v4366_v60  ;;  %v10381_v4 = vld [vmem:[#allocation67_spill] sm:$0xff] }
 0x66a   :  { %v7321_v12 = vpop.eup %7320  ;;  %7334 = vlog2.f32 %v4381_v35  ;;  %v4631_v59 = vadd.f32 %v4526_v10, %v9489_v23  ;;  %v5615_v44 = vsel %vm5575_vm5, %v5271_v30, 0.0 }
 0x66b   :  { %v5606_v20 = vadd.f32 %v5605_v25, %v5604_v51  ;;  %v5268_v3 = vsub.f32 %v4626_v8, %v10377_v53  ;;  %v4520_v54 = vmul.f32 0.6931472, %v7321_v12  ;;  %v7323_v47 = vpop.eup %7322  ;;  %v4399_v25 = vpop.xlane.xlu0 %4398  ;;  %v10382_v12 = vld [vmem:[#allocation69_spill] sm:$0xff]  ;;  %v10384_v53 = vld [vmem:[#allocation70_spill] sm:$0xff] }
 0x66c   :  { %v4372_v14 = vpop.xlane.xlu1 %4371  ;;  %v4530_v36 = vmul.f32 0.6931472, %v7323_v47  ;;  %v5273_v23 = vsub.f32 %v4631_v59, %v9500_v31 }
 0x66d   :  { %v5608_v61 = vadd.f32 %v5607_v6, %v5606_v20  ;;  %v5609_v63 = vsel %vm5575_vm5, %v5268_v3, 0.0  ;;  %v4628_v18 = vadd.f32 %v4520_v54, %v9472_v21  ;;  %7336 = vlog2.f32 %v4372_v14 }
 0x66e   :  { %v7325_v58 = vpop.eup %7324  ;;  %7338 = vlog2.f32 %v4387_v50  ;;  %v4633_v19 = vadd.f32 %v4530_v36, %v10381_v4  ;;  %v5619_v31 = vsel %vm5575_vm5, %v5273_v23, 0.0  ;;  %v10383_v50 = vld [vmem:[#allocation68_spill] sm:$0xff] }
 0x66f   :  { %v5610_v7 = vadd.f32 %v5609_v63, %v5608_v61  ;;  %v5270_v15 = vsub.f32 %v4628_v18, %v10380_v17  ;;  %v4524_v1 = vmul.f32 0.6931472, %v7325_v58  ;;  %v7327_v35 = vpop.eup %7326  ;;  %v10385_v61 = vld [vmem:[#allocation72_spill] sm:$0xff] }
 0x670   :  { %v4378_v57 = vpop.xlane.xlu1 %4377  ;;  %v4534_v9 = vmul.f32 0.6931472, %v7327_v35  ;;  %v5275_v20 = vsub.f32 %v4633_v19, %v10383_v50  ;;  %v4405_v35 = vpop.xlane.xlu0 %4404 }
 0x671   :  { %v5612_v22 = vadd.f32 %v5611_v33, %v5610_v7  ;;  %v5613_v21 = vsel %vm5575_vm5, %v5270_v15, 0.0  ;;  %v4630_v39 = vadd.f32 %v4524_v1, %v9491_v49  ;;  %7340 = vlog2.f32 %v4378_v57  ;;  %v10387_v7 = vld [vmem:[#allocation12_spill] sm:$0xff] }
 0x672   :  { %v7329_v29 = vpop.eup %7328  ;;  %7342 = vlog2.f32 %v4393_v5  ;;  %v4635_v3 = vadd.f32 %v4534_v9, %v10384_v53  ;;  %v5623_v58 = vsel %vm5575_vm5, %v5275_v20, 0.0 }
 0x673   :  { %v5614_v32 = vadd.f32 %v5613_v21, %v5612_v22  ;;  %v5272_v26 = vsub.f32 %v4630_v39, %v9503_v48  ;;  %v4528_v62 = vmul.f32 0.6931472, %v7329_v29  ;;  %v7331_v0 = vpop.eup %7330  ;;  %v10388_v22 = vld [vmem:[#allocation14_spill] sm:$0xff] }
 0x674   :  { %v4384_v11 = vpop.xlane.xlu1 %4383  ;;  %v4538_v54 = vmul.f32 0.6931472, %v7331_v0  ;;  %v5277_v30 = vsub.f32 %v4635_v3, %v10386_v42 }
 0x675   :  { %v5616_v60 = vadd.f32 %v5615_v44, %v5614_v32  ;;  %v5617_v41 = vsel %vm5575_vm5, %v5272_v26, 0.0  ;;  %v4632_v49 = vadd.f32 %v4528_v62, %v9515_v27  ;;  %7344 = vlog2.f32 %v4384_v11  ;;  %v10389_v44 = vld [vmem:[#allocation5_spill] sm:$0xff]  ;;  %v10390_v26 = vld [vmem:[#allocation16_spill] sm:$0xff] }
 0x676   :  { %v7333_v51 = vpop.eup %7332  ;;  %v4637_v17 = vadd.f32 %v4538_v54, %v10387_v7  ;;  %v5627_v29 = vsel %vm5575_vm5, %v5277_v30, 0.0 }
 0x677   :  { %v5618_v8 = vadd.f32 %v5617_v41, %v5616_v60  ;;  %v5274_v48 = vsub.f32 %v4632_v49, %v10382_v12  ;;  %v4532_v28 = vmul.f32 0.6931472, %v7333_v51  ;;  %v7335_v2 = vpop.eup %7334  ;;  %v10391_v41 = vld [vmem:[#allocation7_spill] sm:$0xff] }
 0x678   :  { %v4390_v6 = vpop.xlane.xlu1 %4389  ;;  %v4542_v15 = vmul.f32 0.6931472, %v7335_v2  ;;  %v5279_v32 = vsub.f32 %v4637_v17, %v10389_v44 }
 0x679   :  { %v5620_v45 = vadd.f32 %v5619_v31, %v5618_v8  ;;  %v5621_v10 = vsel %vm5575_vm5, %v5274_v48, 0.0  ;;  %v4634_v27 = vadd.f32 %v4532_v28, %v9545_v43  ;;  %7346 = vlog2.f32 %v4390_v6  ;;  %v10392_v8 = vld [vmem:[#allocation6_spill] sm:$0xff]  ;;  %v10393_v48 = vld [vmem:[#allocation8_spill] sm:$0xff]  ;;  %v4411_v6 = vpop.xlane.xlu0 %4410 }
 0x67a   :  { %v7337_v14 = vpop.eup %7336  ;;  %7348 = vlog2.f32 %v4399_v25  ;;  %v4639_v62 = vadd.f32 %v4542_v15, %v10390_v26  ;;  %v5631_v25 = vsel %vm5575_vm5, %v5279_v32, 0.0  ;;  %v10400_v26 = vld [vmem:[#allocation38_spill] sm:$0xff] }
 0x67b   :  { %v5622_v47 = vadd.f32 %v5621_v10, %v5620_v45  ;;  %v5276_v63 = vsub.f32 %v4634_v27, %v10385_v61  ;;  %v4536_v18 = vmul.f32 0.6931472, %v7337_v14  ;;  %v7339_v33 = vpop.eup %7338  ;;  %v10394_v45 = vld [vmem:[#allocation9_spill] sm:$0xff] }
 0x67c   :  { %v4396_v1 = vpop.xlane.xlu1 %4395  ;;  %v4546_v23 = vmul.f32 0.6931472, %v7339_v33  ;;  %v5281_v12 = vsub.f32 %v4639_v62, %v10392_v8 }
 0x67d   :  { %v5624_v59 = vadd.f32 %v5623_v58, %v5622_v47  ;;  %v5625_v36 = vsel %vm5575_vm5, %v5276_v63, 0.0  ;;  %v4636_v43 = vadd.f32 %v4536_v18, %v9575_v55  ;;  %7350 = vlog2.f32 %v4396_v1  ;;  %v10395_v47 = vld [vmem:[#allocation33_spill] sm:$0xff]  ;;  %v10396_v63 = vld [vmem:[#allocation24_spill] sm:$0xff]  ;;  %v10397_v1 = vld [vmem:[#allocation11_spill] sm:$0xff]  ;;  %v4417_v44 = vpop.xlane.xlu0 %4416 }
 0x67e   :  { %v7341_v57 = vpop.eup %7340  ;;  %v4641_v28 = vadd.f32 %v4546_v23, %v10393_v48  ;;  %v5635_v14 = vsel %vm5575_vm5, %v5281_v12, 0.0  ;;  %v10403_v48 = vld [vmem:[#allocation13_spill] sm:$0xff] }
 0x67f   :  { %v5626_v5 = vadd.f32 %v5625_v36, %v5624_v59  ;;  %v5278_v21 = vsub.f32 %v4636_v43, %v10388_v22  ;;  %v4540_v39 = vmul.f32 0.6931472, %v7341_v57  ;;  %v7343_v19 = vpop.eup %7342  ;;  %v10398_v43 = vld [vmem:[#allocation73_spill] sm:$0xff] }
 0x680   :  { %v4402_v4 = vpop.xlane.xlu1 %4401  ;;  %v4550_v31 = vmul.f32 0.6931472, %v7343_v19  ;;  %v5283_v61 = vsub.f32 %v4641_v28, %v10395_v47 }
 0x681   :  { %v5628_v9 = vadd.f32 %v5627_v29, %v5626_v5  ;;  %v5629_v11 = vsel %vm5575_vm5, %v5278_v21, 0.0  ;;  %v4638_v55 = vadd.f32 %v4540_v39, %v9599_v56  ;;  %7352 = vlog2.f32 %v4402_v4 }
 0x682   :  { %v7345_v0 = vpop.eup %7344  ;;  %7354 = vlog2.f32 %v4405_v35  ;;  %v4643_v18 = vadd.f32 %v4550_v31, %v10396_v63  ;;  %v5639_v36 = vsel %vm5575_vm5, %v5283_v61, 0.0  ;;  %v4423_v31 = vpop.xlane.xlu0 %4422  ;;  %v10405_v63 = vld [vmem:[#allocation17_spill] sm:$0xff] }
 0x683   :  { %v5630_v60 = vadd.f32 %v5629_v11, %v5628_v9  ;;  %v5280_v49 = vsub.f32 %v4638_v55, %v10391_v41  ;;  %v4544_v51 = vmul.f32 0.6931472, %v7345_v0 }
 0x684   :  { %v4408_v50 = vpop.xlane.xlu1 %4407  ;;  %v5285_v57 = vsub.f32 %v4643_v18, %v10398_v43 }
 0x685   :  { %v5632_v20 = vadd.f32 %v5631_v25, %v5630_v60  ;;  %v5633_v53 = vsel %vm5575_vm5, %v5280_v49, 0.0  ;;  %v4640_v56 = vadd.f32 %v4544_v51, %v9619_v46  ;;  %7356 = vlog2.f32 %v4408_v50  ;;  %v10401_v60 = vld [vmem:[#allocation49_spill] sm:$0xff]  ;;  %v10402_v51 = vld [vmem:[#allocation30_spill] sm:$0xff] }
 0x686   :  { %v7347_v3 = vpop.eup %7346  ;;  %7358 = vlog2.f32 %v4411_v6  ;;  %v5643_v4 = vsel %vm5575_vm5, %v5285_v57, 0.0 }
 0x687   :  { %v7349_v54 = vpop.eup %7348  ;;  %v5634_v2 = vadd.f32 %v5633_v53, %v5632_v20  ;;  %v5282_v10 = vsub.f32 %v4640_v56, %v10394_v45  ;;  %v4548_v27 = vmul.f32 0.6931472, %v7347_v3  ;;  %v4429_v45 = vpop.xlane.xlu0 %4428 }
 0x688   :  { %v4414_v46 = vpop.xlane.xlu1 %4413  ;;  %v4554_v17 = vmul.f32 0.6931472, %v7349_v54 }
 0x689   :  { %v5636_v58 = vadd.f32 %v5635_v14, %v5634_v2  ;;  %v5637_v42 = vsel %vm5575_vm5, %v5282_v10, 0.0  ;;  %v4642_v30 = vadd.f32 %v4548_v27, %v9639_v52  ;;  %7360 = vlog2.f32 %v4414_v46  ;;  %v10399_v52 = vld [vmem:[#allocation26_spill] sm:$0xff] }
 0x68a   :  { %v7351_v7 = vpop.eup %7350  ;;  %v4645_v39 = vadd.f32 %v4554_v17, %v10399_v52  ;;  %7362 = vlog2.f32 %v4417_v44  ;;  %v10404_v10 = vld [vmem:[#allocation10_spill] sm:$0xff]  ;;  %v10408_v44 = vld [vmem:[#allocation76_spill] sm:$0xff] }
 0x68b   :  { %v5638_v15 = vadd.f32 %v5637_v42, %v5636_v58  ;;  %v5284_v33 = vsub.f32 %v4642_v30, %v10397_v1  ;;  %v4552_v59 = vmul.f32 0.6931472, %v7351_v7 }
 0x68d   :  { %v5640_v35 = vadd.f32 %v5639_v36, %v5638_v15  ;;  %v5641_v5 = vsel %vm5575_vm5, %v5284_v33, 0.0  ;;  %v4644_v22 = vadd.f32 %v4552_v59, %v9665_v13  ;;  %v4420_v55 = vpop.xlane.xlu1 %4419  ;;  %v5287_v13 = vsub.f32 %v4645_v39, %v10401_v60  ;;  %v10406_v33 = vld [vmem:[#allocation15_spill] sm:$0xff] }
 0x68e   :  { %v7353_v21 = vpop.eup %7352  ;;  %7364 = vlog2.f32 %v4420_v55 }
 0x68f   :  { %v7355_v29 = vpop.eup %7354  ;;  %v5642_v32 = vadd.f32 %v5641_v5, %v5640_v35  ;;  %v5286_v62 = vsub.f32 %v4644_v22, %v10400_v26  ;;  %v4556_v23 = vmul.f32 0.6931472, %v7353_v21  ;;  %v5647_v12 = vsel %vm5575_vm5, %v5287_v13, 0.0  ;;  %v10407_v5 = vld [vmem:[#allocation23_spill] sm:$0xff] }
 0x690   :  { %v4558_v41 = vmul.f32 0.6931472, %v7355_v29  ;;  %7366 = vlog2.f32 %v4423_v31  ;;  %v10413_v31 = vld [vmem:[#allocation44_spill] sm:$0xff] }
 0x691   :  { %v5644_v19 = vadd.f32 %v5643_v4, %v5642_v32  ;;  %v5645_v9 = vsel %vm5575_vm5, %v5286_v62, 0.0  ;;  %v4646_v11 = vadd.f32 %v4556_v23, %v9693_v34  ;;  %v10409_v4 = vld [vmem:[#allocation19_spill] sm:$0xff] }
 0x692   :  { %v7357_v0 = vpop.eup %7356  ;;  %v4647_v28 = vadd.f32 %v4558_v41, %v10403_v48  ;;  %v10411_v41 = vld [vmem:[#allocation78_spill] sm:$0xff] }
 0x693   :  { %v5646_v49 = vadd.f32 %v5645_v9, %v5644_v19  ;;  %v5288_v25 = vsub.f32 %v4646_v11, %v10402_v51  ;;  %v4560_v8 = vmul.f32 0.6931472, %v7357_v0  ;;  %v7359_v50 = vpop.eup %7358  ;;  %v10410_v11 = vld [vmem:[#allocation36_spill] sm:$0xff] }
 0x694   :  { %v5289_v54 = vsub.f32 %v4647_v28, %v9727_v24  ;;  %v4562_v6 = vmul.f32 0.6931472, %v7359_v50 }
 0x695   :  { %v5648_v20 = vadd.f32 %v5647_v12, %v5646_v49  ;;  %v4426_v53 = vpop.xlane.xlu1 %4425  ;;  %v5649_v34 = vsel %vm5575_vm5, %v5288_v25, 0.0  ;;  %v4648_v56 = vadd.f32 %v4560_v8, %v9718_v40  ;;  %v4435_v40 = vpop.xlane.xlu0 %4434  ;;  %v10412_v12 = vld [vmem:[#allocation79_spill] sm:$0xff] }
 0x696   :  { %v7361_v3 = vpop.eup %7360  ;;  %7368 = vlog2.f32 %v4426_v53  ;;  %v5651_v61 = vsel %vm5575_vm5, %v5289_v54, 0.0  ;;  %v4649_v18 = vadd.f32 %v4562_v6, %v10405_v63  ;;  %v10415_v54 = vld [vmem:[#allocation81_spill] sm:$0xff] }
 0x697   :  { %v5650_v2 = vadd.f32 %v5649_v34, %v5648_v20  ;;  %v5290_v27 = vsub.f32 %v4648_v56, %v10404_v10  ;;  %v4564_v14 = vmul.f32 0.6931472, %v7361_v3  ;;  %v7363_v58 = vpop.eup %7362  ;;  %7370 = vlog2.f32 %v4429_v45  ;;  %v10414_v56 = vld [vmem:[#allocation29_spill] sm:$0xff] }
 0x698   :  { %v5291_v7 = vsub.f32 %v4649_v18, %v9742_v38  ;;  %v4566_v17 = vmul.f32 0.6931472, %v7363_v58  ;;  %v10417_v18 = vld [vmem:[#allocation46_spill] sm:$0xff] }
 0x699   :  { %v5652_v42 = vadd.f32 %v5651_v61, %v5650_v2  ;;  %v5653_v30 = vsel %vm5575_vm5, %v5290_v27, 0.0  ;;  %v4650_v24 = vadd.f32 %v4564_v14, %v9733_v16  ;;  %v4441_v1 = vpop.xlane.xlu0 %4440  ;;  %v10416_v61 = vld [vmem:[#allocation60_spill] sm:$0xff] }
 0x69a   :  { %v5655_v35 = vsel %vm5575_vm5, %v5291_v7, 0.0  ;;  %v4651_v22 = vadd.f32 %v4566_v17, %v10407_v5  ;;  %v10419_v7 = vld [vmem:[#allocation84_spill] sm:$0xff] }
 0x69b   :  { %v7365_v46 = vpop.eup %7364  ;;  %v5654_v15 = vadd.f32 %v5653_v30, %v5652_v42  ;;  %v5292_v59 = vsub.f32 %v4650_v24, %v10406_v33  ;;  %v10418_v24 = vld [vmem:[#allocation34_spill] sm:$0xff] }
 0x69c   :  { %v4568_v36 = vmul.f32 0.6931472, %v7365_v46  ;;  %v5293_v32 = vsub.f32 %v4651_v22, %v10408_v44  ;;  %v10421_v22 = vld [vmem:[#allocation74_spill] sm:$0xff]  ;;  %v10423_v44 = vld [vmem:[#allocation88_spill] sm:$0xff] }
 0x69d   :  { %v4432_v47 = vpop.xlane.xlu1 %4431  ;;  %v7367_v57 = vpop.eup %7366  ;;  %v5656_v16 = vadd.f32 %v5655_v35, %v5654_v15  ;;  %v5657_v39 = vsel %vm5575_vm5, %v5292_v59, 0.0  ;;  %v10420_v35 = vld [vmem:[#allocation86_spill] sm:$0xff] }
 0x69e   :  { %7372 = vlog2.f32 %v4432_v47  ;;  %v4447_v52 = vpop.xlane.xlu0 %4446  ;;  %v4652_v38 = vadd.f32 %v4568_v36, %v9748_v37  ;;  %v4570_v29 = vmul.f32 0.6931472, %v7367_v57  ;;  %v5659_v13 = vsel %vm5575_vm5, %v5293_v32, 0.0 }
 0x69f   :  { %7374 = vlog2.f32 %v4435_v40  ;;  %v5658_v62 = vadd.f32 %v5657_v39, %v5656_v16 }
 0x6a0   :  { %v5294_v19 = vsub.f32 %v4652_v38, %v10409_v4  ;;  %v4653_v55 = vadd.f32 %v4570_v29, %v10410_v11  ;;  %v10422_v38 = vld [vmem:[#allocation39_spill] sm:$0xff] }
 0x6a1   :  { %v5660_v37 = vadd.f32 %v5659_v13, %v5658_v62 }
 0x6a2   :  { %v4453_v0 = vpop.xlane.xlu0 %4452  ;;  %v5661_v25 = vsel %vm5575_vm5, %v5294_v19, 0.0  ;;  %v5295_v48 = vsub.f32 %v4653_v55, %v10412_v12  ;;  %v10425_v55 = vld [vmem:[#allocation75_spill] sm:$0xff] }
 0x6a3   :  { %v7369_v21 = vpop.eup %7368  ;;  %v5662_v53 = vadd.f32 %v5661_v25, %v5660_v37 }
 0x6a4   :  { %v4572_v26 = vmul.f32 0.6931472, %v7369_v21  ;;  %v7371_v23 = vpop.eup %7370  ;;  %v5663_v2 = vsel %vm5575_vm5, %v5295_v48, 0.0 }
 0x6a5   :  { %v4438_v43 = vpop.xlane.xlu1 %4437  ;;  %v4574_v51 = vmul.f32 0.6931472, %v7371_v23  ;;  %v5664_v47 = vadd.f32 %v5663_v2, %v5662_v53  ;;  %v10428_v53 = vld [vmem:[#allocation91_spill] sm:$0xff] }
 0x6a6   :  { %7376 = vlog2.f32 %v4438_v43  ;;  %v4654_v49 = vadd.f32 %v4572_v26, %v10411_v41  ;;  %v4459_v34 = vpop.xlane.xlu0 %4458 }
 0x6a7   :  { %7378 = vlog2.f32 %v4441_v1  ;;  %v4655_v3 = vadd.f32 %v4574_v51, %v10414_v56  ;;  %v10426_v51 = vld [vmem:[#allocation45_spill] sm:$0xff] }
 0x6a8   :  { %v5296_v50 = vsub.f32 %v4654_v49, %v10413_v31  ;;  %v10429_v56 = vld [vmem:[#allocation77_spill] sm:$0xff] }
 0x6a9   :  { %v5297_v63 = vsub.f32 %v4655_v3, %v10416_v61 }
 0x6aa   :  { %v5665_v27 = vsel %vm5575_vm5, %v5296_v50, 0.0  ;;  %v4465_v30 = vpop.xlane.xlu0 %4464 }
 0x6ab   :  { %v7373_v9 = vpop.eup %7372  ;;  %v5666_v40 = vadd.f32 %v5665_v27, %v5664_v47  ;;  %v5667_v1 = vsel %vm5575_vm5, %v5297_v63, 0.0 }
 0x6ac   :  { %v4576_v8 = vmul.f32 0.6931472, %v7373_v9  ;;  %v7375_v28 = vpop.eup %7374  ;;  %v10424_v9 = vld [vmem:[#allocation89_spill] sm:$0xff] }
 0x6ad   :  { %v4444_v60 = vpop.xlane.xlu1 %4443  ;;  %v4578_v10 = vmul.f32 0.6931472, %v7375_v28  ;;  %v5668_v43 = vadd.f32 %v5667_v1, %v5666_v40 }
 0x6ae   :  { %7380 = vlog2.f32 %v4444_v60  ;;  %v4656_v6 = vadd.f32 %v4576_v8, %v10415_v54  ;;  %v4471_v39 = vpop.xlane.xlu0 %4470  ;;  %v10427_v8 = vld [vmem:[#allocation90_spill] sm:$0xff] }
 0x6af   :  { %7382 = vlog2.f32 %v4447_v52  ;;  %v4657_v46 = vadd.f32 %v4578_v10, %v10418_v24  ;;  %v10430_v10 = vld [vmem:[#allocation80_spill] sm:$0xff] }
 0x6b0   :  { %v5298_v58 = vsub.f32 %v4656_v6, %v10417_v18  ;;  %v10431_v18 = vld [vmem:[#allocation92_spill] sm:$0xff] }
 0x6b1   :  { %v5299_v5 = vsub.f32 %v4657_v46, %v10420_v35 }
 0x6b2   :  { %v5669_v59 = vsel %vm5575_vm5, %v5298_v58, 0.0  ;;  %v4477_v49 = vpop.xlane.xlu0 %4476 }
 0x6b3   :  { %v7377_v20 = vpop.eup %7376  ;;  %v5670_v52 = vadd.f32 %v5669_v59, %v5668_v43  ;;  %v5671_v26 = vsel %vm5575_vm5, %v5299_v5, 0.0  ;;  %v10433_v59 = vld [vmem:[#allocation82_spill] sm:$0xff] }
 0x6b4   :  { %v4580_v14 = vmul.f32 0.6931472, %v7377_v20  ;;  %v7379_v42 = vpop.eup %7378 }
 0x6b5   :  { %v4450_v45 = vpop.xlane.xlu1 %4449  ;;  %v4582_v33 = vmul.f32 0.6931472, %v7379_v42  ;;  %v5672_v19 = vadd.f32 %v5671_v26, %v5670_v52  ;;  %v10434_v52 = vld [vmem:[#allocation20_spill] sm:$0xff] }
 0x6b6   :  { %7384 = vlog2.f32 %v4450_v45  ;;  %v4658_v17 = vadd.f32 %v4580_v14, %v10419_v7  ;;  %v5226_v2 = vpop.xlane.xlu0 %5225 }
 0x6b7   :  { %7386 = vlog2.f32 %v4453_v0  ;;  %v4659_v29 = vadd.f32 %v4582_v33, %v10422_v38 }
 0x6b8   :  { %v5300_v21 = vsub.f32 %v4658_v17, %v10421_v22 }
 0x6b9   :  { %v5301_v11 = vsub.f32 %v4659_v29, %v10424_v9 }
 0x6ba   :  { %v5673_v23 = vsel %vm5575_vm5, %v5300_v21, 0.0  ;;  %v5232_v17 = vpop.xlane.xlu0 %5231 }
 0x6bb   :  { %v7381_v15 = vpop.eup %7380  ;;  %v5674_v41 = vadd.f32 %v5673_v23, %v5672_v19  ;;  %v5675_v48 = vsel %vm5575_vm5, %v5301_v11, 0.0  ;;  %v10435_v19 = vld [vmem:[#allocation83_spill] sm:$0xff] }
 0x6bc   :  { %v4584_v36 = vmul.f32 0.6931472, %v7381_v15  ;;  %v7383_v16 = vpop.eup %7382 }
 0x6bd   :  { %v4456_v57 = vpop.xlane.xlu1 %4455  ;;  %v4586_v62 = vmul.f32 0.6931472, %v7383_v16  ;;  %v5676_v50 = vadd.f32 %v5675_v48, %v5674_v41 }
 0x6be   :  { %7388 = vlog2.f32 %v4456_v57  ;;  %v4660_v32 = vadd.f32 %v4584_v36, %v10423_v44 }
 0x6bf   :  { %7390 = vlog2.f32 %v4459_v34  ;;  %v4661_v25 = vadd.f32 %v4586_v62, %v10426_v51 }
 0x6c0   :  { %7392 = vlog2.f32 %v4465_v30  ;;  %v5302_v0 = vsub.f32 %v4660_v32, %v10425_v55  ;;  %v10432_v30 = vld [vmem:[#allocation18_spill] sm:$0xff]  ;;  %v5238_v32 = vpop.xlane.xlu0 %5237 }
 0x6c1   :  { %v5303_v34 = vsub.f32 %v4661_v25, %v10428_v53  ;;  %v10437_v25 = vld [vmem:[#allocation85_spill] sm:$0xff] }
 0x6c2   :  { %v5677_v31 = vsel %vm5575_vm5, %v5302_v0, 0.0 }
 0x6c3   :  { %v7385_v4 = vpop.eup %7384  ;;  %v5678_v6 = vadd.f32 %v5677_v31, %v5676_v50  ;;  %v5679_v61 = vsel %vm5575_vm5, %v5303_v34, 0.0  ;;  %v10438_v34 = vld [vmem:[#allocation27_spill] sm:$0xff] }
 0x6c4   :  { %v4588_v60 = vmul.f32 0.6931472, %v7385_v4  ;;  %v7387_v13 = vpop.eup %7386  ;;  %v5244_v50 = vpop.xlane.xlu0 %5243 }
 0x6c5   :  { %v4462_v37 = vpop.xlane.xlu1 %4461  ;;  %v4590_v28 = vmul.f32 0.6931472, %v7387_v13  ;;  %v5680_v40 = vadd.f32 %v5679_v61, %v5678_v6 }
 0x6c6   :  { %v4662_v12 = vadd.f32 %v4588_v60, %v10427_v8  ;;  %7394 = vlog2.f32 %v4462_v37  ;;  %v10436_v60 = vld [vmem:[#allocation22_spill] sm:$0xff] }
 0x6c7   :  { %7396 = vlog2.f32 %v4471_v39  ;;  %v4663_v27 = vadd.f32 %v4590_v28, %v10430_v10 }
 0x6c8   :  { %v5304_v3 = vsub.f32 %v4662_v12, %v10429_v56 }
 0x6c9   :  { %v4468_v20 = vpop.xlane.xlu1 %4467  ;;  %v5305_v24 = vsub.f32 %v4663_v27, %v10432_v30  ;;  %v5250_v30 = vpop.xlane.xlu0 %5249 }
 0x6ca   :  { %7398 = vlog2.f32 %v4468_v20  ;;  %v5681_v63 = vsel %vm5575_vm5, %v5304_v3, 0.0 }
 0x6cb   :  { %v7389_v54 = vpop.eup %7388  ;;  %7400 = vlog2.f32 %v4477_v49  ;;  %v5682_v1 = vadd.f32 %v5681_v63, %v5680_v40  ;;  %v5683_v5 = vsel %vm5575_vm5, %v5305_v24, 0.0 }
 0x6cc   :  { %v7391_v45 = vpop.eup %7390  ;;  %v4592_v14 = vmul.f32 0.6931472, %v7389_v54 }
 0x6cd   :  { %v4474_v47 = vpop.xlane.xlu1 %4473  ;;  %v4594_v42 = vmul.f32 0.6931472, %v7391_v45  ;;  %v7393_v7 = vpop.eup %7392  ;;  %v5684_v16 = vadd.f32 %v5683_v5, %v5682_v1 }
 0x6ce   :  { %v4664_v58 = vadd.f32 %v4592_v14, %v10431_v18  ;;  %7402 = vlog2.f32 %v4474_v47  ;;  %v4598_v57 = vmul.f32 0.6931472, %v7393_v7  ;;  %v10439_v14 = vld [vmem:[#allocation87_spill] sm:$0xff] }
 0x6cf   :  { %v4665_v36 = vadd.f32 %v4594_v42, %v10433_v59  ;;  %v10440_v18 = vld [vmem:[#allocation31_spill] sm:$0xff] }
 0x6d0   :  { %v5306_v46 = vsub.f32 %v4664_v58, %v5226_v2  ;;  %v4667_v9 = vadd.f32 %v4598_v57, %v10435_v19 }
 0x6d1   :  { %v4480_v15 = vpop.xlane.xlu1 %4479 }
 0x6d2   :  { %7404 = vlog2.f32 %v4480_v15  ;;  %v5685_v22 = vsel %vm5575_vm5, %v5306_v46, 0.0 }
 0x6d3   :  { %v7395_v33 = vpop.eup %7394  ;;  %v5686_v26 = vadd.f32 %v5685_v22, %v5684_v16 }
 0x6d4   :  { %v7397_v43 = vpop.eup %7396  ;;  %v4596_v35 = vmul.f32 0.6931472, %v7395_v33  ;;  %v7430_v33 = vmov 0.0  }
 0x6d5   :  { %v5229_v21 = vpop.xlane.xlu1 %5228  ;;  %v4602_v44 = vmul.f32 0.6931472, %v7397_v43  ;;  %53 = vst.msk [vmem:[#allocation2] sm:$0x1] %vm52_vm1, %v7430_v33 }
 0x6d6   :  { %v4666_v39 = vadd.f32 %v4596_v35, %v10434_v52  ;;  %v5307_v38 = vsub.f32 %v4665_v36, %v5229_v21 }
 0x6d7   :  { %v7399_v29 = vpop.eup %7398  ;;  %v4669_v8 = vadd.f32 %v4602_v44, %v10437_v25 }
 0x6d8   :  { %v5308_v62 = vsub.f32 %v4666_v39, %v5232_v17  ;;  %v4600_v23 = vmul.f32 0.6931472, %v7399_v29  ;;  %v5687_v4 = vsel %vm5575_vm5, %v5307_v38, 0.0  ;;  %v7401_v11 = vpop.eup %7400 }
 0x6d9   :  { %v5688_v55 = vadd.f32 %v5687_v4, %v5686_v26  ;;  %v5235_v0 = vpop.xlane.xlu1 %5234  ;;  %v4606_v12 = vmul.f32 0.6931472, %v7401_v11 }
 0x6da   :  { %v4668_v13 = vadd.f32 %v4600_v23, %v10436_v60  ;;  %v5309_v41 = vsub.f32 %v4667_v9, %v5235_v0  ;;  %v5689_v49 = vsel %vm5575_vm5, %v5308_v62, 0.0 }
 0x6db   :  { %v7403_v37 = vpop.eup %7402  ;;  %v5690_v51 = vadd.f32 %v5689_v49, %v5688_v55  ;;  %v4671_v47 = vadd.f32 %v4606_v12, %v10439_v14 }
 0x6dc   :  { %v5310_v48 = vsub.f32 %v4668_v13, %v5238_v32  ;;  %v4604_v28 = vmul.f32 0.6931472, %v7403_v37  ;;  %v5691_v31 = vsel %vm5575_vm5, %v5309_v41, 0.0  ;;  %v5574_v21 = vld [vmem:[#allocation2] sm:$0x1] }
 0x6dd   :  { %v5692_v20 = vadd.f32 %v5691_v31, %v5690_v51  ;;  %v5241_v53 = vpop.xlane.xlu1 %5240 }
 0x6de   :  { %v4670_v56 = vadd.f32 %v4604_v28, %v10438_v34  ;;  %v5311_v3 = vsub.f32 %v4669_v8, %v5241_v53  ;;  %v5693_v54 = vsel %vm5575_vm5, %v5310_v48, 0.0 }
 0x6df   :  { %v7405_v6 = vpop.eup %7404  ;;  %v5694_v2 = vadd.f32 %v5693_v54, %v5692_v20 }
 0x6e0   :  { %v5312_v45 = vsub.f32 %v4670_v56, %v5244_v50  ;;  %v4608_v10 = vmul.f32 0.6931472, %v7405_v6  ;;  %v5695_v27 = vsel %vm5575_vm5, %v5311_v3, 0.0 }
 0x6e1   :  { %v5696_v61 = vadd.f32 %v5695_v27, %v5694_v2  ;;  %v5247_v63 = vpop.xlane.xlu1 %5246 }
 0x6e2   :  { %v4672_v58 = vadd.f32 %v4608_v10, %v10440_v18  ;;  %v5313_v42 = vsub.f32 %v4671_v47, %v5247_v63  ;;  %v5697_v40 = vsel %vm5575_vm5, %v5312_v45, 0.0 }
 0x6e3   :  { %v5698_v24 = vadd.f32 %v5697_v40, %v5696_v61 }
 0x6e4   :  { %v5699_v46 = vsel %vm5575_vm5, %v5313_v42, 0.0  ;;  %v5314_v7 = vsub.f32 %v4672_v58, %v5250_v30 }
 0x6e5   :  { %v5700_v17 = vadd.f32 %v5699_v46, %v5698_v24 }
 0x6e6   :  { %v5701_v15 = vsel %vm5575_vm5, %v5314_v7, 0.0 }
 0x6e7   :  { %v5702_v1 = vadd.f32 %v5701_v15, %v5700_v17 }
 0x6e9   :  { %5703 = vadd.xlane.f32.xlu1 %v5702_v1 }
 0x772   :  { %v5704_v59 = vpop.xlane.xlu1 %5703 }
 0x773   :  { %v5705_v36 = vrot.slane %v5704_v59, 4 }
 0x775   :  { %v5706_v43 = vadd.f32 %v5705_v36, %v5704_v59 }
 0x777   :  { %v5707_v57 = vrot.slane %v5706_v43, 2 }
 0x779   :  { %v5708_v35 = vadd.f32 %v5707_v57, %v5706_v43 }
 0x77b   :  { %v5709_v5 = vrot.slane %v5708_v35, 1 }
 0x77d   :  { %v5710_v22 = vadd.f32 %v5709_v5, %v5708_v35 }
 0x77f   :  { %7143 = vpush %v5710_v22 }
 0x7b0   :  { %s7144_s13 = spop %7143 }
 0x7b1   :  { %v5712_v16 = vstv %s7144_s13 }
 0x7b2   :  { %v5713_v52 = vadd.f32 %v5712_v16, %v5574_v21 }
 0x7b4   :  { %5715 = vst.msk [vmem:[#allocation2] sm:$0x1] %vm52_vm1, %v5713_v52 }
 0x7bb   :  { %v5719_v39 = vld [vmem:[#allocation2] sm:$0x1] }
 0x7bc   :  { %v5721_v38 = vmul.f32 0.001953125, %v5719_v39 }
 0x7be   :  { %5722 = vst.msk [vmem:[#allocation2] sm:$0x1] %vm52_vm1, %v5721_v38 }
 0x7bf   :  { %7418 = shalt.err (!%p7415_p4)
}
 0x7c0   :  { %5732 = dma.vmem_to_hbm [thread:$0]  %s5730_s19, 16, %s10132_s14, [#allocation3]  }
 0x7c1   :  { %7427 = dma.done.wait [#allocation3], 16  }
 0x7c2   :  { %7428 = vsyncadd [#allocation3], 4294967280 }
 0x7c3   :  { %5736 = vsyncpa [#allocation3], 1 }

</bundles_post_ra>
